<compile_context>
chip_gen: v7x
topology: tpu7x:2x2x1
jax: 0.10.0
libtpu: 0.0.40
codegen_flags: <defaults>
</compile_context>

<pallas_src>
import math
from functools import partial

import jax
import jax.numpy as jnp
from jax.experimental import pallas as pl
from jax.experimental.pallas import tpu as pltpu  # noqa: F401  (kept for TPU-specific tuning hooks)

# ---- small config (same topology as ViT-B/16, scaled down) ----
PATCH = 16
IMG = 32
IN_CH = 3
NUM_LAYERS = 3
NUM_HEADS = 4
HIDDEN = 32
MLP_DIM = 64
HEAD_DIM = HIDDEN // NUM_HEADS
N_PATCH = (IMG // PATCH) ** 2          # 4 patches
SEQ = N_PATCH + 1                      # 5 real tokens (CLS + patches)
S_PAD = 8                              # padded to a full sublane tile
LN_EPS = 1e-6                          # torchvision ViT uses LayerNorm(eps=1e-6)


def _layernorm(x, w, b, eps=LN_EPS):
    mu = jnp.mean(x, axis=-1, keepdims=True)
    var = jnp.mean(jnp.square(x - mu), axis=-1, keepdims=True)
    return (x - mu) * jax.lax.rsqrt(var + eps) * w + b


# ------------------------- fully fused ViT forward kernel -------------------------
def _vit_kernel(tokpatch_ref, conv_w_ref, tokbias_ref,
                ln1w_ref, ln1b_ref, wqkv_ref, bqkv_ref, wo_ref, bo_ref,
                ln2w_ref, ln2b_ref, w1_ref, b1_ref, w2_ref, b2_ref,
                lnfw_ref, lnfb_ref, o_ref,
                *, num_layers, num_heads, head_dim, batch, s_pad, s_real):
    d = num_heads * head_dim
    t = batch * s_pad                                   # tokens, batch folded in
    inv_sqrt2 = 1.0 / math.sqrt(2.0)

    # --- patch embedding; CLS token, conv bias and pos-embed are folded into a
    #     precomputed per-slot token bias (padded slots are zero rows) ---
    x = jnp.dot(tokpatch_ref[...], conv_w_ref[...],
                preferred_element_type=jnp.float32)      # (T, D) f32
    x = (x.reshape(batch, s_pad, d) + tokbias_ref[...]).reshape(t, d)

    # --- key mask for the padded key columns (shared by all layers / heads) ---
    col = jax.lax.broadcasted_iota(jnp.int32, (s_pad, s_pad), 1)
    kmask = jnp.where(col < s_real, 0.0, -1e30).astype(jnp.float32)   # (S_pad, S_pad)

    for l in range(num_layers):                          # 3 layers, fully unrolled
        # ---------- self-attention block (pre-LN) ----------
        h = _layernorm(x, ln1w_ref[l], ln1b_ref[l])
        hb = h.astype(jnp.bfloat16)
        # single merged QKV matmul per layer (1/sqrt(hd) already folded into Q cols)
        qkv = jnp.dot(hb, wqkv_ref[l],
                      preferred_element_type=jnp.float32) + bqkv_ref[l]   # (T, 3D) f32
        oh_parts = []
        for hh in range(num_heads):                      # 8-lane slices, all intra-vreg
            off = hh * head_dim
            qb = qkv[:, off:off + head_dim].astype(jnp.bfloat16).reshape(batch, s_pad, head_dim)
            kb = qkv[:, d + off:d + off + head_dim].astype(jnp.bfloat16).reshape(batch, s_pad, head_dim)
            vb = qkv[:, 2 * d + off:2 * d + off + head_dim].astype(jnp.bfloat16).reshape(batch, s_pad, head_dim)
            s = jnp.einsum('bqc,bkc->bqk', qb, kb,
                           preferred_element_type=jnp.float32) + kmask
            s = s - jnp.max(s, axis=-1, keepdims=True)
            p = jnp.exp(s)
            p = p * pl.reciprocal(jnp.sum(p, axis=-1, keepdims=True), approx=True)
            oh = jnp.einsum('bqk,bkc->bqc', p.astype(jnp.bfloat16), vb,
                            preferred_element_type=jnp.float32)           # (B, S_pad, hd)
            oh_parts.append(oh.reshape(t, head_dim))
        # concatenated heads -> ONE out-proj matmul against the original (D, D) weight
        oh_all = jnp.concatenate(oh_parts, axis=-1).astype(jnp.bfloat16)  # (T, D)
        attn = jnp.dot(oh_all, wo_ref[l],
                       preferred_element_type=jnp.float32) + bo_ref[l]
        x = x + attn

        # ---------- MLP block (pre-LN), exact (erf) GELU like nn.GELU() ----------
        h2 = _layernorm(x, ln2w_ref[l], ln2b_ref[l])
        m = jnp.dot(h2.astype(jnp.bfloat16), w1_ref[l],
                    preferred_element_type=jnp.float32) + b1_ref[l]
        m = 0.5 * m * (1.0 + jax.lax.erf(m * inv_sqrt2))
        m = jnp.dot(m.astype(jnp.bfloat16), w2_ref[l],
                    preferred_element_type=jnp.float32) + b2_ref[l]
        x = x + m

    # ---------- epilogue: gather CLS rows, final LN + exact L2 normalize, one store ----------
    x_cls = x.reshape(batch, s_pad, d)[:, 0, :]          # (B, D) sublane-stride gather
    y = _layernorm(x_cls, lnfw_ref[...], lnfb_ref[...])
    nrm = jnp.sqrt(jnp.sum(y * y, axis=-1, keepdims=True))
    y = y / jnp.maximum(nrm, 1e-12)                      # exact divide (F.normalize semantics)
    o_ref[...] = y


# ------------------------- glue (reshapes / param setup) -------------------------
def patchify(x, patch):
    b, c, hh, ww = x.shape
    nh, nw = hh // patch, ww // patch
    x = x.reshape(b, c, nh, patch, nw, patch)
    x = x.transpose(0, 2, 4, 1, 3, 5)                   # (B, nh, nw, C, P, P)
    return x.reshape(b, nh * nw, c * patch * patch)     # matches Conv2d(C,D,P,P) flattening


def vit_forward(x, prep):
    b = x.shape[0]
    k = IN_CH * PATCH * PATCH
    patches = patchify(x, PATCH)                        # (B, N, K)
    # one zero row in front (CLS slot) + zero rows at the back (sequence padding)
    tokpatch = jnp.pad(patches, ((0, 0), (1, S_PAD - 1 - N_PATCH), (0, 0)))
    tokpatch = tokpatch.reshape(b * S_PAD, k).astype(jnp.bfloat16)

    kern = partial(_vit_kernel, num_layers=NUM_LAYERS, num_heads=NUM_HEADS,
                   head_dim=HEAD_DIM, batch=b, s_pad=S_PAD, s_real=SEQ)
    desc = pl.pallas_call(
        kern,
        out_shape=jax.ShapeDtypeStruct((b, HIDDEN), jnp.float32),
    )(tokpatch, prep["conv_w"], prep["tok_bias"],
      prep["ln1w"], prep["ln1b"],
      prep["wqkv"], prep["bqkv"],
      prep["wo"], prep["bo"],
      prep["ln2w"], prep["ln2b"],
      prep["w1"], prep["b1"], prep["w2"], prep["b2"],
      prep["lnf_w"], prep["lnf_b"])
    return {"global_desc": desc}


def prepare_params(params):
    """One-time restructuring: stack per-layer weights (leading L axis), keep the
    fused (D, 3D) QKV weight (head-major within each of Q/K/V) with the attention
    scale folded into the Q columns, fold CLS+conv-bias+pos-embed into a per-slot
    token bias, and cast matmul weights to bf16."""
    f32, bf16 = jnp.float32, jnp.bfloat16
    d = HIDDEN
    scale = 1.0 / math.sqrt(HEAD_DIM)

    pos = params["pos_emb"][0]                          # (SEQ, D)
    cls = params["cls_token"][0]                        # (1, D)
    tok_bias = jnp.zeros((S_PAD, d), f32)
    tok_bias = tok_bias.at[0:1, :].set(cls + pos[0:1, :])
    tok_bias = tok_bias.at[1:1 + N_PATCH, :].set(params["conv_b"] + pos[1:1 + N_PATCH, :])

    acc = {name: [] for name in
           ("ln1w", "ln1b", "wqkv", "bqkv", "wo", "bo",
            "ln2w", "ln2b", "w1", "b1", "w2", "b2")}
    for lp in params["layers"]:
        (l1w, l1b, qkvw, qkvb, ow, ob, l2w, l2b, fc1w, fc1b, fc2w, fc2b) = lp
        acc["ln1w"].append(l1w); acc["ln1b"].append(l1b)
        # fold 1/sqrt(head_dim) into the Q slice of the fused QKV weight/bias
        acc["wqkv"].append(jnp.concatenate([qkvw[:, :d] * scale, qkvw[:, d:]], axis=1))
        acc["bqkv"].append(jnp.concatenate([qkvb[:, :d] * scale, qkvb[:, d:]], axis=1))
        acc["wo"].append(ow)                             # original (D, D) out_proj weight
        acc["bo"].append(ob)
        acc["ln2w"].append(l2w); acc["ln2b"].append(l2b)
        acc["w1"].append(fc1w); acc["b1"].append(fc1b)
        acc["w2"].append(fc2w); acc["b2"].append(fc2b)

    stack = lambda name, dt: jnp.stack(acc[name]).astype(dt)
    return dict(
        conv_w=params["conv_w"].astype(bf16),
        tok_bias=tok_bias,
        ln1w=stack("ln1w", f32), ln1b=stack("ln1b", f32),
        wqkv=stack("wqkv", bf16), bqkv=stack("bqkv", f32),
        wo=stack("wo", bf16), bo=stack("bo", f32),
        ln2w=stack("ln2w", f32), ln2b=stack("ln2b", f32),
        w1=stack("w1", bf16), b1=stack("b1", f32),
        w2=stack("w2", bf16), b2=stack("b2", f32),
        lnf_w=params["ln_w"], lnf_b=params["ln_b"],
    )


def init_params(key):
    n = (IMG // PATCH) ** 2
    s = n + 1
    k = IN_CH * PATCH * PATCH
    keys = jax.random.split(key, 3 + NUM_LAYERS)

    def nrm(kk, shape, scale=0.02):
        return (scale * jax.random.normal(kk, shape)).astype(jnp.float32)

    params = {
        "conv_w": nrm(keys[0], (k, HIDDEN)),            # Conv2d weight, (D,C,P,P) flattened & transposed
        "conv_b": jnp.zeros((1, HIDDEN), jnp.float32),
        "cls_token": nrm(keys[1], (1, 1, HIDDEN)),
        "pos_emb": nrm(keys[2], (1, s, HIDDEN)),
        "ln_w": jnp.ones((1, HIDDEN), jnp.float32),
        "ln_b": jnp.zeros((1, HIDDEN), jnp.float32),
        "layers": [],
    }
    for i in range(NUM_LAYERS):
        lk = jax.random.split(keys[3 + i], 4)
        layer = (
            jnp.ones((1, HIDDEN), jnp.float32),          # ln1 weight
            jnp.zeros((1, HIDDEN), jnp.float32),         # ln1 bias
            nrm(lk[0], (HIDDEN, 3 * HIDDEN)),            # qkv in_proj weight (matmul layout, head-major)
            jnp.zeros((1, 3 * HIDDEN), jnp.float32),     # qkv in_proj bias
            nrm(lk[1], (HIDDEN, HIDDEN)),                # attn out_proj weight
            jnp.zeros((1, HIDDEN), jnp.float32),         # attn out_proj bias
            jnp.ones((1, HIDDEN), jnp.float32),          # ln2 weight
            jnp.zeros((1, HIDDEN), jnp.float32),         # ln2 bias
            nrm(lk[2], (HIDDEN, MLP_DIM)),               # mlp fc1 weight
            jnp.zeros((1, MLP_DIM), jnp.float32),        # mlp fc1 bias
            nrm(lk[3], (MLP_DIM, HIDDEN)),               # mlp fc2 weight
            jnp.zeros((1, HIDDEN), jnp.float32),         # mlp fc2 bias
        )
        params["layers"].append(layer)
    return params


if __name__ == "__main__":
    key = jax.random.PRNGKey(0)
    pkey, xkey = jax.random.split(key)
    params = init_params(pkey)
    prep = prepare_params(params)
    x = jax.random.normal(xkey, (2, IN_CH, IMG, IMG), dtype=jnp.float32)  # NCHW
    fwd = jax.jit(vit_forward)
    out = fwd(x, prep)
    jax.block_until_ready(out["global_desc"])
    assert out["global_desc"].shape == (2, HIDDEN)
    print("KERNEL_OK")
</pallas_src>

<mosaic_0001>
module attributes {stable_mosaic.version = 11 : i64} {
  func.func @_vit_kernel(%arg0: memref<16x768xbf16, #tpu.memory_space<vmem>>, %arg1: memref<768x32xbf16, #tpu.memory_space<vmem>>, %arg2: memref<8x32xf32, #tpu.memory_space<vmem>>, %arg3: memref<3x1x32xf32, #tpu.memory_space<vmem>>, %arg4: memref<3x1x32xf32, #tpu.memory_space<vmem>>, %arg5: memref<3x32x96xbf16, #tpu.memory_space<vmem>>, %arg6: memref<3x1x96xf32, #tpu.memory_space<vmem>>, %arg7: memref<3x32x32xbf16, #tpu.memory_space<vmem>>, %arg8: memref<3x1x32xf32, #tpu.memory_space<vmem>>, %arg9: memref<3x1x32xf32, #tpu.memory_space<vmem>>, %arg10: memref<3x1x32xf32, #tpu.memory_space<vmem>>, %arg11: memref<3x32x64xbf16, #tpu.memory_space<vmem>>, %arg12: memref<3x1x64xf32, #tpu.memory_space<vmem>>, %arg13: memref<3x64x32xbf16, #tpu.memory_space<vmem>>, %arg14: memref<3x1x32xf32, #tpu.memory_space<vmem>>, %arg15: memref<1x32xf32, #tpu.memory_space<vmem>>, %arg16: memref<1x32xf32, #tpu.memory_space<vmem>>, %arg17: memref<2x32xf32, #tpu.memory_space<vmem>>) attributes {dimension_semantics = [], scalar_prefetch = 0 : i64, scratch_operands = 0 : i64, tpu.core_type = #tpu.core_type<tc>} {
    %c0 = arith.constant 0 : index
    %c0_0 = arith.constant 0 : index
    %0 = vector.load %arg0[%c0, %c0_0] : memref<16x768xbf16, #tpu.memory_space<vmem>>, vector<16x768xbf16>
    %c0_1 = arith.constant 0 : index
    %c0_2 = arith.constant 0 : index
    %1 = vector.load %arg1[%c0_1, %c0_2] : memref<768x32xbf16, #tpu.memory_space<vmem>>, vector<768x32xbf16>
    %cst = arith.constant dense<0.000000e+00> : vector<16x32xf32>
    %2 = tpu.matmul %0, %1, %cst {dimension_numbers = #tpu.dot_dimension_numbers<[1], [0], [0], [1], [0, 0, 1, 1], [], []>} : vector<16x768xbf16>, vector<768x32xbf16>, vector<16x32xf32> -> vector<16x32xf32>
    %3 = vector.shape_cast %2 : vector<16x32xf32> to vector<2x8x32xf32>
    %c0_3 = arith.constant 0 : index
    %c0_4 = arith.constant 0 : index
    %4 = vector.load %arg2[%c0_3, %c0_4] : memref<8x32xf32, #tpu.memory_space<vmem>>, vector<8x32xf32>
    %5 = vector.shape_cast %4 : vector<8x32xf32> to vector<1x8x32xf32>
    %6 = vector.broadcast %5 : vector<1x8x32xf32> to vector<2x8x32xf32>
    %7 = arith.addf %3, %6 : vector<2x8x32xf32>
    %8 = vector.shape_cast %7 : vector<2x8x32xf32> to vector<16x32xf32>
    %9 = tpu.iota {dimensions = array<i32: 1>} : vector<8x8xi32>
    %c5_i32 = arith.constant 5 : i32
    %10 = vector.broadcast %c5_i32 : i32 to vector<8x8xi32>
    %11 = arith.cmpi slt, %9, %10 : vector<8x8xi32>
    %cst_5 = arith.constant 0.000000e+00 : f32
    %cst_6 = arith.constant -1.000000e+30 : f32
    %12 = vector.broadcast %cst_5 : f32 to vector<8x8xf32>
    %13 = vector.broadcast %cst_6 : f32 to vector<8x8xf32>
    %14 = arith.select %11, %12, %13 : vector<8x8xi1>, vector<8x8xf32>
    %c0_7 = arith.constant 0 : index
    %c0_8 = arith.constant 0 : index
    %c0_9 = arith.constant 0 : index
    %15 = vector.load %arg3[%c0_7, %c0_8, %c0_9] : memref<3x1x32xf32, #tpu.memory_space<vmem>>, vector<1x1x32xf32>
    %16 = vector.shape_cast %15 : vector<1x1x32xf32> to vector<1x32xf32>
    %c0_10 = arith.constant 0 : index
    %c0_11 = arith.constant 0 : index
    %c0_12 = arith.constant 0 : index
    %17 = vector.load %arg4[%c0_10, %c0_11, %c0_12] : memref<3x1x32xf32, #tpu.memory_space<vmem>>, vector<1x1x32xf32>
    %18 = vector.shape_cast %17 : vector<1x1x32xf32> to vector<1x32xf32>
    %cst_13 = arith.constant dense<0.000000e+00> : vector<16xf32>
    %19 = vector.multi_reduction <add>, %8, %cst_13 [1] : vector<16x32xf32> to vector<16xf32>
    %20 = vector.shape_cast %19 : vector<16xf32> to vector<16x1xf32>
    %cst_14 = arith.constant 3.200000e+01 : f32
    %21 = vector.broadcast %cst_14 : f32 to vector<16x1xf32>
    %22 = arith.divf %20, %21 : vector<16x1xf32>
    %23 = vector.broadcast %22 : vector<16x1xf32> to vector<16x32xf32>
    %24 = arith.subf %8, %23 : vector<16x32xf32>
    %25 = arith.mulf %24, %24 : vector<16x32xf32>
    %cst_15 = arith.constant dense<0.000000e+00> : vector<16xf32>
    %26 = vector.multi_reduction <add>, %25, %cst_15 [1] : vector<16x32xf32> to vector<16xf32>
    %27 = vector.shape_cast %26 : vector<16xf32> to vector<16x1xf32>
    %cst_16 = arith.constant 3.200000e+01 : f32
    %28 = vector.broadcast %cst_16 : f32 to vector<16x1xf32>
    %29 = arith.divf %27, %28 : vector<16x1xf32>
    %30 = vector.broadcast %22 : vector<16x1xf32> to vector<16x32xf32>
    %31 = arith.subf %8, %30 : vector<16x32xf32>
    %cst_17 = arith.constant 9.99999997E-7 : f32
    %32 = vector.broadcast %cst_17 : f32 to vector<16x1xf32>
    %33 = arith.addf %29, %32 : vector<16x1xf32>
    %34 = math.rsqrt %33 : vector<16x1xf32>
    %35 = vector.broadcast %34 : vector<16x1xf32> to vector<16x32xf32>
    %36 = arith.mulf %31, %35 : vector<16x32xf32>
    %37 = vector.broadcast %16 : vector<1x32xf32> to vector<16x32xf32>
    %38 = arith.mulf %36, %37 : vector<16x32xf32>
    %39 = vector.broadcast %18 : vector<1x32xf32> to vector<16x32xf32>
    %40 = arith.addf %38, %39 : vector<16x32xf32>
    %41 = arith.truncf %40 : vector<16x32xf32> to vector<16x32xbf16>
    %c0_18 = arith.constant 0 : index
    %c0_19 = arith.constant 0 : index
    %c0_20 = arith.constant 0 : index
    %42 = vector.load %arg5[%c0_18, %c0_19, %c0_20] : memref<3x32x96xbf16, #tpu.memory_space<vmem>>, vector<1x32x96xbf16>
    %43 = vector.shape_cast %42 : vector<1x32x96xbf16> to vector<32x96xbf16>
    %cst_21 = arith.constant dense<0.000000e+00> : vector<16x96xf32>
    %44 = tpu.matmul %41, %43, %cst_21 {dimension_numbers = #tpu.dot_dimension_numbers<[1], [0], [0], [1], [0, 0, 1, 1], [], []>} : vector<16x32xbf16>, vector<32x96xbf16>, vector<16x96xf32> -> vector<16x96xf32>
    %c0_22 = arith.constant 0 : index
    %c0_23 = arith.constant 0 : index
    %c0_24 = arith.constant 0 : index
    %45 = vector.load %arg6[%c0_22, %c0_23, %c0_24] : memref<3x1x96xf32, #tpu.memory_space<vmem>>, vector<1x1x96xf32>
    %46 = vector.shape_cast %45 : vector<1x1x96xf32> to vector<1x96xf32>
    %47 = vector.broadcast %46 : vector<1x96xf32> to vector<16x96xf32>
    %48 = arith.addf %44, %47 : vector<16x96xf32>
    %49 = vector.extract_strided_slice %48 {offsets = [0, 0], sizes = [16, 8], strides = [1, 1]} : vector<16x96xf32> to vector<16x8xf32>
    %50 = arith.truncf %49 : vector<16x8xf32> to vector<16x8xbf16>
    %51 = vector.shape_cast %50 : vector<16x8xbf16> to vector<2x8x8xbf16>
    %52 = vector.extract_strided_slice %48 {offsets = [0, 32], sizes = [16, 8], strides = [1, 1]} : vector<16x96xf32> to vector<16x8xf32>
    %53 = arith.truncf %52 : vector<16x8xf32> to vector<16x8xbf16>
    %54 = vector.shape_cast %53 : vector<16x8xbf16> to vector<2x8x8xbf16>
    %55 = vector.extract_strided_slice %48 {offsets = [0, 64], sizes = [16, 8], strides = [1, 1]} : vector<16x96xf32> to vector<16x8xf32>
    %56 = arith.truncf %55 : vector<16x8xf32> to vector<16x8xbf16>
    %57 = vector.shape_cast %56 : vector<16x8xbf16> to vector<2x8x8xbf16>
    "tpu.trace_start"() <{level = 10 : i32, message = "bqc,bkc->bqk"}> : () -> ()
    %cst_25 = arith.constant dense<0.000000e+00> : vector<2x8x8xf32>
    %58 = tpu.matmul %51, %54, %cst_25 {dimension_numbers = #tpu.dot_dimension_numbers<[2], [2], [1], [1], [0, 0, 0, 1, 1, 1], [0], [0]>} : vector<2x8x8xbf16>, vector<2x8x8xbf16>, vector<2x8x8xf32> -> vector<2x8x8xf32>
    "tpu.trace_stop"() : () -> ()
    %59 = vector.shape_cast %14 : vector<8x8xf32> to vector<1x8x8xf32>
    %60 = vector.broadcast %59 : vector<1x8x8xf32> to vector<2x8x8xf32>
    %61 = arith.addf %58, %60 : vector<2x8x8xf32>
    %cst_26 = arith.constant dense<0xFF800000> : vector<2x8xf32>
    %62 = vector.multi_reduction <maximumf>, %61, %cst_26 [2] : vector<2x8x8xf32> to vector<2x8xf32>
    %63 = vector.shape_cast %62 : vector<2x8xf32> to vector<2x8x1xf32>
    %64 = vector.broadcast %63 : vector<2x8x1xf32> to vector<2x8x8xf32>
    %65 = arith.subf %61, %64 : vector<2x8x8xf32>
    %66 = math.exp %65 : vector<2x8x8xf32>
    %cst_27 = arith.constant dense<0.000000e+00> : vector<2x8xf32>
    %67 = vector.multi_reduction <add>, %66, %cst_27 [2] : vector<2x8x8xf32> to vector<2x8xf32>
    %68 = vector.shape_cast %67 : vector<2x8xf32> to vector<2x8x1xf32>
    %69 = tpu.reciprocal %68 {approx = true} : vector<2x8x1xf32> -> vector<2x8x1xf32>
    %70 = vector.broadcast %69 : vector<2x8x1xf32> to vector<2x8x8xf32>
    %71 = arith.mulf %66, %70 : vector<2x8x8xf32>
    %72 = arith.truncf %71 : vector<2x8x8xf32> to vector<2x8x8xbf16>
    "tpu.trace_start"() <{level = 10 : i32, message = "bqk,bkc->bqc"}> : () -> ()
    %cst_28 = arith.constant dense<0.000000e+00> : vector<2x8x8xf32>
    %73 = tpu.matmul %72, %57, %cst_28 {dimension_numbers = #tpu.dot_dimension_numbers<[2], [1], [1], [2], [0, 0, 0, 1, 1, 2], [0], [0]>} : vector<2x8x8xbf16>, vector<2x8x8xbf16>, vector<2x8x8xf32> -> vector<2x8x8xf32>
    "tpu.trace_stop"() : () -> ()
    %74 = vector.shape_cast %73 : vector<2x8x8xf32> to vector<16x8xf32>
    %75 = vector.extract_strided_slice %48 {offsets = [0, 8], sizes = [16, 8], strides = [1, 1]} : vector<16x96xf32> to vector<16x8xf32>
    %76 = arith.truncf %75 : vector<16x8xf32> to vector<16x8xbf16>
    %77 = vector.shape_cast %76 : vector<16x8xbf16> to vector<2x8x8xbf16>
    %78 = vector.extract_strided_slice %48 {offsets = [0, 40], sizes = [16, 8], strides = [1, 1]} : vector<16x96xf32> to vector<16x8xf32>
    %79 = arith.truncf %78 : vector<16x8xf32> to vector<16x8xbf16>
    %80 = vector.shape_cast %79 : vector<16x8xbf16> to vector<2x8x8xbf16>
    %81 = vector.extract_strided_slice %48 {offsets = [0, 72], sizes = [16, 8], strides = [1, 1]} : vector<16x96xf32> to vector<16x8xf32>
    %82 = arith.truncf %81 : vector<16x8xf32> to vector<16x8xbf16>
    %83 = vector.shape_cast %82 : vector<16x8xbf16> to vector<2x8x8xbf16>
    "tpu.trace_start"() <{level = 10 : i32, message = "bqc,bkc->bqk"}> : () -> ()
    %cst_29 = arith.constant dense<0.000000e+00> : vector<2x8x8xf32>
    %84 = tpu.matmul %77, %80, %cst_29 {dimension_numbers = #tpu.dot_dimension_numbers<[2], [2], [1], [1], [0, 0, 0, 1, 1, 1], [0], [0]>} : vector<2x8x8xbf16>, vector<2x8x8xbf16>, vector<2x8x8xf32> -> vector<2x8x8xf32>
    "tpu.trace_stop"() : () -> ()
    %85 = vector.shape_cast %14 : vector<8x8xf32> to vector<1x8x8xf32>
    %86 = vector.broadcast %85 : vector<1x8x8xf32> to vector<2x8x8xf32>
    %87 = arith.addf %84, %86 : vector<2x8x8xf32>
    %cst_30 = arith.constant dense<0xFF800000> : vector<2x8xf32>
    %88 = vector.multi_reduction <maximumf>, %87, %cst_30 [2] : vector<2x8x8xf32> to vector<2x8xf32>
    %89 = vector.shape_cast %88 : vector<2x8xf32> to vector<2x8x1xf32>
    %90 = vector.broadcast %89 : vector<2x8x1xf32> to vector<2x8x8xf32>
    %91 = arith.subf %87, %90 : vector<2x8x8xf32>
    %92 = math.exp %91 : vector<2x8x8xf32>
    %cst_31 = arith.constant dense<0.000000e+00> : vector<2x8xf32>
    %93 = vector.multi_reduction <add>, %92, %cst_31 [2] : vector<2x8x8xf32> to vector<2x8xf32>
    %94 = vector.shape_cast %93 : vector<2x8xf32> to vector<2x8x1xf32>
    %95 = tpu.reciprocal %94 {approx = true} : vector<2x8x1xf32> -> vector<2x8x1xf32>
    %96 = vector.broadcast %95 : vector<2x8x1xf32> to vector<2x8x8xf32>
    %97 = arith.mulf %92, %96 : vector<2x8x8xf32>
    %98 = arith.truncf %97 : vector<2x8x8xf32> to vector<2x8x8xbf16>
    "tpu.trace_start"() <{level = 10 : i32, message = "bqk,bkc->bqc"}> : () -> ()
    %cst_32 = arith.constant dense<0.000000e+00> : vector<2x8x8xf32>
    %99 = tpu.matmul %98, %83, %cst_32 {dimension_numbers = #tpu.dot_dimension_numbers<[2], [1], [1], [2], [0, 0, 0, 1, 1, 2], [0], [0]>} : vector<2x8x8xbf16>, vector<2x8x8xbf16>, vector<2x8x8xf32> -> vector<2x8x8xf32>
    "tpu.trace_stop"() : () -> ()
    %100 = vector.shape_cast %99 : vector<2x8x8xf32> to vector<16x8xf32>
    %101 = vector.extract_strided_slice %48 {offsets = [0, 16], sizes = [16, 8], strides = [1, 1]} : vector<16x96xf32> to vector<16x8xf32>
    %102 = arith.truncf %101 : vector<16x8xf32> to vector<16x8xbf16>
    %103 = vector.shape_cast %102 : vector<16x8xbf16> to vector<2x8x8xbf16>
    %104 = vector.extract_strided_slice %48 {offsets = [0, 48], sizes = [16, 8], strides = [1, 1]} : vector<16x96xf32> to vector<16x8xf32>
    %105 = arith.truncf %104 : vector<16x8xf32> to vector<16x8xbf16>
    %106 = vector.shape_cast %105 : vector<16x8xbf16> to vector<2x8x8xbf16>
    %107 = vector.extract_strided_slice %48 {offsets = [0, 80], sizes = [16, 8], strides = [1, 1]} : vector<16x96xf32> to vector<16x8xf32>
    %108 = arith.truncf %107 : vector<16x8xf32> to vector<16x8xbf16>
    %109 = vector.shape_cast %108 : vector<16x8xbf16> to vector<2x8x8xbf16>
    "tpu.trace_start"() <{level = 10 : i32, message = "bqc,bkc->bqk"}> : () -> ()
    %cst_33 = arith.constant dense<0.000000e+00> : vector<2x8x8xf32>
    %110 = tpu.matmul %103, %106, %cst_33 {dimension_numbers = #tpu.dot_dimension_numbers<[2], [2], [1], [1], [0, 0, 0, 1, 1, 1], [0], [0]>} : vector<2x8x8xbf16>, vector<2x8x8xbf16>, vector<2x8x8xf32> -> vector<2x8x8xf32>
    "tpu.trace_stop"() : () -> ()
    %111 = vector.shape_cast %14 : vector<8x8xf32> to vector<1x8x8xf32>
    %112 = vector.broadcast %111 : vector<1x8x8xf32> to vector<2x8x8xf32>
    %113 = arith.addf %110, %112 : vector<2x8x8xf32>
    %cst_34 = arith.constant dense<0xFF800000> : vector<2x8xf32>
    %114 = vector.multi_reduction <maximumf>, %113, %cst_34 [2] : vector<2x8x8xf32> to vector<2x8xf32>
    %115 = vector.shape_cast %114 : vector<2x8xf32> to vector<2x8x1xf32>
    %116 = vector.broadcast %115 : vector<2x8x1xf32> to vector<2x8x8xf32>
    %117 = arith.subf %113, %116 : vector<2x8x8xf32>
    %118 = math.exp %117 : vector<2x8x8xf32>
    %cst_35 = arith.constant dense<0.000000e+00> : vector<2x8xf32>
    %119 = vector.multi_reduction <add>, %118, %cst_35 [2] : vector<2x8x8xf32> to vector<2x8xf32>
    %120 = vector.shape_cast %119 : vector<2x8xf32> to vector<2x8x1xf32>
    %121 = tpu.reciprocal %120 {approx = true} : vector<2x8x1xf32> -> vector<2x8x1xf32>
    %122 = vector.broadcast %121 : vector<2x8x1xf32> to vector<2x8x8xf32>
    %123 = arith.mulf %118, %122 : vector<2x8x8xf32>
    %124 = arith.truncf %123 : vector<2x8x8xf32> to vector<2x8x8xbf16>
    "tpu.trace_start"() <{level = 10 : i32, message = "bqk,bkc->bqc"}> : () -> ()
    %cst_36 = arith.constant dense<0.000000e+00> : vector<2x8x8xf32>
    %125 = tpu.matmul %124, %109, %cst_36 {dimension_numbers = #tpu.dot_dimension_numbers<[2], [1], [1], [2], [0, 0, 0, 1, 1, 2], [0], [0]>} : vector<2x8x8xbf16>, vector<2x8x8xbf16>, vector<2x8x8xf32> -> vector<2x8x8xf32>
    "tpu.trace_stop"() : () -> ()
    %126 = vector.shape_cast %125 : vector<2x8x8xf32> to vector<16x8xf32>
    %127 = vector.extract_strided_slice %48 {offsets = [0, 24], sizes = [16, 8], strides = [1, 1]} : vector<16x96xf32> to vector<16x8xf32>
    %128 = arith.truncf %127 : vector<16x8xf32> to vector<16x8xbf16>
    %129 = vector.shape_cast %128 : vector<16x8xbf16> to vector<2x8x8xbf16>
    %130 = vector.extract_strided_slice %48 {offsets = [0, 56], sizes = [16, 8], strides = [1, 1]} : vector<16x96xf32> to vector<16x8xf32>
    %131 = arith.truncf %130 : vector<16x8xf32> to vector<16x8xbf16>
    %132 = vector.shape_cast %131 : vector<16x8xbf16> to vector<2x8x8xbf16>
    %133 = vector.extract_strided_slice %48 {offsets = [0, 88], sizes = [16, 8], strides = [1, 1]} : vector<16x96xf32> to vector<16x8xf32>
    %134 = arith.truncf %133 : vector<16x8xf32> to vector<16x8xbf16>
    %135 = vector.shape_cast %134 : vector<16x8xbf16> to vector<2x8x8xbf16>
    "tpu.trace_start"() <{level = 10 : i32, message = "bqc,bkc->bqk"}> : () -> ()
    %cst_37 = arith.constant dense<0.000000e+00> : vector<2x8x8xf32>
    %136 = tpu.matmul %129, %132, %cst_37 {dimension_numbers = #tpu.dot_dimension_numbers<[2], [2], [1], [1], [0, 0, 0, 1, 1, 1], [0], [0]>} : vector<2x8x8xbf16>, vector<2x8x8xbf16>, vector<2x8x8xf32> -> vector<2x8x8xf32>
    "tpu.trace_stop"() : () -> ()
    %137 = vector.shape_cast %14 : vector<8x8xf32> to vector<1x8x8xf32>
    %138 = vector.broadcast %137 : vector<1x8x8xf32> to vector<2x8x8xf32>
    %139 = arith.addf %136, %138 : vector<2x8x8xf32>
    %cst_38 = arith.constant dense<0xFF800000> : vector<2x8xf32>
    %140 = vector.multi_reduction <maximumf>, %139, %cst_38 [2] : vector<2x8x8xf32> to vector<2x8xf32>
    %141 = vector.shape_cast %140 : vector<2x8xf32> to vector<2x8x1xf32>
    %142 = vector.broadcast %141 : vector<2x8x1xf32> to vector<2x8x8xf32>
    %143 = arith.subf %139, %142 : vector<2x8x8xf32>
    %144 = math.exp %143 : vector<2x8x8xf32>
    %cst_39 = arith.constant dense<0.000000e+00> : vector<2x8xf32>
    %145 = vector.multi_reduction <add>, %144, %cst_39 [2] : vector<2x8x8xf32> to vector<2x8xf32>
    %146 = vector.shape_cast %145 : vector<2x8xf32> to vector<2x8x1xf32>
    %147 = tpu.reciprocal %146 {approx = true} : vector<2x8x1xf32> -> vector<2x8x1xf32>
    %148 = vector.broadcast %147 : vector<2x8x1xf32> to vector<2x8x8xf32>
    %149 = arith.mulf %144, %148 : vector<2x8x8xf32>
    %150 = arith.truncf %149 : vector<2x8x8xf32> to vector<2x8x8xbf16>
    "tpu.trace_start"() <{level = 10 : i32, message = "bqk,bkc->bqc"}> : () -> ()
    %cst_40 = arith.constant dense<0.000000e+00> : vector<2x8x8xf32>
    %151 = tpu.matmul %150, %135, %cst_40 {dimension_numbers = #tpu.dot_dimension_numbers<[2], [1], [1], [2], [0, 0, 0, 1, 1, 2], [0], [0]>} : vector<2x8x8xbf16>, vector<2x8x8xbf16>, vector<2x8x8xf32> -> vector<2x8x8xf32>
    "tpu.trace_stop"() : () -> ()
    %152 = vector.shape_cast %151 : vector<2x8x8xf32> to vector<16x8xf32>
    %153 = tpu.concatenate %74, %100, %126, %152 in 1 : vector<16x8xf32>, vector<16x8xf32>, vector<16x8xf32>, vector<16x8xf32> -> vector<16x32xf32>
    %154 = arith.truncf %153 : vector<16x32xf32> to vector<16x32xbf16>
    %c0_41 = arith.constant 0 : index
    %c0_42 = arith.constant 0 : index
    %c0_43 = arith.constant 0 : index
    %155 = vector.load %arg7[%c0_41, %c0_42, %c0_43] : memref<3x32x32xbf16, #tpu.memory_space<vmem>>, vector<1x32x32xbf16>
    %156 = vector.shape_cast %155 : vector<1x32x32xbf16> to vector<32x32xbf16>
    %cst_44 = arith.constant dense<0.000000e+00> : vector<16x32xf32>
    %157 = tpu.matmul %154, %156, %cst_44 {dimension_numbers = #tpu.dot_dimension_numbers<[1], [0], [0], [1], [0, 0, 1, 1], [], []>} : vector<16x32xbf16>, vector<32x32xbf16>, vector<16x32xf32> -> vector<16x32xf32>
    %c0_45 = arith.constant 0 : index
    %c0_46 = arith.constant 0 : index
    %c0_47 = arith.constant 0 : index
    %158 = vector.load %arg8[%c0_45, %c0_46, %c0_47] : memref<3x1x32xf32, #tpu.memory_space<vmem>>, vector<1x1x32xf32>
    %159 = vector.shape_cast %158 : vector<1x1x32xf32> to vector<1x32xf32>
    %160 = vector.broadcast %159 : vector<1x32xf32> to vector<16x32xf32>
    %161 = arith.addf %157, %160 : vector<16x32xf32>
    %162 = arith.addf %8, %161 : vector<16x32xf32>
    %c0_48 = arith.constant 0 : index
    %c0_49 = arith.constant 0 : index
    %c0_50 = arith.constant 0 : index
    %163 = vector.load %arg9[%c0_48, %c0_49, %c0_50] : memref<3x1x32xf32, #tpu.memory_space<vmem>>, vector<1x1x32xf32>
    %164 = vector.shape_cast %163 : vector<1x1x32xf32> to vector<1x32xf32>
    %c0_51 = arith.constant 0 : index
    %c0_52 = arith.constant 0 : index
    %c0_53 = arith.constant 0 : index
    %165 = vector.load %arg10[%c0_51, %c0_52, %c0_53] : memref<3x1x32xf32, #tpu.memory_space<vmem>>, vector<1x1x32xf32>
    %166 = vector.shape_cast %165 : vector<1x1x32xf32> to vector<1x32xf32>
    %cst_54 = arith.constant dense<0.000000e+00> : vector<16xf32>
    %167 = vector.multi_reduction <add>, %162, %cst_54 [1] : vector<16x32xf32> to vector<16xf32>
    %168 = vector.shape_cast %167 : vector<16xf32> to vector<16x1xf32>
    %cst_55 = arith.constant 3.200000e+01 : f32
    %169 = vector.broadcast %cst_55 : f32 to vector<16x1xf32>
    %170 = arith.divf %168, %169 : vector<16x1xf32>
    %171 = vector.broadcast %170 : vector<16x1xf32> to vector<16x32xf32>
    %172 = arith.subf %162, %171 : vector<16x32xf32>
    %173 = arith.mulf %172, %172 : vector<16x32xf32>
    %cst_56 = arith.constant dense<0.000000e+00> : vector<16xf32>
    %174 = vector.multi_reduction <add>, %173, %cst_56 [1] : vector<16x32xf32> to vector<16xf32>
    %175 = vector.shape_cast %174 : vector<16xf32> to vector<16x1xf32>
    %cst_57 = arith.constant 3.200000e+01 : f32
    %176 = vector.broadcast %cst_57 : f32 to vector<16x1xf32>
    %177 = arith.divf %175, %176 : vector<16x1xf32>
    %178 = vector.broadcast %170 : vector<16x1xf32> to vector<16x32xf32>
    %179 = arith.subf %162, %178 : vector<16x32xf32>
    %cst_58 = arith.constant 9.99999997E-7 : f32
    %180 = vector.broadcast %cst_58 : f32 to vector<16x1xf32>
    %181 = arith.addf %177, %180 : vector<16x1xf32>
    %182 = math.rsqrt %181 : vector<16x1xf32>
    %183 = vector.broadcast %182 : vector<16x1xf32> to vector<16x32xf32>
    %184 = arith.mulf %179, %183 : vector<16x32xf32>
    %185 = vector.broadcast %164 : vector<1x32xf32> to vector<16x32xf32>
    %186 = arith.mulf %184, %185 : vector<16x32xf32>
    %187 = vector.broadcast %166 : vector<1x32xf32> to vector<16x32xf32>
    %188 = arith.addf %186, %187 : vector<16x32xf32>
    %189 = arith.truncf %188 : vector<16x32xf32> to vector<16x32xbf16>
    %c0_59 = arith.constant 0 : index
    %c0_60 = arith.constant 0 : index
    %c0_61 = arith.constant 0 : index
    %190 = vector.load %arg11[%c0_59, %c0_60, %c0_61] : memref<3x32x64xbf16, #tpu.memory_space<vmem>>, vector<1x32x64xbf16>
    %191 = vector.shape_cast %190 : vector<1x32x64xbf16> to vector<32x64xbf16>
    %cst_62 = arith.constant dense<0.000000e+00> : vector<16x64xf32>
    %192 = tpu.matmul %189, %191, %cst_62 {dimension_numbers = #tpu.dot_dimension_numbers<[1], [0], [0], [1], [0, 0, 1, 1], [], []>} : vector<16x32xbf16>, vector<32x64xbf16>, vector<16x64xf32> -> vector<16x64xf32>
    %c0_63 = arith.constant 0 : index
    %c0_64 = arith.constant 0 : index
    %c0_65 = arith.constant 0 : index
    %193 = vector.load %arg12[%c0_63, %c0_64, %c0_65] : memref<3x1x64xf32, #tpu.memory_space<vmem>>, vector<1x1x64xf32>
    %194 = vector.shape_cast %193 : vector<1x1x64xf32> to vector<1x64xf32>
    %195 = vector.broadcast %194 : vector<1x64xf32> to vector<16x64xf32>
    %196 = arith.addf %192, %195 : vector<16x64xf32>
    %cst_66 = arith.constant 5.000000e-01 : f32
    %197 = vector.broadcast %cst_66 : f32 to vector<16x64xf32>
    %198 = arith.mulf %197, %196 : vector<16x64xf32>
    %cst_67 = arith.constant 0.707106769 : f32
    %199 = vector.broadcast %cst_67 : f32 to vector<16x64xf32>
    %200 = arith.mulf %196, %199 : vector<16x64xf32>
    %201 = math.erf %200 : vector<16x64xf32>
    %cst_68 = arith.constant 1.000000e+00 : f32
    %202 = vector.broadcast %cst_68 : f32 to vector<16x64xf32>
    %203 = arith.addf %202, %201 : vector<16x64xf32>
    %204 = arith.mulf %198, %203 : vector<16x64xf32>
    %205 = arith.truncf %204 : vector<16x64xf32> to vector<16x64xbf16>
    %c0_69 = arith.constant 0 : index
    %c0_70 = arith.constant 0 : index
    %c0_71 = arith.constant 0 : index
    %206 = vector.load %arg13[%c0_69, %c0_70, %c0_71] : memref<3x64x32xbf16, #tpu.memory_space<vmem>>, vector<1x64x32xbf16>
    %207 = vector.shape_cast %206 : vector<1x64x32xbf16> to vector<64x32xbf16>
    %cst_72 = arith.constant dense<0.000000e+00> : vector<16x32xf32>
    %208 = tpu.matmul %205, %207, %cst_72 {dimension_numbers = #tpu.dot_dimension_numbers<[1], [0], [0], [1], [0, 0, 1, 1], [], []>} : vector<16x64xbf16>, vector<64x32xbf16>, vector<16x32xf32> -> vector<16x32xf32>
    %c0_73 = arith.constant 0 : index
    %c0_74 = arith.constant 0 : index
    %c0_75 = arith.constant 0 : index
    %209 = vector.load %arg14[%c0_73, %c0_74, %c0_75] : memref<3x1x32xf32, #tpu.memory_space<vmem>>, vector<1x1x32xf32>
    %210 = vector.shape_cast %209 : vector<1x1x32xf32> to vector<1x32xf32>
    %211 = vector.broadcast %210 : vector<1x32xf32> to vector<16x32xf32>
    %212 = arith.addf %208, %211 : vector<16x32xf32>
    %213 = arith.addf %162, %212 : vector<16x32xf32>
    %c1 = arith.constant 1 : index
    %c0_76 = arith.constant 0 : index
    %c0_77 = arith.constant 0 : index
    %214 = vector.load %arg3[%c1, %c0_76, %c0_77] : memref<3x1x32xf32, #tpu.memory_space<vmem>>, vector<1x1x32xf32>
    %215 = vector.shape_cast %214 : vector<1x1x32xf32> to vector<1x32xf32>
    %c1_78 = arith.constant 1 : index
    %c0_79 = arith.constant 0 : index
    %c0_80 = arith.constant 0 : index
    %216 = vector.load %arg4[%c1_78, %c0_79, %c0_80] : memref<3x1x32xf32, #tpu.memory_space<vmem>>, vector<1x1x32xf32>
    %217 = vector.shape_cast %216 : vector<1x1x32xf32> to vector<1x32xf32>
    %cst_81 = arith.constant dense<0.000000e+00> : vector<16xf32>
    %218 = vector.multi_reduction <add>, %213, %cst_81 [1] : vector<16x32xf32> to vector<16xf32>
    %219 = vector.shape_cast %218 : vector<16xf32> to vector<16x1xf32>
    %cst_82 = arith.constant 3.200000e+01 : f32
    %220 = vector.broadcast %cst_82 : f32 to vector<16x1xf32>
    %221 = arith.divf %219, %220 : vector<16x1xf32>
    %222 = vector.broadcast %221 : vector<16x1xf32> to vector<16x32xf32>
    %223 = arith.subf %213, %222 : vector<16x32xf32>
    %224 = arith.mulf %223, %223 : vector<16x32xf32>
    %cst_83 = arith.constant dense<0.000000e+00> : vector<16xf32>
    %225 = vector.multi_reduction <add>, %224, %cst_83 [1] : vector<16x32xf32> to vector<16xf32>
    %226 = vector.shape_cast %225 : vector<16xf32> to vector<16x1xf32>
    %cst_84 = arith.constant 3.200000e+01 : f32
    %227 = vector.broadcast %cst_84 : f32 to vector<16x1xf32>
    %228 = arith.divf %226, %227 : vector<16x1xf32>
    %229 = vector.broadcast %221 : vector<16x1xf32> to vector<16x32xf32>
    %230 = arith.subf %213, %229 : vector<16x32xf32>
    %cst_85 = arith.constant 9.99999997E-7 : f32
    %231 = vector.broadcast %cst_85 : f32 to vector<16x1xf32>
    %232 = arith.addf %228, %231 : vector<16x1xf32>
    %233 = math.rsqrt %232 : vector<16x1xf32>
    %234 = vector.broadcast %233 : vector<16x1xf32> to vector<16x32xf32>
    %235 = arith.mulf %230, %234 : vector<16x32xf32>
    %236 = vector.broadcast %215 : vector<1x32xf32> to vector<16x32xf32>
    %237 = arith.mulf %235, %236 : vector<16x32xf32>
    %238 = vector.broadcast %217 : vector<1x32xf32> to vector<16x32xf32>
    %239 = arith.addf %237, %238 : vector<16x32xf32>
    %240 = arith.truncf %239 : vector<16x32xf32> to vector<16x32xbf16>
    %c1_86 = arith.constant 1 : index
    %c0_87 = arith.constant 0 : index
    %c0_88 = arith.constant 0 : index
    %241 = vector.load %arg5[%c1_86, %c0_87, %c0_88] : memref<3x32x96xbf16, #tpu.memory_space<vmem>>, vector<1x32x96xbf16>
    %242 = vector.shape_cast %241 : vector<1x32x96xbf16> to vector<32x96xbf16>
    %cst_89 = arith.constant dense<0.000000e+00> : vector<16x96xf32>
    %243 = tpu.matmul %240, %242, %cst_89 {dimension_numbers = #tpu.dot_dimension_numbers<[1], [0], [0], [1], [0, 0, 1, 1], [], []>} : vector<16x32xbf16>, vector<32x96xbf16>, vector<16x96xf32> -> vector<16x96xf32>
    %c1_90 = arith.constant 1 : index
    %c0_91 = arith.constant 0 : index
    %c0_92 = arith.constant 0 : index
    %244 = vector.load %arg6[%c1_90, %c0_91, %c0_92] : memref<3x1x96xf32, #tpu.memory_space<vmem>>, vector<1x1x96xf32>
    %245 = vector.shape_cast %244 : vector<1x1x96xf32> to vector<1x96xf32>
    %246 = vector.broadcast %245 : vector<1x96xf32> to vector<16x96xf32>
    %247 = arith.addf %243, %246 : vector<16x96xf32>
    %248 = vector.extract_strided_slice %247 {offsets = [0, 0], sizes = [16, 8], strides = [1, 1]} : vector<16x96xf32> to vector<16x8xf32>
    %249 = arith.truncf %248 : vector<16x8xf32> to vector<16x8xbf16>
    %250 = vector.shape_cast %249 : vector<16x8xbf16> to vector<2x8x8xbf16>
    %251 = vector.extract_strided_slice %247 {offsets = [0, 32], sizes = [16, 8], strides = [1, 1]} : vector<16x96xf32> to vector<16x8xf32>
    %252 = arith.truncf %251 : vector<16x8xf32> to vector<16x8xbf16>
    %253 = vector.shape_cast %252 : vector<16x8xbf16> to vector<2x8x8xbf16>
    %254 = vector.extract_strided_slice %247 {offsets = [0, 64], sizes = [16, 8], strides = [1, 1]} : vector<16x96xf32> to vector<16x8xf32>
    %255 = arith.truncf %254 : vector<16x8xf32> to vector<16x8xbf16>
    %256 = vector.shape_cast %255 : vector<16x8xbf16> to vector<2x8x8xbf16>
    "tpu.trace_start"() <{level = 10 : i32, message = "bqc,bkc->bqk"}> : () -> ()
    %cst_93 = arith.constant dense<0.000000e+00> : vector<2x8x8xf32>
    %257 = tpu.matmul %250, %253, %cst_93 {dimension_numbers = #tpu.dot_dimension_numbers<[2], [2], [1], [1], [0, 0, 0, 1, 1, 1], [0], [0]>} : vector<2x8x8xbf16>, vector<2x8x8xbf16>, vector<2x8x8xf32> -> vector<2x8x8xf32>
    "tpu.trace_stop"() : () -> ()
    %258 = vector.shape_cast %14 : vector<8x8xf32> to vector<1x8x8xf32>
    %259 = vector.broadcast %258 : vector<1x8x8xf32> to vector<2x8x8xf32>
    %260 = arith.addf %257, %259 : vector<2x8x8xf32>
    %cst_94 = arith.constant dense<0xFF800000> : vector<2x8xf32>
    %261 = vector.multi_reduction <maximumf>, %260, %cst_94 [2] : vector<2x8x8xf32> to vector<2x8xf32>
    %262 = vector.shape_cast %261 : vector<2x8xf32> to vector<2x8x1xf32>
    %263 = vector.broadcast %262 : vector<2x8x1xf32> to vector<2x8x8xf32>
    %264 = arith.subf %260, %263 : vector<2x8x8xf32>
    %265 = math.exp %264 : vector<2x8x8xf32>
    %cst_95 = arith.constant dense<0.000000e+00> : vector<2x8xf32>
    %266 = vector.multi_reduction <add>, %265, %cst_95 [2] : vector<2x8x8xf32> to vector<2x8xf32>
    %267 = vector.shape_cast %266 : vector<2x8xf32> to vector<2x8x1xf32>
    %268 = tpu.reciprocal %267 {approx = true} : vector<2x8x1xf32> -> vector<2x8x1xf32>
    %269 = vector.broadcast %268 : vector<2x8x1xf32> to vector<2x8x8xf32>
    %270 = arith.mulf %265, %269 : vector<2x8x8xf32>
    %271 = arith.truncf %270 : vector<2x8x8xf32> to vector<2x8x8xbf16>
    "tpu.trace_start"() <{level = 10 : i32, message = "bqk,bkc->bqc"}> : () -> ()
    %cst_96 = arith.constant dense<0.000000e+00> : vector<2x8x8xf32>
    %272 = tpu.matmul %271, %256, %cst_96 {dimension_numbers = #tpu.dot_dimension_numbers<[2], [1], [1], [2], [0, 0, 0, 1, 1, 2], [0], [0]>} : vector<2x8x8xbf16>, vector<2x8x8xbf16>, vector<2x8x8xf32> -> vector<2x8x8xf32>
    "tpu.trace_stop"() : () -> ()
    %273 = vector.shape_cast %272 : vector<2x8x8xf32> to vector<16x8xf32>
    %274 = vector.extract_strided_slice %247 {offsets = [0, 8], sizes = [16, 8], strides = [1, 1]} : vector<16x96xf32> to vector<16x8xf32>
    %275 = arith.truncf %274 : vector<16x8xf32> to vector<16x8xbf16>
    %276 = vector.shape_cast %275 : vector<16x8xbf16> to vector<2x8x8xbf16>
    %277 = vector.extract_strided_slice %247 {offsets = [0, 40], sizes = [16, 8], strides = [1, 1]} : vector<16x96xf32> to vector<16x8xf32>
    %278 = arith.truncf %277 : vector<16x8xf32> to vector<16x8xbf16>
    %279 = vector.shape_cast %278 : vector<16x8xbf16> to vector<2x8x8xbf16>
    %280 = vector.extract_strided_slice %247 {offsets = [0, 72], sizes = [16, 8], strides = [1, 1]} : vector<16x96xf32> to vector<16x8xf32>
    %281 = arith.truncf %280 : vector<16x8xf32> to vector<16x8xbf16>
    %282 = vector.shape_cast %281 : vector<16x8xbf16> to vector<2x8x8xbf16>
    "tpu.trace_start"() <{level = 10 : i32, message = "bqc,bkc->bqk"}> : () -> ()
    %cst_97 = arith.constant dense<0.000000e+00> : vector<2x8x8xf32>
    %283 = tpu.matmul %276, %279, %cst_97 {dimension_numbers = #tpu.dot_dimension_numbers<[2], [2], [1], [1], [0, 0, 0, 1, 1, 1], [0], [0]>} : vector<2x8x8xbf16>, vector<2x8x8xbf16>, vector<2x8x8xf32> -> vector<2x8x8xf32>
    "tpu.trace_stop"() : () -> ()
    %284 = vector.shape_cast %14 : vector<8x8xf32> to vector<1x8x8xf32>
    %285 = vector.broadcast %284 : vector<1x8x8xf32> to vector<2x8x8xf32>
    %286 = arith.addf %283, %285 : vector<2x8x8xf32>
    %cst_98 = arith.constant dense<0xFF800000> : vector<2x8xf32>
    %287 = vector.multi_reduction <maximumf>, %286, %cst_98 [2] : vector<2x8x8xf32> to vector<2x8xf32>
    %288 = vector.shape_cast %287 : vector<2x8xf32> to vector<2x8x1xf32>
    %289 = vector.broadcast %288 : vector<2x8x1xf32> to vector<2x8x8xf32>
    %290 = arith.subf %286, %289 : vector<2x8x8xf32>
    %291 = math.exp %290 : vector<2x8x8xf32>
    %cst_99 = arith.constant dense<0.000000e+00> : vector<2x8xf32>
    %292 = vector.multi_reduction <add>, %291, %cst_99 [2] : vector<2x8x8xf32> to vector<2x8xf32>
    %293 = vector.shape_cast %292 : vector<2x8xf32> to vector<2x8x1xf32>
    %294 = tpu.reciprocal %293 {approx = true} : vector<2x8x1xf32> -> vector<2x8x1xf32>
    %295 = vector.broadcast %294 : vector<2x8x1xf32> to vector<2x8x8xf32>
    %296 = arith.mulf %291, %295 : vector<2x8x8xf32>
    %297 = arith.truncf %296 : vector<2x8x8xf32> to vector<2x8x8xbf16>
    "tpu.trace_start"() <{level = 10 : i32, message = "bqk,bkc->bqc"}> : () -> ()
    %cst_100 = arith.constant dense<0.000000e+00> : vector<2x8x8xf32>
    %298 = tpu.matmul %297, %282, %cst_100 {dimension_numbers = #tpu.dot_dimension_numbers<[2], [1], [1], [2], [0, 0, 0, 1, 1, 2], [0], [0]>} : vector<2x8x8xbf16>, vector<2x8x8xbf16>, vector<2x8x8xf32> -> vector<2x8x8xf32>
    "tpu.trace_stop"() : () -> ()
    %299 = vector.shape_cast %298 : vector<2x8x8xf32> to vector<16x8xf32>
    %300 = vector.extract_strided_slice %247 {offsets = [0, 16], sizes = [16, 8], strides = [1, 1]} : vector<16x96xf32> to vector<16x8xf32>
    %301 = arith.truncf %300 : vector<16x8xf32> to vector<16x8xbf16>
    %302 = vector.shape_cast %301 : vector<16x8xbf16> to vector<2x8x8xbf16>
    %303 = vector.extract_strided_slice %247 {offsets = [0, 48], sizes = [16, 8], strides = [1, 1]} : vector<16x96xf32> to vector<16x8xf32>
    %304 = arith.truncf %303 : vector<16x8xf32> to vector<16x8xbf16>
    %305 = vector.shape_cast %304 : vector<16x8xbf16> to vector<2x8x8xbf16>
    %306 = vector.extract_strided_slice %247 {offsets = [0, 80], sizes = [16, 8], strides = [1, 1]} : vector<16x96xf32> to vector<16x8xf32>
    %307 = arith.truncf %306 : vector<16x8xf32> to vector<16x8xbf16>
    %308 = vector.shape_cast %307 : vector<16x8xbf16> to vector<2x8x8xbf16>
    "tpu.trace_start"() <{level = 10 : i32, message = "bqc,bkc->bqk"}> : () -> ()
    %cst_101 = arith.constant dense<0.000000e+00> : vector<2x8x8xf32>
    %309 = tpu.matmul %302, %305, %cst_101 {dimension_numbers = #tpu.dot_dimension_numbers<[2], [2], [1], [1], [0, 0, 0, 1, 1, 1], [0], [0]>} : vector<2x8x8xbf16>, vector<2x8x8xbf16>, vector<2x8x8xf32> -> vector<2x8x8xf32>
    "tpu.trace_stop"() : () -> ()
    %310 = vector.shape_cast %14 : vector<8x8xf32> to vector<1x8x8xf32>
    %311 = vector.broadcast %310 : vector<1x8x8xf32> to vector<2x8x8xf32>
    %312 = arith.addf %309, %311 : vector<2x8x8xf32>
    %cst_102 = arith.constant dense<0xFF800000> : vector<2x8xf32>
    %313 = vector.multi_reduction <maximumf>, %312, %cst_102 [2] : vector<2x8x8xf32> to vector<2x8xf32>
    %314 = vector.shape_cast %313 : vector<2x8xf32> to vector<2x8x1xf32>
    %315 = vector.broadcast %314 : vector<2x8x1xf32> to vector<2x8x8xf32>
    %316 = arith.subf %312, %315 : vector<2x8x8xf32>
    %317 = math.exp %316 : vector<2x8x8xf32>
    %cst_103 = arith.constant dense<0.000000e+00> : vector<2x8xf32>
    %318 = vector.multi_reduction <add>, %317, %cst_103 [2] : vector<2x8x8xf32> to vector<2x8xf32>
    %319 = vector.shape_cast %318 : vector<2x8xf32> to vector<2x8x1xf32>
    %320 = tpu.reciprocal %319 {approx = true} : vector<2x8x1xf32> -> vector<2x8x1xf32>
    %321 = vector.broadcast %320 : vector<2x8x1xf32> to vector<2x8x8xf32>
    %322 = arith.mulf %317, %321 : vector<2x8x8xf32>
    %323 = arith.truncf %322 : vector<2x8x8xf32> to vector<2x8x8xbf16>
    "tpu.trace_start"() <{level = 10 : i32, message = "bqk,bkc->bqc"}> : () -> ()
    %cst_104 = arith.constant dense<0.000000e+00> : vector<2x8x8xf32>
    %324 = tpu.matmul %323, %308, %cst_104 {dimension_numbers = #tpu.dot_dimension_numbers<[2], [1], [1], [2], [0, 0, 0, 1, 1, 2], [0], [0]>} : vector<2x8x8xbf16>, vector<2x8x8xbf16>, vector<2x8x8xf32> -> vector<2x8x8xf32>
    "tpu.trace_stop"() : () -> ()
    %325 = vector.shape_cast %324 : vector<2x8x8xf32> to vector<16x8xf32>
    %326 = vector.extract_strided_slice %247 {offsets = [0, 24], sizes = [16, 8], strides = [1, 1]} : vector<16x96xf32> to vector<16x8xf32>
    %327 = arith.truncf %326 : vector<16x8xf32> to vector<16x8xbf16>
    %328 = vector.shape_cast %327 : vector<16x8xbf16> to vector<2x8x8xbf16>
    %329 = vector.extract_strided_slice %247 {offsets = [0, 56], sizes = [16, 8], strides = [1, 1]} : vector<16x96xf32> to vector<16x8xf32>
    %330 = arith.truncf %329 : vector<16x8xf32> to vector<16x8xbf16>
    %331 = vector.shape_cast %330 : vector<16x8xbf16> to vector<2x8x8xbf16>
    %332 = vector.extract_strided_slice %247 {offsets = [0, 88], sizes = [16, 8], strides = [1, 1]} : vector<16x96xf32> to vector<16x8xf32>
    %333 = arith.truncf %332 : vector<16x8xf32> to vector<16x8xbf16>
    %334 = vector.shape_cast %333 : vector<16x8xbf16> to vector<2x8x8xbf16>
    "tpu.trace_start"() <{level = 10 : i32, message = "bqc,bkc->bqk"}> : () -> ()
    %cst_105 = arith.constant dense<0.000000e+00> : vector<2x8x8xf32>
    %335 = tpu.matmul %328, %331, %cst_105 {dimension_numbers = #tpu.dot_dimension_numbers<[2], [2], [1], [1], [0, 0, 0, 1, 1, 1], [0], [0]>} : vector<2x8x8xbf16>, vector<2x8x8xbf16>, vector<2x8x8xf32> -> vector<2x8x8xf32>
    "tpu.trace_stop"() : () -> ()
    %336 = vector.shape_cast %14 : vector<8x8xf32> to vector<1x8x8xf32>
    %337 = vector.broadcast %336 : vector<1x8x8xf32> to vector<2x8x8xf32>
    %338 = arith.addf %335, %337 : vector<2x8x8xf32>
    %cst_106 = arith.constant dense<0xFF800000> : vector<2x8xf32>
    %339 = vector.multi_reduction <maximumf>, %338, %cst_106 [2] : vector<2x8x8xf32> to vector<2x8xf32>
    %340 = vector.shape_cast %339 : vector<2x8xf32> to vector<2x8x1xf32>
    %341 = vector.broadcast %340 : vector<2x8x1xf32> to vector<2x8x8xf32>
    %342 = arith.subf %338, %341 : vector<2x8x8xf32>
    %343 = math.exp %342 : vector<2x8x8xf32>
    %cst_107 = arith.constant dense<0.000000e+00> : vector<2x8xf32>
    %344 = vector.multi_reduction <add>, %343, %cst_107 [2] : vector<2x8x8xf32> to vector<2x8xf32>
    %345 = vector.shape_cast %344 : vector<2x8xf32> to vector<2x8x1xf32>
    %346 = tpu.reciprocal %345 {approx = true} : vector<2x8x1xf32> -> vector<2x8x1xf32>
    %347 = vector.broadcast %346 : vector<2x8x1xf32> to vector<2x8x8xf32>
    %348 = arith.mulf %343, %347 : vector<2x8x8xf32>
    %349 = arith.truncf %348 : vector<2x8x8xf32> to vector<2x8x8xbf16>
    "tpu.trace_start"() <{level = 10 : i32, message = "bqk,bkc->bqc"}> : () -> ()
    %cst_108 = arith.constant dense<0.000000e+00> : vector<2x8x8xf32>
    %350 = tpu.matmul %349, %334, %cst_108 {dimension_numbers = #tpu.dot_dimension_numbers<[2], [1], [1], [2], [0, 0, 0, 1, 1, 2], [0], [0]>} : vector<2x8x8xbf16>, vector<2x8x8xbf16>, vector<2x8x8xf32> -> vector<2x8x8xf32>
    "tpu.trace_stop"() : () -> ()
    %351 = vector.shape_cast %350 : vector<2x8x8xf32> to vector<16x8xf32>
    %352 = tpu.concatenate %273, %299, %325, %351 in 1 : vector<16x8xf32>, vector<16x8xf32>, vector<16x8xf32>, vector<16x8xf32> -> vector<16x32xf32>
    %353 = arith.truncf %352 : vector<16x32xf32> to vector<16x32xbf16>
    %c1_109 = arith.constant 1 : index
    %c0_110 = arith.constant 0 : index
    %c0_111 = arith.constant 0 : index
    %354 = vector.load %arg7[%c1_109, %c0_110, %c0_111] : memref<3x32x32xbf16, #tpu.memory_space<vmem>>, vector<1x32x32xbf16>
    %355 = vector.shape_cast %354 : vector<1x32x32xbf16> to vector<32x32xbf16>
    %cst_112 = arith.constant dense<0.000000e+00> : vector<16x32xf32>
    %356 = tpu.matmul %353, %355, %cst_112 {dimension_numbers = #tpu.dot_dimension_numbers<[1], [0], [0], [1], [0, 0, 1, 1], [], []>} : vector<16x32xbf16>, vector<32x32xbf16>, vector<16x32xf32> -> vector<16x32xf32>
    %c1_113 = arith.constant 1 : index
    %c0_114 = arith.constant 0 : index
    %c0_115 = arith.constant 0 : index
    %357 = vector.load %arg8[%c1_113, %c0_114, %c0_115] : memref<3x1x32xf32, #tpu.memory_space<vmem>>, vector<1x1x32xf32>
    %358 = vector.shape_cast %357 : vector<1x1x32xf32> to vector<1x32xf32>
    %359 = vector.broadcast %358 : vector<1x32xf32> to vector<16x32xf32>
    %360 = arith.addf %356, %359 : vector<16x32xf32>
    %361 = arith.addf %213, %360 : vector<16x32xf32>
    %c1_116 = arith.constant 1 : index
    %c0_117 = arith.constant 0 : index
    %c0_118 = arith.constant 0 : index
    %362 = vector.load %arg9[%c1_116, %c0_117, %c0_118] : memref<3x1x32xf32, #tpu.memory_space<vmem>>, vector<1x1x32xf32>
    %363 = vector.shape_cast %362 : vector<1x1x32xf32> to vector<1x32xf32>
    %c1_119 = arith.constant 1 : index
    %c0_120 = arith.constant 0 : index
    %c0_121 = arith.constant 0 : index
    %364 = vector.load %arg10[%c1_119, %c0_120, %c0_121] : memref<3x1x32xf32, #tpu.memory_space<vmem>>, vector<1x1x32xf32>
    %365 = vector.shape_cast %364 : vector<1x1x32xf32> to vector<1x32xf32>
    %cst_122 = arith.constant dense<0.000000e+00> : vector<16xf32>
    %366 = vector.multi_reduction <add>, %361, %cst_122 [1] : vector<16x32xf32> to vector<16xf32>
    %367 = vector.shape_cast %366 : vector<16xf32> to vector<16x1xf32>
    %cst_123 = arith.constant 3.200000e+01 : f32
    %368 = vector.broadcast %cst_123 : f32 to vector<16x1xf32>
    %369 = arith.divf %367, %368 : vector<16x1xf32>
    %370 = vector.broadcast %369 : vector<16x1xf32> to vector<16x32xf32>
    %371 = arith.subf %361, %370 : vector<16x32xf32>
    %372 = arith.mulf %371, %371 : vector<16x32xf32>
    %cst_124 = arith.constant dense<0.000000e+00> : vector<16xf32>
    %373 = vector.multi_reduction <add>, %372, %cst_124 [1] : vector<16x32xf32> to vector<16xf32>
    %374 = vector.shape_cast %373 : vector<16xf32> to vector<16x1xf32>
    %cst_125 = arith.constant 3.200000e+01 : f32
    %375 = vector.broadcast %cst_125 : f32 to vector<16x1xf32>
    %376 = arith.divf %374, %375 : vector<16x1xf32>
    %377 = vector.broadcast %369 : vector<16x1xf32> to vector<16x32xf32>
    %378 = arith.subf %361, %377 : vector<16x32xf32>
    %cst_126 = arith.constant 9.99999997E-7 : f32
    %379 = vector.broadcast %cst_126 : f32 to vector<16x1xf32>
    %380 = arith.addf %376, %379 : vector<16x1xf32>
    %381 = math.rsqrt %380 : vector<16x1xf32>
    %382 = vector.broadcast %381 : vector<16x1xf32> to vector<16x32xf32>
    %383 = arith.mulf %378, %382 : vector<16x32xf32>
    %384 = vector.broadcast %363 : vector<1x32xf32> to vector<16x32xf32>
    %385 = arith.mulf %383, %384 : vector<16x32xf32>
    %386 = vector.broadcast %365 : vector<1x32xf32> to vector<16x32xf32>
    %387 = arith.addf %385, %386 : vector<16x32xf32>
    %388 = arith.truncf %387 : vector<16x32xf32> to vector<16x32xbf16>
    %c1_127 = arith.constant 1 : index
    %c0_128 = arith.constant 0 : index
    %c0_129 = arith.constant 0 : index
    %389 = vector.load %arg11[%c1_127, %c0_128, %c0_129] : memref<3x32x64xbf16, #tpu.memory_space<vmem>>, vector<1x32x64xbf16>
    %390 = vector.shape_cast %389 : vector<1x32x64xbf16> to vector<32x64xbf16>
    %cst_130 = arith.constant dense<0.000000e+00> : vector<16x64xf32>
    %391 = tpu.matmul %388, %390, %cst_130 {dimension_numbers = #tpu.dot_dimension_numbers<[1], [0], [0], [1], [0, 0, 1, 1], [], []>} : vector<16x32xbf16>, vector<32x64xbf16>, vector<16x64xf32> -> vector<16x64xf32>
    %c1_131 = arith.constant 1 : index
    %c0_132 = arith.constant 0 : index
    %c0_133 = arith.constant 0 : index
    %392 = vector.load %arg12[%c1_131, %c0_132, %c0_133] : memref<3x1x64xf32, #tpu.memory_space<vmem>>, vector<1x1x64xf32>
    %393 = vector.shape_cast %392 : vector<1x1x64xf32> to vector<1x64xf32>
    %394 = vector.broadcast %393 : vector<1x64xf32> to vector<16x64xf32>
    %395 = arith.addf %391, %394 : vector<16x64xf32>
    %cst_134 = arith.constant 5.000000e-01 : f32
    %396 = vector.broadcast %cst_134 : f32 to vector<16x64xf32>
    %397 = arith.mulf %396, %395 : vector<16x64xf32>
    %cst_135 = arith.constant 0.707106769 : f32
    %398 = vector.broadcast %cst_135 : f32 to vector<16x64xf32>
    %399 = arith.mulf %395, %398 : vector<16x64xf32>
    %400 = math.erf %399 : vector<16x64xf32>
    %cst_136 = arith.constant 1.000000e+00 : f32
    %401 = vector.broadcast %cst_136 : f32 to vector<16x64xf32>
    %402 = arith.addf %401, %400 : vector<16x64xf32>
    %403 = arith.mulf %397, %402 : vector<16x64xf32>
    %404 = arith.truncf %403 : vector<16x64xf32> to vector<16x64xbf16>
    %c1_137 = arith.constant 1 : index
    %c0_138 = arith.constant 0 : index
    %c0_139 = arith.constant 0 : index
    %405 = vector.load %arg13[%c1_137, %c0_138, %c0_139] : memref<3x64x32xbf16, #tpu.memory_space<vmem>>, vector<1x64x32xbf16>
    %406 = vector.shape_cast %405 : vector<1x64x32xbf16> to vector<64x32xbf16>
    %cst_140 = arith.constant dense<0.000000e+00> : vector<16x32xf32>
    %407 = tpu.matmul %404, %406, %cst_140 {dimension_numbers = #tpu.dot_dimension_numbers<[1], [0], [0], [1], [0, 0, 1, 1], [], []>} : vector<16x64xbf16>, vector<64x32xbf16>, vector<16x32xf32> -> vector<16x32xf32>
    %c1_141 = arith.constant 1 : index
    %c0_142 = arith.constant 0 : index
    %c0_143 = arith.constant 0 : index
    %408 = vector.load %arg14[%c1_141, %c0_142, %c0_143] : memref<3x1x32xf32, #tpu.memory_space<vmem>>, vector<1x1x32xf32>
    %409 = vector.shape_cast %408 : vector<1x1x32xf32> to vector<1x32xf32>
    %410 = vector.broadcast %409 : vector<1x32xf32> to vector<16x32xf32>
    %411 = arith.addf %407, %410 : vector<16x32xf32>
    %412 = arith.addf %361, %411 : vector<16x32xf32>
    %c2 = arith.constant 2 : index
    %c0_144 = arith.constant 0 : index
    %c0_145 = arith.constant 0 : index
    %413 = vector.load %arg3[%c2, %c0_144, %c0_145] : memref<3x1x32xf32, #tpu.memory_space<vmem>>, vector<1x1x32xf32>
    %414 = vector.shape_cast %413 : vector<1x1x32xf32> to vector<1x32xf32>
    %c2_146 = arith.constant 2 : index
    %c0_147 = arith.constant 0 : index
    %c0_148 = arith.constant 0 : index
    %415 = vector.load %arg4[%c2_146, %c0_147, %c0_148] : memref<3x1x32xf32, #tpu.memory_space<vmem>>, vector<1x1x32xf32>
    %416 = vector.shape_cast %415 : vector<1x1x32xf32> to vector<1x32xf32>
    %cst_149 = arith.constant dense<0.000000e+00> : vector<16xf32>
    %417 = vector.multi_reduction <add>, %412, %cst_149 [1] : vector<16x32xf32> to vector<16xf32>
    %418 = vector.shape_cast %417 : vector<16xf32> to vector<16x1xf32>
    %cst_150 = arith.constant 3.200000e+01 : f32
    %419 = vector.broadcast %cst_150 : f32 to vector<16x1xf32>
    %420 = arith.divf %418, %419 : vector<16x1xf32>
    %421 = vector.broadcast %420 : vector<16x1xf32> to vector<16x32xf32>
    %422 = arith.subf %412, %421 : vector<16x32xf32>
    %423 = arith.mulf %422, %422 : vector<16x32xf32>
    %cst_151 = arith.constant dense<0.000000e+00> : vector<16xf32>
    %424 = vector.multi_reduction <add>, %423, %cst_151 [1] : vector<16x32xf32> to vector<16xf32>
    %425 = vector.shape_cast %424 : vector<16xf32> to vector<16x1xf32>
    %cst_152 = arith.constant 3.200000e+01 : f32
    %426 = vector.broadcast %cst_152 : f32 to vector<16x1xf32>
    %427 = arith.divf %425, %426 : vector<16x1xf32>
    %428 = vector.broadcast %420 : vector<16x1xf32> to vector<16x32xf32>
    %429 = arith.subf %412, %428 : vector<16x32xf32>
    %cst_153 = arith.constant 9.99999997E-7 : f32
    %430 = vector.broadcast %cst_153 : f32 to vector<16x1xf32>
    %431 = arith.addf %427, %430 : vector<16x1xf32>
    %432 = math.rsqrt %431 : vector<16x1xf32>
    %433 = vector.broadcast %432 : vector<16x1xf32> to vector<16x32xf32>
    %434 = arith.mulf %429, %433 : vector<16x32xf32>
    %435 = vector.broadcast %414 : vector<1x32xf32> to vector<16x32xf32>
    %436 = arith.mulf %434, %435 : vector<16x32xf32>
    %437 = vector.broadcast %416 : vector<1x32xf32> to vector<16x32xf32>
    %438 = arith.addf %436, %437 : vector<16x32xf32>
    %439 = arith.truncf %438 : vector<16x32xf32> to vector<16x32xbf16>
    %c2_154 = arith.constant 2 : index
    %c0_155 = arith.constant 0 : index
    %c0_156 = arith.constant 0 : index
    %440 = vector.load %arg5[%c2_154, %c0_155, %c0_156] : memref<3x32x96xbf16, #tpu.memory_space<vmem>>, vector<1x32x96xbf16>
    %441 = vector.shape_cast %440 : vector<1x32x96xbf16> to vector<32x96xbf16>
    %cst_157 = arith.constant dense<0.000000e+00> : vector<16x96xf32>
    %442 = tpu.matmul %439, %441, %cst_157 {dimension_numbers = #tpu.dot_dimension_numbers<[1], [0], [0], [1], [0, 0, 1, 1], [], []>} : vector<16x32xbf16>, vector<32x96xbf16>, vector<16x96xf32> -> vector<16x96xf32>
    %c2_158 = arith.constant 2 : index
    %c0_159 = arith.constant 0 : index
    %c0_160 = arith.constant 0 : index
    %443 = vector.load %arg6[%c2_158, %c0_159, %c0_160] : memref<3x1x96xf32, #tpu.memory_space<vmem>>, vector<1x1x96xf32>
    %444 = vector.shape_cast %443 : vector<1x1x96xf32> to vector<1x96xf32>
    %445 = vector.broadcast %444 : vector<1x96xf32> to vector<16x96xf32>
    %446 = arith.addf %442, %445 : vector<16x96xf32>
    %447 = vector.extract_strided_slice %446 {offsets = [0, 0], sizes = [16, 8], strides = [1, 1]} : vector<16x96xf32> to vector<16x8xf32>
    %448 = arith.truncf %447 : vector<16x8xf32> to vector<16x8xbf16>
    %449 = vector.shape_cast %448 : vector<16x8xbf16> to vector<2x8x8xbf16>
    %450 = vector.extract_strided_slice %446 {offsets = [0, 32], sizes = [16, 8], strides = [1, 1]} : vector<16x96xf32> to vector<16x8xf32>
    %451 = arith.truncf %450 : vector<16x8xf32> to vector<16x8xbf16>
    %452 = vector.shape_cast %451 : vector<16x8xbf16> to vector<2x8x8xbf16>
    %453 = vector.extract_strided_slice %446 {offsets = [0, 64], sizes = [16, 8], strides = [1, 1]} : vector<16x96xf32> to vector<16x8xf32>
    %454 = arith.truncf %453 : vector<16x8xf32> to vector<16x8xbf16>
    %455 = vector.shape_cast %454 : vector<16x8xbf16> to vector<2x8x8xbf16>
    "tpu.trace_start"() <{level = 10 : i32, message = "bqc,bkc->bqk"}> : () -> ()
    %cst_161 = arith.constant dense<0.000000e+00> : vector<2x8x8xf32>
    %456 = tpu.matmul %449, %452, %cst_161 {dimension_numbers = #tpu.dot_dimension_numbers<[2], [2], [1], [1], [0, 0, 0, 1, 1, 1], [0], [0]>} : vector<2x8x8xbf16>, vector<2x8x8xbf16>, vector<2x8x8xf32> -> vector<2x8x8xf32>
    "tpu.trace_stop"() : () -> ()
    %457 = vector.shape_cast %14 : vector<8x8xf32> to vector<1x8x8xf32>
    %458 = vector.broadcast %457 : vector<1x8x8xf32> to vector<2x8x8xf32>
    %459 = arith.addf %456, %458 : vector<2x8x8xf32>
    %cst_162 = arith.constant dense<0xFF800000> : vector<2x8xf32>
    %460 = vector.multi_reduction <maximumf>, %459, %cst_162 [2] : vector<2x8x8xf32> to vector<2x8xf32>
    %461 = vector.shape_cast %460 : vector<2x8xf32> to vector<2x8x1xf32>
    %462 = vector.broadcast %461 : vector<2x8x1xf32> to vector<2x8x8xf32>
    %463 = arith.subf %459, %462 : vector<2x8x8xf32>
    %464 = math.exp %463 : vector<2x8x8xf32>
    %cst_163 = arith.constant dense<0.000000e+00> : vector<2x8xf32>
    %465 = vector.multi_reduction <add>, %464, %cst_163 [2] : vector<2x8x8xf32> to vector<2x8xf32>
    %466 = vector.shape_cast %465 : vector<2x8xf32> to vector<2x8x1xf32>
    %467 = tpu.reciprocal %466 {approx = true} : vector<2x8x1xf32> -> vector<2x8x1xf32>
    %468 = vector.broadcast %467 : vector<2x8x1xf32> to vector<2x8x8xf32>
    %469 = arith.mulf %464, %468 : vector<2x8x8xf32>
    %470 = arith.truncf %469 : vector<2x8x8xf32> to vector<2x8x8xbf16>
    "tpu.trace_start"() <{level = 10 : i32, message = "bqk,bkc->bqc"}> : () -> ()
    %cst_164 = arith.constant dense<0.000000e+00> : vector<2x8x8xf32>
    %471 = tpu.matmul %470, %455, %cst_164 {dimension_numbers = #tpu.dot_dimension_numbers<[2], [1], [1], [2], [0, 0, 0, 1, 1, 2], [0], [0]>} : vector<2x8x8xbf16>, vector<2x8x8xbf16>, vector<2x8x8xf32> -> vector<2x8x8xf32>
    "tpu.trace_stop"() : () -> ()
    %472 = vector.shape_cast %471 : vector<2x8x8xf32> to vector<16x8xf32>
    %473 = vector.extract_strided_slice %446 {offsets = [0, 8], sizes = [16, 8], strides = [1, 1]} : vector<16x96xf32> to vector<16x8xf32>
    %474 = arith.truncf %473 : vector<16x8xf32> to vector<16x8xbf16>
    %475 = vector.shape_cast %474 : vector<16x8xbf16> to vector<2x8x8xbf16>
    %476 = vector.extract_strided_slice %446 {offsets = [0, 40], sizes = [16, 8], strides = [1, 1]} : vector<16x96xf32> to vector<16x8xf32>
    %477 = arith.truncf %476 : vector<16x8xf32> to vector<16x8xbf16>
    %478 = vector.shape_cast %477 : vector<16x8xbf16> to vector<2x8x8xbf16>
    %479 = vector.extract_strided_slice %446 {offsets = [0, 72], sizes = [16, 8], strides = [1, 1]} : vector<16x96xf32> to vector<16x8xf32>
    %480 = arith.truncf %479 : vector<16x8xf32> to vector<16x8xbf16>
    %481 = vector.shape_cast %480 : vector<16x8xbf16> to vector<2x8x8xbf16>
    "tpu.trace_start"() <{level = 10 : i32, message = "bqc,bkc->bqk"}> : () -> ()
    %cst_165 = arith.constant dense<0.000000e+00> : vector<2x8x8xf32>
    %482 = tpu.matmul %475, %478, %cst_165 {dimension_numbers = #tpu.dot_dimension_numbers<[2], [2], [1], [1], [0, 0, 0, 1, 1, 1], [0], [0]>} : vector<2x8x8xbf16>, vector<2x8x8xbf16>, vector<2x8x8xf32> -> vector<2x8x8xf32>
    "tpu.trace_stop"() : () -> ()
    %483 = vector.shape_cast %14 : vector<8x8xf32> to vector<1x8x8xf32>
    %484 = vector.broadcast %483 : vector<1x8x8xf32> to vector<2x8x8xf32>
    %485 = arith.addf %482, %484 : vector<2x8x8xf32>
    %cst_166 = arith.constant dense<0xFF800000> : vector<2x8xf32>
    %486 = vector.multi_reduction <maximumf>, %485, %cst_166 [2] : vector<2x8x8xf32> to vector<2x8xf32>
    %487 = vector.shape_cast %486 : vector<2x8xf32> to vector<2x8x1xf32>
    %488 = vector.broadcast %487 : vector<2x8x1xf32> to vector<2x8x8xf32>
    %489 = arith.subf %485, %488 : vector<2x8x8xf32>
    %490 = math.exp %489 : vector<2x8x8xf32>
    %cst_167 = arith.constant dense<0.000000e+00> : vector<2x8xf32>
    %491 = vector.multi_reduction <add>, %490, %cst_167 [2] : vector<2x8x8xf32> to vector<2x8xf32>
    %492 = vector.shape_cast %491 : vector<2x8xf32> to vector<2x8x1xf32>
    %493 = tpu.reciprocal %492 {approx = true} : vector<2x8x1xf32> -> vector<2x8x1xf32>
    %494 = vector.broadcast %493 : vector<2x8x1xf32> to vector<2x8x8xf32>
    %495 = arith.mulf %490, %494 : vector<2x8x8xf32>
    %496 = arith.truncf %495 : vector<2x8x8xf32> to vector<2x8x8xbf16>
    "tpu.trace_start"() <{level = 10 : i32, message = "bqk,bkc->bqc"}> : () -> ()
    %cst_168 = arith.constant dense<0.000000e+00> : vector<2x8x8xf32>
    %497 = tpu.matmul %496, %481, %cst_168 {dimension_numbers = #tpu.dot_dimension_numbers<[2], [1], [1], [2], [0, 0, 0, 1, 1, 2], [0], [0]>} : vector<2x8x8xbf16>, vector<2x8x8xbf16>, vector<2x8x8xf32> -> vector<2x8x8xf32>
    "tpu.trace_stop"() : () -> ()
    %498 = vector.shape_cast %497 : vector<2x8x8xf32> to vector<16x8xf32>
    %499 = vector.extract_strided_slice %446 {offsets = [0, 16], sizes = [16, 8], strides = [1, 1]} : vector<16x96xf32> to vector<16x8xf32>
    %500 = arith.truncf %499 : vector<16x8xf32> to vector<16x8xbf16>
    %501 = vector.shape_cast %500 : vector<16x8xbf16> to vector<2x8x8xbf16>
    %502 = vector.extract_strided_slice %446 {offsets = [0, 48], sizes = [16, 8], strides = [1, 1]} : vector<16x96xf32> to vector<16x8xf32>
    %503 = arith.truncf %502 : vector<16x8xf32> to vector<16x8xbf16>
    %504 = vector.shape_cast %503 : vector<16x8xbf16> to vector<2x8x8xbf16>
    %505 = vector.extract_strided_slice %446 {offsets = [0, 80], sizes = [16, 8], strides = [1, 1]} : vector<16x96xf32> to vector<16x8xf32>
    %506 = arith.truncf %505 : vector<16x8xf32> to vector<16x8xbf16>
    %507 = vector.shape_cast %506 : vector<16x8xbf16> to vector<2x8x8xbf16>
    "tpu.trace_start"() <{level = 10 : i32, message = "bqc,bkc->bqk"}> : () -> ()
    %cst_169 = arith.constant dense<0.000000e+00> : vector<2x8x8xf32>
    %508 = tpu.matmul %501, %504, %cst_169 {dimension_numbers = #tpu.dot_dimension_numbers<[2], [2], [1], [1], [0, 0, 0, 1, 1, 1], [0], [0]>} : vector<2x8x8xbf16>, vector<2x8x8xbf16>, vector<2x8x8xf32> -> vector<2x8x8xf32>
    "tpu.trace_stop"() : () -> ()
    %509 = vector.shape_cast %14 : vector<8x8xf32> to vector<1x8x8xf32>
    %510 = vector.broadcast %509 : vector<1x8x8xf32> to vector<2x8x8xf32>
    %511 = arith.addf %508, %510 : vector<2x8x8xf32>
    %cst_170 = arith.constant dense<0xFF800000> : vector<2x8xf32>
    %512 = vector.multi_reduction <maximumf>, %511, %cst_170 [2] : vector<2x8x8xf32> to vector<2x8xf32>
    %513 = vector.shape_cast %512 : vector<2x8xf32> to vector<2x8x1xf32>
    %514 = vector.broadcast %513 : vector<2x8x1xf32> to vector<2x8x8xf32>
    %515 = arith.subf %511, %514 : vector<2x8x8xf32>
    %516 = math.exp %515 : vector<2x8x8xf32>
    %cst_171 = arith.constant dense<0.000000e+00> : vector<2x8xf32>
    %517 = vector.multi_reduction <add>, %516, %cst_171 [2] : vector<2x8x8xf32> to vector<2x8xf32>
    %518 = vector.shape_cast %517 : vector<2x8xf32> to vector<2x8x1xf32>
    %519 = tpu.reciprocal %518 {approx = true} : vector<2x8x1xf32> -> vector<2x8x1xf32>
    %520 = vector.broadcast %519 : vector<2x8x1xf32> to vector<2x8x8xf32>
    %521 = arith.mulf %516, %520 : vector<2x8x8xf32>
    %522 = arith.truncf %521 : vector<2x8x8xf32> to vector<2x8x8xbf16>
    "tpu.trace_start"() <{level = 10 : i32, message = "bqk,bkc->bqc"}> : () -> ()
    %cst_172 = arith.constant dense<0.000000e+00> : vector<2x8x8xf32>
    %523 = tpu.matmul %522, %507, %cst_172 {dimension_numbers = #tpu.dot_dimension_numbers<[2], [1], [1], [2], [0, 0, 0, 1, 1, 2], [0], [0]>} : vector<2x8x8xbf16>, vector<2x8x8xbf16>, vector<2x8x8xf32> -> vector<2x8x8xf32>
    "tpu.trace_stop"() : () -> ()
    %524 = vector.shape_cast %523 : vector<2x8x8xf32> to vector<16x8xf32>
    %525 = vector.extract_strided_slice %446 {offsets = [0, 24], sizes = [16, 8], strides = [1, 1]} : vector<16x96xf32> to vector<16x8xf32>
    %526 = arith.truncf %525 : vector<16x8xf32> to vector<16x8xbf16>
    %527 = vector.shape_cast %526 : vector<16x8xbf16> to vector<2x8x8xbf16>
    %528 = vector.extract_strided_slice %446 {offsets = [0, 56], sizes = [16, 8], strides = [1, 1]} : vector<16x96xf32> to vector<16x8xf32>
    %529 = arith.truncf %528 : vector<16x8xf32> to vector<16x8xbf16>
    %530 = vector.shape_cast %529 : vector<16x8xbf16> to vector<2x8x8xbf16>
    %531 = vector.extract_strided_slice %446 {offsets = [0, 88], sizes = [16, 8], strides = [1, 1]} : vector<16x96xf32> to vector<16x8xf32>
    %532 = arith.truncf %531 : vector<16x8xf32> to vector<16x8xbf16>
    %533 = vector.shape_cast %532 : vector<16x8xbf16> to vector<2x8x8xbf16>
    "tpu.trace_start"() <{level = 10 : i32, message = "bqc,bkc->bqk"}> : () -> ()
    %cst_173 = arith.constant dense<0.000000e+00> : vector<2x8x8xf32>
    %534 = tpu.matmul %527, %530, %cst_173 {dimension_numbers = #tpu.dot_dimension_numbers<[2], [2], [1], [1], [0, 0, 0, 1, 1, 1], [0], [0]>} : vector<2x8x8xbf16>, vector<2x8x8xbf16>, vector<2x8x8xf32> -> vector<2x8x8xf32>
    "tpu.trace_stop"() : () -> ()
    %535 = vector.shape_cast %14 : vector<8x8xf32> to vector<1x8x8xf32>
    %536 = vector.broadcast %535 : vector<1x8x8xf32> to vector<2x8x8xf32>
    %537 = arith.addf %534, %536 : vector<2x8x8xf32>
    %cst_174 = arith.constant dense<0xFF800000> : vector<2x8xf32>
    %538 = vector.multi_reduction <maximumf>, %537, %cst_174 [2] : vector<2x8x8xf32> to vector<2x8xf32>
    %539 = vector.shape_cast %538 : vector<2x8xf32> to vector<2x8x1xf32>
    %540 = vector.broadcast %539 : vector<2x8x1xf32> to vector<2x8x8xf32>
    %541 = arith.subf %537, %540 : vector<2x8x8xf32>
    %542 = math.exp %541 : vector<2x8x8xf32>
    %cst_175 = arith.constant dense<0.000000e+00> : vector<2x8xf32>
    %543 = vector.multi_reduction <add>, %542, %cst_175 [2] : vector<2x8x8xf32> to vector<2x8xf32>
    %544 = vector.shape_cast %543 : vector<2x8xf32> to vector<2x8x1xf32>
    %545 = tpu.reciprocal %544 {approx = true} : vector<2x8x1xf32> -> vector<2x8x1xf32>
    %546 = vector.broadcast %545 : vector<2x8x1xf32> to vector<2x8x8xf32>
    %547 = arith.mulf %542, %546 : vector<2x8x8xf32>
    %548 = arith.truncf %547 : vector<2x8x8xf32> to vector<2x8x8xbf16>
    "tpu.trace_start"() <{level = 10 : i32, message = "bqk,bkc->bqc"}> : () -> ()
    %cst_176 = arith.constant dense<0.000000e+00> : vector<2x8x8xf32>
    %549 = tpu.matmul %548, %533, %cst_176 {dimension_numbers = #tpu.dot_dimension_numbers<[2], [1], [1], [2], [0, 0, 0, 1, 1, 2], [0], [0]>} : vector<2x8x8xbf16>, vector<2x8x8xbf16>, vector<2x8x8xf32> -> vector<2x8x8xf32>
    "tpu.trace_stop"() : () -> ()
    %550 = vector.shape_cast %549 : vector<2x8x8xf32> to vector<16x8xf32>
    %551 = tpu.concatenate %472, %498, %524, %550 in 1 : vector<16x8xf32>, vector<16x8xf32>, vector<16x8xf32>, vector<16x8xf32> -> vector<16x32xf32>
    %552 = arith.truncf %551 : vector<16x32xf32> to vector<16x32xbf16>
    %c2_177 = arith.constant 2 : index
    %c0_178 = arith.constant 0 : index
    %c0_179 = arith.constant 0 : index
    %553 = vector.load %arg7[%c2_177, %c0_178, %c0_179] : memref<3x32x32xbf16, #tpu.memory_space<vmem>>, vector<1x32x32xbf16>
    %554 = vector.shape_cast %553 : vector<1x32x32xbf16> to vector<32x32xbf16>
    %cst_180 = arith.constant dense<0.000000e+00> : vector<16x32xf32>
    %555 = tpu.matmul %552, %554, %cst_180 {dimension_numbers = #tpu.dot_dimension_numbers<[1], [0], [0], [1], [0, 0, 1, 1], [], []>} : vector<16x32xbf16>, vector<32x32xbf16>, vector<16x32xf32> -> vector<16x32xf32>
    %c2_181 = arith.constant 2 : index
    %c0_182 = arith.constant 0 : index
    %c0_183 = arith.constant 0 : index
    %556 = vector.load %arg8[%c2_181, %c0_182, %c0_183] : memref<3x1x32xf32, #tpu.memory_space<vmem>>, vector<1x1x32xf32>
    %557 = vector.shape_cast %556 : vector<1x1x32xf32> to vector<1x32xf32>
    %558 = vector.broadcast %557 : vector<1x32xf32> to vector<16x32xf32>
    %559 = arith.addf %555, %558 : vector<16x32xf32>
    %560 = arith.addf %412, %559 : vector<16x32xf32>
    %c2_184 = arith.constant 2 : index
    %c0_185 = arith.constant 0 : index
    %c0_186 = arith.constant 0 : index
    %561 = vector.load %arg9[%c2_184, %c0_185, %c0_186] : memref<3x1x32xf32, #tpu.memory_space<vmem>>, vector<1x1x32xf32>
    %562 = vector.shape_cast %561 : vector<1x1x32xf32> to vector<1x32xf32>
    %c2_187 = arith.constant 2 : index
    %c0_188 = arith.constant 0 : index
    %c0_189 = arith.constant 0 : index
    %563 = vector.load %arg10[%c2_187, %c0_188, %c0_189] : memref<3x1x32xf32, #tpu.memory_space<vmem>>, vector<1x1x32xf32>
    %564 = vector.shape_cast %563 : vector<1x1x32xf32> to vector<1x32xf32>
    %cst_190 = arith.constant dense<0.000000e+00> : vector<16xf32>
    %565 = vector.multi_reduction <add>, %560, %cst_190 [1] : vector<16x32xf32> to vector<16xf32>
    %566 = vector.shape_cast %565 : vector<16xf32> to vector<16x1xf32>
    %cst_191 = arith.constant 3.200000e+01 : f32
    %567 = vector.broadcast %cst_191 : f32 to vector<16x1xf32>
    %568 = arith.divf %566, %567 : vector<16x1xf32>
    %569 = vector.broadcast %568 : vector<16x1xf32> to vector<16x32xf32>
    %570 = arith.subf %560, %569 : vector<16x32xf32>
    %571 = arith.mulf %570, %570 : vector<16x32xf32>
    %cst_192 = arith.constant dense<0.000000e+00> : vector<16xf32>
    %572 = vector.multi_reduction <add>, %571, %cst_192 [1] : vector<16x32xf32> to vector<16xf32>
    %573 = vector.shape_cast %572 : vector<16xf32> to vector<16x1xf32>
    %cst_193 = arith.constant 3.200000e+01 : f32
    %574 = vector.broadcast %cst_193 : f32 to vector<16x1xf32>
    %575 = arith.divf %573, %574 : vector<16x1xf32>
    %576 = vector.broadcast %568 : vector<16x1xf32> to vector<16x32xf32>
    %577 = arith.subf %560, %576 : vector<16x32xf32>
    %cst_194 = arith.constant 9.99999997E-7 : f32
    %578 = vector.broadcast %cst_194 : f32 to vector<16x1xf32>
    %579 = arith.addf %575, %578 : vector<16x1xf32>
    %580 = math.rsqrt %579 : vector<16x1xf32>
    %581 = vector.broadcast %580 : vector<16x1xf32> to vector<16x32xf32>
    %582 = arith.mulf %577, %581 : vector<16x32xf32>
    %583 = vector.broadcast %562 : vector<1x32xf32> to vector<16x32xf32>
    %584 = arith.mulf %582, %583 : vector<16x32xf32>
    %585 = vector.broadcast %564 : vector<1x32xf32> to vector<16x32xf32>
    %586 = arith.addf %584, %585 : vector<16x32xf32>
    %587 = arith.truncf %586 : vector<16x32xf32> to vector<16x32xbf16>
    %c2_195 = arith.constant 2 : index
    %c0_196 = arith.constant 0 : index
    %c0_197 = arith.constant 0 : index
    %588 = vector.load %arg11[%c2_195, %c0_196, %c0_197] : memref<3x32x64xbf16, #tpu.memory_space<vmem>>, vector<1x32x64xbf16>
    %589 = vector.shape_cast %588 : vector<1x32x64xbf16> to vector<32x64xbf16>
    %cst_198 = arith.constant dense<0.000000e+00> : vector<16x64xf32>
    %590 = tpu.matmul %587, %589, %cst_198 {dimension_numbers = #tpu.dot_dimension_numbers<[1], [0], [0], [1], [0, 0, 1, 1], [], []>} : vector<16x32xbf16>, vector<32x64xbf16>, vector<16x64xf32> -> vector<16x64xf32>
    %c2_199 = arith.constant 2 : index
    %c0_200 = arith.constant 0 : index
    %c0_201 = arith.constant 0 : index
    %591 = vector.load %arg12[%c2_199, %c0_200, %c0_201] : memref<3x1x64xf32, #tpu.memory_space<vmem>>, vector<1x1x64xf32>
    %592 = vector.shape_cast %591 : vector<1x1x64xf32> to vector<1x64xf32>
    %593 = vector.broadcast %592 : vector<1x64xf32> to vector<16x64xf32>
    %594 = arith.addf %590, %593 : vector<16x64xf32>
    %cst_202 = arith.constant 5.000000e-01 : f32
    %595 = vector.broadcast %cst_202 : f32 to vector<16x64xf32>
    %596 = arith.mulf %595, %594 : vector<16x64xf32>
    %cst_203 = arith.constant 0.707106769 : f32
    %597 = vector.broadcast %cst_203 : f32 to vector<16x64xf32>
    %598 = arith.mulf %594, %597 : vector<16x64xf32>
    %599 = math.erf %598 : vector<16x64xf32>
    %cst_204 = arith.constant 1.000000e+00 : f32
    %600 = vector.broadcast %cst_204 : f32 to vector<16x64xf32>
    %601 = arith.addf %600, %599 : vector<16x64xf32>
    %602 = arith.mulf %596, %601 : vector<16x64xf32>
    %603 = arith.truncf %602 : vector<16x64xf32> to vector<16x64xbf16>
    %c2_205 = arith.constant 2 : index
    %c0_206 = arith.constant 0 : index
    %c0_207 = arith.constant 0 : index
    %604 = vector.load %arg13[%c2_205, %c0_206, %c0_207] : memref<3x64x32xbf16, #tpu.memory_space<vmem>>, vector<1x64x32xbf16>
    %605 = vector.shape_cast %604 : vector<1x64x32xbf16> to vector<64x32xbf16>
    %cst_208 = arith.constant dense<0.000000e+00> : vector<16x32xf32>
    %606 = tpu.matmul %603, %605, %cst_208 {dimension_numbers = #tpu.dot_dimension_numbers<[1], [0], [0], [1], [0, 0, 1, 1], [], []>} : vector<16x64xbf16>, vector<64x32xbf16>, vector<16x32xf32> -> vector<16x32xf32>
    %c2_209 = arith.constant 2 : index
    %c0_210 = arith.constant 0 : index
    %c0_211 = arith.constant 0 : index
    %607 = vector.load %arg14[%c2_209, %c0_210, %c0_211] : memref<3x1x32xf32, #tpu.memory_space<vmem>>, vector<1x1x32xf32>
    %608 = vector.shape_cast %607 : vector<1x1x32xf32> to vector<1x32xf32>
    %609 = vector.broadcast %608 : vector<1x32xf32> to vector<16x32xf32>
    %610 = arith.addf %606, %609 : vector<16x32xf32>
    %611 = arith.addf %560, %610 : vector<16x32xf32>
    %612 = vector.shape_cast %611 : vector<16x32xf32> to vector<2x8x32xf32>
    %613 = vector.extract_strided_slice %612 {offsets = [0, 0, 0], sizes = [2, 1, 32], strides = [1, 1, 1]} : vector<2x8x32xf32> to vector<2x1x32xf32>
    %614 = vector.shape_cast %613 : vector<2x1x32xf32> to vector<2x32xf32>
    %c0_212 = arith.constant 0 : index
    %c0_213 = arith.constant 0 : index
    %615 = vector.load %arg15[%c0_212, %c0_213] : memref<1x32xf32, #tpu.memory_space<vmem>>, vector<1x32xf32>
    %c0_214 = arith.constant 0 : index
    %c0_215 = arith.constant 0 : index
    %616 = vector.load %arg16[%c0_214, %c0_215] : memref<1x32xf32, #tpu.memory_space<vmem>>, vector<1x32xf32>
    %cst_216 = arith.constant dense<0.000000e+00> : vector<2xf32>
    %617 = vector.multi_reduction <add>, %614, %cst_216 [1] : vector<2x32xf32> to vector<2xf32>
    %618 = vector.shape_cast %617 : vector<2xf32> to vector<2x1xf32>
    %cst_217 = arith.constant 3.200000e+01 : f32
    %619 = vector.broadcast %cst_217 : f32 to vector<2x1xf32>
    %620 = arith.divf %618, %619 : vector<2x1xf32>
    %621 = vector.broadcast %620 : vector<2x1xf32> to vector<2x32xf32>
    %622 = arith.subf %614, %621 : vector<2x32xf32>
    %623 = arith.mulf %622, %622 : vector<2x32xf32>
    %cst_218 = arith.constant dense<0.000000e+00> : vector<2xf32>
    %624 = vector.multi_reduction <add>, %623, %cst_218 [1] : vector<2x32xf32> to vector<2xf32>
    %625 = vector.shape_cast %624 : vector<2xf32> to vector<2x1xf32>
    %cst_219 = arith.constant 3.200000e+01 : f32
    %626 = vector.broadcast %cst_219 : f32 to vector<2x1xf32>
    %627 = arith.divf %625, %626 : vector<2x1xf32>
    %628 = vector.broadcast %620 : vector<2x1xf32> to vector<2x32xf32>
    %629 = arith.subf %614, %628 : vector<2x32xf32>
    %cst_220 = arith.constant 9.99999997E-7 : f32
    %630 = vector.broadcast %cst_220 : f32 to vector<2x1xf32>
    %631 = arith.addf %627, %630 : vector<2x1xf32>
    %632 = math.rsqrt %631 : vector<2x1xf32>
    %633 = vector.broadcast %632 : vector<2x1xf32> to vector<2x32xf32>
    %634 = arith.mulf %629, %633 : vector<2x32xf32>
    %635 = vector.broadcast %615 : vector<1x32xf32> to vector<2x32xf32>
    %636 = arith.mulf %634, %635 : vector<2x32xf32>
    %637 = vector.broadcast %616 : vector<1x32xf32> to vector<2x32xf32>
    %638 = arith.addf %636, %637 : vector<2x32xf32>
    %639 = arith.mulf %638, %638 : vector<2x32xf32>
    %cst_221 = arith.constant dense<0.000000e+00> : vector<2xf32>
    %640 = vector.multi_reduction <add>, %639, %cst_221 [1] : vector<2x32xf32> to vector<2xf32>
    %641 = vector.shape_cast %640 : vector<2xf32> to vector<2x1xf32>
    %642 = math.sqrt %641 : vector<2x1xf32>
    %cst_222 = arith.constant 9.99999996E-13 : f32
    %643 = vector.broadcast %cst_222 : f32 to vector<2x1xf32>
    %644 = arith.maximumf %642, %643 : vector<2x1xf32>
    %645 = vector.broadcast %644 : vector<2x1xf32> to vector<2x32xf32>
    %646 = arith.divf %638, %645 : vector<2x32xf32>
    %c0_223 = arith.constant 0 : index
    %c0_224 = arith.constant 0 : index
    %647 = vector.load %arg17[%c0_223, %c0_224] : memref<2x32xf32, #tpu.memory_space<vmem>>, vector<2x32xf32>
    tpu.vector_store %arg17[%c0_223, %c0_224], %646 {strides = array<i32>} : memref<2x32xf32, #tpu.memory_space<vmem>>, vector<2x32xf32>,
    return
  }
}

</mosaic_0001>

<bundles_post_ra>
// kernel: vit_forward.1
= control target key start
LH: loop header
LB: loop body
LE: loop exit
PB: predicated region body
PF: predicated region fallthrough
CT: control target
= control target key end

     0   :  { %s6944_s0 = inlined_call_operand.vmem [shape: bf16[16,768], index: 0, kind: input, shape index: {}]   ;;  %s6945_s1 = inlined_call_operand.vmem [shape: bf16[768,32], index: 1, kind: input, shape index: {}]   ;;  %s6946_s2 = inlined_call_operand.vmem [shape: f32[8,32], index: 2, kind: input, shape index: {}]   ;;  %s6947_s3 = inlined_call_operand.vmem [shape: f32[3,1,32], index: 3, kind: input, shape index: {}]   ;;  %s6948_s4 = inlined_call_operand.vmem [shape: f32[3,1,32], index: 4, kind: input, shape index: {}]   ;;  %s6949_s5 = inlined_call_operand.vmem [shape: bf16[3,32,96], index: 5, kind: input, shape index: {}]   ;;  %s6950_s6 = inlined_call_operand.vmem [shape: f32[3,1,96], index: 6, kind: input, shape index: {}]   ;;  %s6951_s7 = inlined_call_operand.vmem [shape: bf16[3,32,32], index: 7, kind: input, shape index: {}]   ;;  %s6952_s8 = inlined_call_operand.vmem [shape: f32[3,1,32], index: 8, kind: input, shape index: {}]   ;;  %s6953_s9 = inlined_call_operand.vmem [shape: f32[3,1,32], index: 9, kind: input, shape index: {}]   ;;  %s6954_s10 = inlined_call_operand.vmem [shape: f32[3,1,32], index: 10, kind: input, shape index: {}]   ;;  %s6955_s11 = inlined_call_operand.vmem [shape: bf16[3,32,64], index: 11, kind: input, shape index: {}]   ;;  %s6956_s12 = inlined_call_operand.vmem [shape: f32[3,1,64], index: 12, kind: input, shape index: {}]   ;;  %s6957_s13 = inlined_call_operand.vmem [shape: bf16[3,64,32], index: 13, kind: input, shape index: {}]   ;;  %s6958_s14 = inlined_call_operand.vmem [shape: f32[3,1,32], index: 14, kind: input, shape index: {}]   ;;  %s6959_s15 = inlined_call_operand.vmem [shape: f32[1,32], index: 15, kind: input, shape index: {}]   ;;  %s6960_s16 = inlined_call_operand.vmem [shape: f32[1,32], index: 16, kind: input, shape index: {}]   ;;  %s6961_s17 = inlined_call_operand.hbm [shape: f32[2,32], index: 17, kind: output, shape index: {}]  }
   0x1   :  { %6984 = sst [smem:[#allocation5_spill]] %s6944_s0 }
   0x2   :  { %6985 = sst [smem:[#allocation6_spill]] %s6945_s1 }
   0x3   :  { %s6986_s26 = sld [smem:[#allocation6_spill]]  ;;  %s6987_s20 = sld [smem:[#allocation5_spill]] }
   0x9   :  { %v5546_v0 = vld [vmem:[%s6986_s26 + $0x40] sm:$0xff]   ;;  %v5550_v4 = vld [vmem:[%s6986_s26 + $0x48] sm:$0xff]   ;;  %v5554_v8 = vld [vmem:[%s6986_s26 + $0x50] sm:$0xff]  }
   0xa   :  { %v5547_v1 = vld [vmem:[%s6986_s26 + $0xc0] sm:$0xff]   ;;  %4883 = vmatprep.subr.bf16.mxu0 %v5546_v0  ;;  %v5551_v5 = vld [vmem:[%s6986_s26 + $0xc8] sm:$0xff]   ;;  %v5555_v9 = vld [vmem:[%s6986_s26 + $0xd0] sm:$0xff]  }
   0xb   :  { %v5548_v2 = vld [vmem:[%s6986_s26] sm:$0xff]   ;;  %4905 = vmatprep.subr.bf16.mxu1 %v5547_v1  ;;  %v5552_v6 = vld [vmem:[%s6986_s26 + $0x8] sm:$0xff]   ;;  %v5556_v10 = vld [vmem:[%s6986_s26 + $0x10] sm:$0xff]  }
   0xc   :  { %v5549_v3 = vld [vmem:[%s6986_s26 + $0x80] sm:$0xff]   ;;  %4884 = vmatpush3.bf16.msra.mxu0 %v5548_v2  ;;  %v5553_v7 = vld [vmem:[%s6986_s26 + $0x88] sm:$0xff]   ;;  %v5557_v11 = vld [vmem:[%s6986_s26 + $0x90] sm:$0xff]  }
   0xd   :  { %4906 = vmatpush3.bf16.msra.mxu1 %v5549_v3  ;;  %4885 = vmatprep.subr.bf16.mxu0 %v5550_v4  ;;  %v5558_v12 = vld [vmem:[%s6986_s26 + $0x58] sm:$0xff]   ;;  %v5562_v16 = vld [vmem:[%s6986_s26 + $0x60] sm:$0xff]   ;;  %v5566_v20 = vld [vmem:[%s6986_s26 + $0x68] sm:$0xff]  }
   0xe   :  { %4907 = vmatprep.subr.bf16.mxu1 %v5551_v5  ;;  %v5559_v13 = vld [vmem:[%s6986_s26 + $0xd8] sm:$0xff]   ;;  %v5563_v17 = vld [vmem:[%s6986_s26 + $0xe0] sm:$0xff]   ;;  %v5567_v21 = vld [vmem:[%s6986_s26 + $0xe8] sm:$0xff]  }
   0xf   :  { %v5560_v14 = vld [vmem:[%s6986_s26 + $0x18] sm:$0xff]   ;;  %v5564_v18 = vld [vmem:[%s6986_s26 + $0x20] sm:$0xff]   ;;  %v5568_v22 = vld [vmem:[%s6986_s26 + $0x28] sm:$0xff]  }
  0x10   :  { %4886 = vmatpush3.bf16.msra.mxu0 %v5552_v6  ;;  %v5561_v15 = vld [vmem:[%s6986_s26 + $0x98] sm:$0xff]   ;;  %v5565_v19 = vld [vmem:[%s6986_s26 + $0xa0] sm:$0xff]   ;;  %v5569_v23 = vld [vmem:[%s6986_s26 + $0xa8] sm:$0xff]  }
  0x11   :  { %4908 = vmatpush3.bf16.msra.mxu1 %v5553_v7  ;;  %4887 = vmatprep.subr.bf16.mxu0 %v5554_v8  ;;  %v5570_v24 = vld [vmem:[%s6986_s26 + $0x70] sm:$0xff]   ;;  %v5574_v28 = vld [vmem:[%s6986_s26 + $0x78] sm:$0xff]   ;;  %v5581_v34 = vld [vmem:[%s6987_s20 + $0x8] ss:$24 sps:$4 sm:$0xff]  }
  0x12   :  { %4909 = vmatprep.subr.bf16.mxu1 %v5555_v9  ;;  %v5571_v25 = vld [vmem:[%s6986_s26 + $0xf0] sm:$0xff]   ;;  %v5575_v29 = vld [vmem:[%s6986_s26 + $0xf8] sm:$0xff]   ;;  %v5583_v35 = vld [vmem:[%s6987_s20 + $0xc] ss:$24 sps:$4 sm:$0xff]  }
  0x13   :  { %v5572_v26 = vld [vmem:[%s6986_s26 + $0x30] sm:$0xff]   ;;  %v5576_v30 = vld [vmem:[%s6986_s26 + $0x38] sm:$0xff]   ;;  %v5584_v36 = vld [vmem:[%s6986_s26 + $0x140] sm:$0xff]   ;;  %551 = vmatprep.mubr.bf16.mxu1 %v5583_v35 }
  0x14   :  { %4888 = vmatpush3.bf16.msra.mxu0 %v5556_v10  ;;  %v5573_v27 = vld [vmem:[%s6986_s26 + $0xb0] sm:$0xff]   ;;  %v5577_v31 = vld [vmem:[%s6986_s26 + $0xb8] sm:$0xff]   ;;  %v5585_v37 = vld [vmem:[%s6986_s26 + $0x100] sm:$0xff]  }
  0x15   :  { %4910 = vmatpush3.bf16.msra.mxu1 %v5557_v11  ;;  %4889 = vmatprep.subr.bf16.mxu0 %v5558_v12  ;;  %v5578_v32 = vld [vmem:[%s6987_s20] ss:$24 sps:$4 sm:$0xff]   ;;  %v5580_v33 = vld [vmem:[%s6987_s20 + $0x4] ss:$24 sps:$4 sm:$0xff]   ;;  %v5586_v38 = vld [vmem:[%s6986_s26 + $0x148] sm:$0xff]  }
  0x16   :  { %4911 = vmatprep.subr.bf16.mxu1 %v5559_v13  ;;  %510 = vmatprep.mubr.bf16.mxu0 %v5580_v33  ;;  %v5587_v39 = vld [vmem:[%s6986_s26 + $0x108] sm:$0xff]   ;;  %v5588_v40 = vld [vmem:[%s6986_s26 + $0x150] sm:$0xff]   ;;  %v5590_v42 = vld [vmem:[%s6986_s26 + $0x158] sm:$0xff]  }
  0x17   :  { %v5589_v41 = vld [vmem:[%s6986_s26 + $0x110] sm:$0xff]   ;;  %v5591_v43 = vld [vmem:[%s6986_s26 + $0x118] sm:$0xff]   ;;  %v5592_v44 = vld [vmem:[%s6986_s26 + $0x160] sm:$0xff]  }
  0x18   :  { %4890 = vmatpush3.bf16.msra.mxu0 %v5560_v14  ;;  %v5593_v45 = vld [vmem:[%s6986_s26 + $0x120] sm:$0xff]   ;;  %v5594_v46 = vld [vmem:[%s6986_s26 + $0x168] sm:$0xff]   ;;  %v5596_v49 = vld [vmem:[%s6986_s26 + $0x170] sm:$0xff]  }
  0x19   :  { %4912 = vmatpush3.bf16.msra.mxu1 %v5561_v15  ;;  %4891 = vmatprep.subr.bf16.mxu0 %v5562_v16  ;;  %v5602_v47 = vld [vmem:[%s6987_s20 + $0x14] ss:$24 sps:$4 sm:$0xff]   ;;  %v5598_v51 = vld [vmem:[%s6986_s26 + $0x178] sm:$0xff]   ;;  %v5600_v53 = vld [vmem:[%s6987_s20 + $0x10] ss:$24 sps:$4 sm:$0xff]  }
  0x1a   :  { %4913 = vmatprep.subr.bf16.mxu1 %v5563_v17  ;;  %v5595_v48 = vld [vmem:[%s6986_s26 + $0x128] sm:$0xff]   ;;  %v5597_v50 = vld [vmem:[%s6986_s26 + $0x130] sm:$0xff]   ;;  %v5599_v52 = vld [vmem:[%s6986_s26 + $0x138] sm:$0xff]  }
  0x1c   :  { %4892 = vmatpush3.bf16.msra.mxu0 %v5564_v18 }
  0x1d   :  { %4914 = vmatpush3.bf16.msra.mxu1 %v5565_v19  ;;  %4893 = vmatprep.subr.bf16.mxu0 %v5566_v20 }
  0x1e   :  { %4915 = vmatprep.subr.bf16.mxu1 %v5567_v21 }
  0x20   :  { %4894 = vmatpush3.bf16.msra.mxu0 %v5568_v22 }
  0x21   :  { %4916 = vmatpush3.bf16.msra.mxu1 %v5569_v23  ;;  %4895 = vmatprep.subr.bf16.mxu0 %v5570_v24 }
  0x22   :  { %4917 = vmatprep.subr.bf16.mxu1 %v5571_v25 }
  0x24   :  { %4896 = vmatpush3.bf16.msra.mxu0 %v5572_v26 }
  0x25   :  { %4918 = vmatpush3.bf16.msra.mxu1 %v5573_v27  ;;  %4897 = vmatprep.subr.bf16.mxu0 %v5574_v28 }
  0x26   :  { %4919 = vmatprep.subr.bf16.mxu1 %v5575_v29 }
  0x28   :  { %4898 = vmatpush3.bf16.msra.mxu0 %v5576_v30 }
  0x29   :  { %4920 = vmatpush3.bf16.msra.mxu1 %v5577_v31  ;;  %4927 = vmatprep.subr.bf16.mxu0 %v5584_v36 }
  0x2b   :  { %511 = vmatmul.mubr.bf16.vlgmr.msra.gmra.mrb[0].mxu0 %v5578_v32 }
  0x2c   :  { %552 = vmatmul.mubr.bf16.vlgmr.msra.gmra.mrb[0].mxu1 %v5581_v34  ;;  %4928 = vmatpush3.bf16.msra.mxu0 %v5585_v37 }
  0x2d   :  { %4929 = vmatprep.subr.bf16.mxu0 %v5586_v38  ;;  %592 = vmatprep.mubr.bf16.mxu0 %v5602_v47 }
  0x30   :  { %4930 = vmatpush3.bf16.msra.mxu0 %v5587_v39 }
  0x31   :  { %4931 = vmatprep.subr.bf16.mxu0 %v5588_v40 }
  0x34   :  { %4932 = vmatpush3.bf16.msra.mxu0 %v5589_v41 }
  0x35   :  { %4933 = vmatprep.subr.bf16.mxu0 %v5590_v42 }
  0x38   :  { %4934 = vmatpush3.bf16.msra.mxu0 %v5591_v43 }
  0x39   :  { %4935 = vmatprep.subr.bf16.mxu0 %v5592_v44 }
  0x3c   :  { %4936 = vmatpush3.bf16.msra.mxu0 %v5593_v45 }
  0x3d   :  { %4937 = vmatprep.subr.bf16.mxu0 %v5594_v46 }
  0x40   :  { %4938 = vmatpush3.bf16.msra.mxu0 %v5595_v48 }
  0x41   :  { %4939 = vmatprep.subr.bf16.mxu0 %v5596_v49 }
  0x44   :  { %4940 = vmatpush3.bf16.msra.mxu0 %v5597_v50 }
  0x45   :  { %4941 = vmatprep.subr.bf16.mxu0 %v5598_v51 }
  0x48   :  { %4942 = vmatpush3.bf16.msra.mxu0 %v5599_v52 }
  0x4b   :  { %593 = vmatmul.mubr.bf16.vlgmr.msra.gmra.mrb[4].mxu0 %v5600_v53 }
  0x4c   :  { %22 = vsyncpa [#allocation3], 0  ;;  %v601_v9 = vld [vmem:[%s6946_s2] sm:$0xff]  ;;  %vm610_vm0 = vcmask 261120   ;;  %v5797_v28 = vmov 0.0   ;;  %v5604_v29 = vld [vmem:[%s6949_s5 + $0x8] sm:$0xff]  }
  0x4d   :  { %v5603_v27 = vld [vmem:[%s6949_s5] sm:$0xff]   ;;  %5087 = vmatprep.subr.bf16.mxu1 %v5797_v28  ;;  %5113 = vmatprep.subr.bf16.mxu0 %v5797_v28  ;;  %vm5798_vm1 = vmmov 0   ;;  %s5799_s1 = smov 96   ;;  %vm730_vm2 = vcmask 64512   ;;  %s5801_s21 = smov 64   ;;  %vm854_vm4 = vcmask 1043456  }
  0x4e   :  { %5088 = vmatpush3.bf16.msra.mxu1 %v5603_v27  ;;  %5091 = vmatprep.mubr.msk.bf16.mxu1 %vm5798_vm1, %v5797_v28  ;;  %v4699_v38 = vld [vmem:[%s6947_s3] ss:$0 sm:$0xff]  ;;  %s5802_s22 = smov 88   ;;  %s5803_s23 = smov 120   ;;  %vm1632_vm5 = vcmask 130048   ;;  %vm1635_vm6 = vcmask 195584  }
  0x4f   :  { %5089 = vmatprep.subr.bf16.mxu1 %v5797_v28  ;;  %5115 = vmatprep.mubr.msk.bf16.mxu0 %vm5798_vm1, %v5797_v28  ;;  %v4700_v42 = vld [vmem:[%s6948_s4] ss:$0 sm:$0xff]  ;;  %s6982_s26 = smov 56   ;;  %s6980_s20 = smov 80   ;;  %vm1870_vm7 = vcmask 523264   ;;  %vm4550_vm8 = vcmask 1041409  }
  0x50   :  { %v4701_v47 = vld [vmem:[%s6950_s6] ss:$0 sm:$0xff]  ;;  %s6978_s2 = smov 112   ;;  %s6976_s24 = smov 48   ;;  %vm4553_vm9 = vcmask 254976  }
  0x51   :  { %s6974_s25 = smov 72   ;;  %s6972_s27 = smov 104  }
  0x52   :  { %5090 = vmatpush3.bf16.msra.mxu1 %v5604_v29  ;;  %s6970_s28 = smov 40   ;;  %s6968_s29 = smov 8  }
  0x53   :  { %5095 = vmatprep.subr.bf16.mxu1 %v5797_v28  ;;  %s6964_s0 = smov 16   ;;  %s6966_s30 = smov 24  }
  0x54   :  { %s6989_s19 = smov 40  }
  0xfe   :  { %v4899_v54 = vpop.f32.mrb[0].mxu0 }
  0xff   :  { %v4921_v55 = vpop.f32.mrb[0].mxu1  ;;  %v4900_v56 = vpop.f32.mrb[1].mxu0 }
 0x100   :  { %v4901_v57 = vadd.f32 %v4900_v56, %v4899_v54  ;;  %v4922_v58 = vpop.f32.mrb[1].mxu1  ;;  %v4902_v59 = vpop.f32.mrb[2].mxu0 }
 0x101   :  { %v4923_v60 = vadd.f32 %v4922_v58, %v4921_v55  ;;  %v4924_v61 = vpop.f32.mrb[2].mxu1  ;;  %v4903_v62 = vpop.f32.mrb[3].mxu0 }
 0x102   :  { %v4904_v63 = vadd.f32 %v4903_v62, %v4902_v59  ;;  %v4925_v0 = vpop.f32.mrb[3].mxu1  ;;  %v5800_v62 = vmov -1e+30  }
 0x103   :  { %v554_v1 = vadd.f32 %v4923_v60, %v4901_v57  ;;  %v4926_v2 = vadd.f32 %v4925_v0, %v4924_v61  ;;  %v604_v60 = vlaneseq }
 0x105   :  { %v557_v3 = vadd.f32 %v4926_v2, %v4904_v63  ;;  %v605_v61 = vand.u32 127, %v604_v60 }
 0x107   :  { %vm606_vm3 = vcmp.lt.s32.totalorder %v605_v61, 5 }
 0x108   :  { %v6128_v63 = vsel %vm606_vm3, 0.0, %v5800_v62 }
 0x11e   :  { %v4943_v4 = vpop.f32.mrb[4].mxu0 }
 0x11f   :  { %v4944_v5 = vpop.f32.mrb[5].mxu0 }
 0x120   :  { %v4945_v6 = vadd.f32 %v4944_v5, %v4943_v4  ;;  %v4946_v7 = vpop.f32.mrb[6].mxu0 }
 0x121   :  { %v4947_v8 = vpop.f32.mrb[7].mxu0 }
 0x122   :  { %v595_v10 = vadd.f32 %v4945_v6, %v554_v1  ;;  %v4948_v11 = vadd.f32 %v4947_v8, %v4946_v7 }
 0x124   :  { %v598_v12 = vadd.f32 %v4948_v11, %v557_v3  ;;  %v6070_v13 = vadd.f32 %v601_v9, %v595_v10 }
 0x126   :  { %v6072_v14 = vadd.f32 %v601_v9, %v598_v12  ;;  %v611_v15 = vsel %vm610_vm0, %v6070_v13, 0.0 }
 0x127   :  { %612 = vadd.xlane.f32.xlu0 %v611_v15 }
 0x128   :  { %v614_v16 = vsel %vm610_vm0, %v6072_v14, 0.0 }
 0x12b   :  { %615 = vadd.xlane.f32.xlu0 %v614_v16 }
 0x1b4   :  { %v613_v17 = vpop.xlane.xlu0 %612 }
 0x1b5   :  { %v618_v18 = vmul.f32 0.03125, %v613_v17 }
 0x1b7   :  { %v620_v19 = vsub.f32 %v6070_v13, %v618_v18 }
 0x1b8   :  { %v616_v20 = vpop.xlane.xlu0 %615 }
 0x1b9   :  { %v619_v21 = vmul.f32 0.03125, %v616_v20  ;;  %v622_v22 = vmul.f32 %v620_v19, %v620_v19 }
 0x1bb   :  { %v621_v23 = vsub.f32 %v6072_v14, %v619_v21  ;;  %v624_v24 = vsel %vm610_vm0, %v622_v22, 0.0 }
 0x1bc   :  { %625 = vadd.xlane.f32.xlu1 %v624_v24 }
 0x1bd   :  { %v623_v25 = vmul.f32 %v621_v23, %v621_v23 }
 0x1bf   :  { %v627_v26 = vsel %vm610_vm0, %v623_v25, 0.0 }
 0x1c0   :  { %628 = vadd.xlane.f32.xlu1 %v627_v26 }
 0x249   :  { %v626_v30 = vpop.xlane.xlu1 %625 }
 0x24a   :  { %v630_v31 = vmul.f32 0.03125, %v626_v30 }
 0x24c   :  { %v632_v32 = vadd.f32 1e-06, %v630_v31 }
 0x24d   :  { %v629_v33 = vpop.xlane.xlu1 %628 }
 0x24e   :  { %5633 = vrsqrt.f32 %v632_v32  ;;  %v631_v34 = vmul.f32 0.03125, %v629_v33 }
 0x250   :  { %v633_v35 = vadd.f32 1e-06, %v631_v34 }
 0x252   :  { %5635 = vrsqrt.f32 %v633_v35 }
 0x258   :  { %v5634_v36 = vpop.eup %5633 }
 0x259   :  { %v636_v37 = vmul.f32 %v5634_v36, %v620_v19 }
 0x25b   :  { %v644_v40 = vmul.f32 %v4699_v38, %v636_v37 }
 0x25c   :  { %v5636_v39 = vpop.eup %5635 }
 0x25d   :  { %v637_v41 = vmul.f32 %v5636_v39, %v621_v23  ;;  %v652_v44 = vadd.f32 %v4700_v42, %v644_v40 }
 0x25f   :  { %v645_v43 = vmul.f32 %v4699_v38, %v637_v41 }
 0x261   :  { %v653_v45 = vadd.f32 %v4700_v42, %v645_v43 }
 0x263   :  { %v654_v46 = vpack.c.bf16 %v653_v45, %v652_v44 }
 0x265   :  { %5092 = vmatmul.mubr.msk.bf16.vlgmr.msra.gmra.mrb[4].mxu1 %vm610_vm0, %v654_v46 }
 0x266   :  { %5097 = vmatprep.mubr.msk.bf16.mxu1 %vm5798_vm1, %v5797_v28 }
 0x338   :  { %v715_v48 = vpop.f32.mrb[4].mxu1 }
 0x339   :  { %v716_v49 = vadd.f32 %v4701_v47, %v715_v48  ;;  %v5093_v50 = vpop.f32.mrb[5].mxu1 }
 0x33a   :  { %v718_v51 = vpop.f32.mrb[6].mxu1 }
 0x33b   :  { %v6108_v52 = vpack.c.bf16 %v716_v49, %v716_v49  ;;  %v719_v53 = vadd.f32 %v4701_v47, %v718_v51  ;;  %v5094_v54 = vpop.f32.mrb[7].mxu1 }
 0x33d   :  { %v6110_v55 = vpack.c.bf16 %v719_v53, %v719_v53  ;;  %728 = vrot.lane.b32.xlu0 %v6108_v52, %s5799_s1 }
 0x33f   :  { %777 = vrot.lane.b32.xlu1 %v6110_v55, %s5799_s1 }
 0x3af   :  { %v729_v56 = vpop.permute.xlu0 %728 }
 0x3b0   :  { %v735_v57 = vsel %vm730_vm2, %v729_v56, 0 }
 0x3b1   :  { %5096 = vmatpush3.bf16.xpose.msra.mxu1 %v735_v57  ;;  %v778_v58 = vpop.permute.xlu1 %777 }
 0x3b2   :  { %5101 = vmatprep.subr.bf16.mxu1 %v5797_v28  ;;  %v783_v59 = vsel %vm730_vm2, %v778_v58, 0 }
 0x3b8   :  { %5098 = vmatmul.mubr.msk.bf16.vlgmr.msra.gmra.mrb[8].mxu1 %vm730_vm2, %v6108_v52 }
 0x3b9   :  { %5102 = vmatpush3.bf16.xpose.msra.mxu1 %v783_v59  ;;  %5103 = vmatprep.mubr.msk.bf16.mxu1 %vm5798_vm1, %v5797_v28 }
 0x3ba   :  { %5107 = vmatprep.subr.bf16.mxu1 %v5797_v28 }
 0x3c0   :  { %5104 = vmatmul.mubr.msk.bf16.vlgmr.msra.gmra.mrb[12].mxu1 %vm730_vm2, %v6110_v55 }
 0x3c1   :  { %5109 = vmatprep.mubr.msk.bf16.mxu1 %vm5798_vm1, %v5797_v28 }
 0x48b   :  { %v771_v0 = vpop.f32.mrb[8].mxu1 }
 0x48c   :  { %v772_v1 = vadd.f32 %v771_v0, %v6128_v63  ;;  %v5099_v2 = vpop.f32.mrb[9].mxu1 }
 0x48d   :  { %v774_v3 = vpop.f32.mrb[10].mxu1 }
 0x48e   :  { %v5100_v4 = vpop.f32.mrb[11].mxu1  ;;  %v825_v5 = vsel %vm730_vm2, %v772_v1, -inf }
 0x48f   :  { %826 = vmax.xlane.f32.xlu1 %v825_v5 }
 0x493   :  { %v819_v6 = vpop.f32.mrb[12].mxu1 }
 0x494   :  { %v820_v7 = vadd.f32 %v819_v6, %v6128_v63  ;;  %v5105_v8 = vpop.f32.mrb[13].mxu1 }
 0x495   :  { %v822_v9 = vpop.f32.mrb[14].mxu1 }
 0x496   :  { %v5106_v10 = vpop.f32.mrb[15].mxu1  ;;  %v828_v11 = vsel %vm730_vm2, %v820_v7, -inf }
 0x497   :  { %829 = vmax.xlane.f32.xlu0 %v828_v11 }
 0x4a0   :  { %898 = vrot.lane.b32.xlu1 %v6110_v55, %s5801_s21 }
 0x4a4   :  { %948 = vrot.lane.b32.xlu1 %v6108_v52, %s5802_s22 }
 0x51c   :  { %v827_v12 = vpop.xlane.xlu1 %826 }
 0x51d   :  { %v831_v15 = vsub.f32 %v772_v1, %v827_v12 }
 0x51f   :  { %v833_v16 = vmul.f32 1.442695, %v831_v15 }
 0x520   :  { %v899_v17 = vpop.permute.xlu1 %898 }
 0x521   :  { %5637 = vpow2.f32 %v833_v16  ;;  %v904_v18 = vsel %vm854_vm4, %v899_v17, 0 }
 0x522   :  { %5114 = vmatpush3.bf16.msra.mxu0 %v904_v18 }
 0x523   :  { %5125 = vmatprep.subr.bf16.mxu0 %v5797_v28 }
 0x524   :  { %v830_v19 = vpop.xlane.xlu0 %829  ;;  %v949_v27 = vpop.permute.xlu1 %948 }
 0x525   :  { %v832_v20 = vsub.f32 %v820_v7, %v830_v19  ;;  %v954_v35 = vsel %vm730_vm2, %v949_v27, 0 }
 0x527   :  { %v835_v21 = vmul.f32 1.442695, %v832_v20 }
 0x529   :  { %5639 = vpow2.f32 %v835_v21 }
 0x52b   :  { %v5638_v22 = vpop.eup %5637 }
 0x52c   :  { %v837_v23 = vsel %vm730_vm2, %v5638_v22, 0.0 }
 0x52d   :  { %838 = vadd.xlane.f32.xlu0 %v837_v23 }
 0x533   :  { %v5640_v24 = vpop.eup %5639 }
 0x534   :  { %v840_v25 = vsel %vm730_vm2, %v5640_v24, 0.0 }
 0x535   :  { %841 = vadd.xlane.f32.xlu1 %v840_v25 }
 0x543   :  { %849 = vrot.lane.b32.xlu0 %v6108_v52, %s5801_s21 }
 0x546   :  { %998 = vrot.lane.b32.xlu1 %v6110_v55, %s5802_s22 }
 0x547   :  { %946 = vrot.lane.b32.xlu0 %v6108_v52, %s5803_s23 }
 0x54a   :  { %996 = vrot.lane.b32.xlu1 %v6110_v55, %s5803_s23 }
 0x5ba   :  { %v839_v26 = vpop.xlane.xlu0 %838 }
 0x5bb   :  { %5641 = vrcp.f32 %v839_v26 }
 0x5be   :  { %v850_v29 = vpop.permute.xlu0 %849 }
 0x5bf   :  { %v856_v30 = vsel %vm854_vm4, %v850_v29, 0 }
 0x5c0   :  { %5108 = vmatpush3.bf16.msra.mxu1 %v856_v30 }
 0x5c1   :  { %5119 = vmatprep.subr.bf16.mxu1 %v5797_v28 }
 0x5c2   :  { %v842_v31 = vpop.xlane.xlu1 %841  ;;  %v947_v40 = vpop.permute.xlu0 %946 }
 0x5c3   :  { %5643 = vrcp.f32 %v842_v31 }
 0x5c5   :  { %v5642_v32 = vpop.eup %5641 }
 0x5c6   :  { %v845_v33 = vmul.f32 %v5642_v32, %v5638_v22  ;;  %v999_v38 = vpop.permute.xlu1 %998 }
 0x5c7   :  { %v1004_v41 = vsel %vm730_vm2, %v999_v38, 0 }
 0x5c8   :  { %v847_v34 = vpack.c.bf16 %v845_v33, %v845_v33 }
 0x5ca   :  { %5110 = vmatmul.mubr.msk.bf16.vlgmr.msra.gmra.mrb[16].mxu1 %vm730_vm2, %v847_v34  ;;  %v997_v42 = vpop.permute.xlu1 %996 }
 0x5cb   :  { %5120 = vmatpush3.bf16.xpose.msra.mxu1 %v954_v35  ;;  %5121 = vmatprep.mubr.msk.bf16.mxu1 %vm5798_vm1, %v5797_v28 }
 0x5cc   :  { %5131 = vmatprep.subr.bf16.mxu1 %v5797_v28 }
 0x5cd   :  { %v5644_v36 = vpop.eup %5643 }
 0x5ce   :  { %v846_v37 = vmul.f32 %v5644_v36, %v5640_v24 }
 0x5d0   :  { %v848_v39 = vpack.c.bf16 %v846_v37, %v846_v37 }
 0x5d2   :  { %5116 = vmatmul.mubr.msk.bf16.vlgmr.msra.gmra.mrb[8].mxu0 %vm730_vm2, %v848_v39  ;;  %5122 = vmatmul.mubr.msk.bf16.vlgmr.msra.gmra.mrb[20].mxu1 %vm730_vm2, %v947_v40 }
 0x5d3   :  { %5126 = vmatpush3.bf16.xpose.msra.mxu0 %v1004_v41  ;;  %5127 = vmatprep.mubr.msk.bf16.mxu0 %vm5798_vm1, %v5797_v28 }
 0x5d4   :  { %5137 = vmatprep.subr.bf16.mxu0 %v5797_v28  ;;  %5133 = vmatprep.mubr.msk.bf16.mxu1 %vm5798_vm1, %v5797_v28 }
 0x5da   :  { %5128 = vmatmul.mubr.msk.bf16.vlgmr.msra.gmra.mrb[12].mxu0 %vm730_vm2, %v997_v42 }
 0x5db   :  { %5139 = vmatprep.mubr.msk.bf16.mxu0 %vm5798_vm1, %v5797_v28 }
 0x69d   :  { %v6168_v43 = vpop.f32.mrb[16].mxu1 }
 0x69e   :  { %v5111_v44 = vpop.f32.mrb[17].mxu1 }
 0x69f   :  { %v895_v45 = vpop.f32.mrb[18].mxu1 }
 0x6a0   :  { %v5112_v46 = vpop.f32.mrb[19].mxu1 }
 0x6a5   :  { %v6170_v47 = vpop.f32.mrb[8].mxu0  ;;  %v990_v48 = vpop.f32.mrb[20].mxu1 }
 0x6a6   :  { %v991_v49 = vadd.f32 %v990_v48, %v6128_v63  ;;  %v5117_v50 = vpop.f32.mrb[9].mxu0  ;;  %v5123_v51 = vpop.f32.mrb[21].mxu1 }
 0x6a7   :  { %v943_v53 = vpop.f32.mrb[10].mxu0  ;;  %v993_v54 = vpop.f32.mrb[22].mxu1 }
 0x6a8   :  { %v5118_v56 = vpop.f32.mrb[11].mxu0  ;;  %v5124_v57 = vpop.f32.mrb[23].mxu1  ;;  %v1046_v58 = vsel %vm730_vm2, %v991_v49, -inf }
 0x6a9   :  { %1047 = vmax.xlane.f32.xlu0 %v1046_v58 }
 0x6ad   :  { %v1040_v59 = vpop.f32.mrb[12].mxu0 }
 0x6ae   :  { %v1041_v60 = vadd.f32 %v1040_v59, %v6128_v63  ;;  %v5129_v61 = vpop.f32.mrb[13].mxu0 }
 0x6af   :  { %v1043_v62 = vpop.f32.mrb[14].mxu0 }
 0x6b0   :  { %v5130_v0 = vpop.f32.mrb[15].mxu0  ;;  %v1049_v1 = vsel %vm730_vm2, %v1041_v60, -inf }
 0x6b1   :  { %1050 = vmax.xlane.f32.xlu1 %v1049_v1 }
 0x6c2   :  { %1118 = vrot.lane.b32.xlu1 %v6110_v55, %s6982_s26 }
 0x6c6   :  { %1168 = vrot.lane.b32.xlu1 %v6108_v52, %s6980_s20 }
 0x6ca   :  { %1218 = vrot.lane.b32.xlu1 %v6110_v55, %s6980_s20 }
 0x6ce   :  { %1216 = vrot.lane.b32.xlu1 %v6110_v55, %s6978_s2 }
 0x736   :  { %v1048_v2 = vpop.xlane.xlu0 %1047 }
 0x737   :  { %v1052_v3 = vsub.f32 %v991_v49, %v1048_v2 }
 0x739   :  { %v1054_v4 = vmul.f32 1.442695, %v1052_v3 }
 0x73b   :  { %5645 = vpow2.f32 %v1054_v4 }
 0x73e   :  { %v1051_v5 = vpop.xlane.xlu1 %1050 }
 0x73f   :  { %v1053_v6 = vsub.f32 %v1041_v60, %v1051_v5 }
 0x741   :  { %v1056_v7 = vmul.f32 1.442695, %v1053_v6 }
 0x742   :  { %v1119_v8 = vpop.permute.xlu1 %1118 }
 0x743   :  { %5647 = vpow2.f32 %v1056_v7  ;;  %v1124_v9 = vsel %vm854_vm4, %v1119_v8, 0 }
 0x744   :  { %5138 = vmatpush3.bf16.msra.mxu0 %v1124_v9 }
 0x745   :  { %v5646_v10 = vpop.eup %5645  ;;  %5149 = vmatprep.subr.bf16.mxu0 %v5797_v28 }
 0x746   :  { %v1058_v11 = vsel %vm730_vm2, %v5646_v10, 0.0  ;;  %v1169_v23 = vpop.permute.xlu1 %1168 }
 0x747   :  { %1059 = vadd.xlane.f32.xlu0 %v1058_v11  ;;  %v1174_v27 = vsel %vm730_vm2, %v1169_v23, 0 }
 0x74a   :  { %v1219_v26 = vpop.permute.xlu1 %1218 }
 0x74b   :  { %v1224_v30 = vsel %vm730_vm2, %v1219_v26, 0 }
 0x74d   :  { %v5648_v12 = vpop.eup %5647 }
 0x74e   :  { %v1061_v15 = vsel %vm730_vm2, %v5648_v12, 0.0  ;;  %v1217_v32 = vpop.permute.xlu1 %1216 }
 0x74f   :  { %1062 = vadd.xlane.f32.xlu0 %v1061_v15 }
 0x765   :  { %1070 = vrot.lane.b32.xlu0 %v6108_v52, %s6982_s26 }
 0x769   :  { %1166 = vrot.lane.b32.xlu0 %v6108_v52, %s6978_s2 }
 0x7d4   :  { %v1060_v16 = vpop.xlane.xlu0 %1059 }
 0x7d5   :  { %5649 = vrcp.f32 %v1060_v16 }
 0x7dc   :  { %v1063_v17 = vpop.xlane.xlu0 %1062 }
 0x7dd   :  { %5651 = vrcp.f32 %v1063_v17 }
 0x7df   :  { %v5650_v18 = vpop.eup %5649 }
 0x7e0   :  { %v1071_v19 = vpop.permute.xlu0 %1070  ;;  %v1066_v20 = vmul.f32 %v5650_v18, %v5646_v10 }
 0x7e1   :  { %v1076_v21 = vsel %vm854_vm4, %v1071_v19, 0 }
 0x7e2   :  { %5132 = vmatpush3.bf16.msra.mxu1 %v1076_v21  ;;  %v1068_v22 = vpack.c.bf16 %v1066_v20, %v1066_v20 }
 0x7e3   :  { %5143 = vmatprep.subr.bf16.mxu1 %v5797_v28 }
 0x7e4   :  { %v1167_v31 = vpop.permute.xlu0 %1166 }
 0x7e5   :  { %5134 = vmatmul.mubr.msk.bf16.vlgmr.msra.gmra.mrb[24].mxu1 %vm730_vm2, %v1068_v22 }
 0x7e6   :  { %5145 = vmatprep.mubr.msk.bf16.mxu1 %vm5798_vm1, %v5797_v28 }
 0x7e7   :  { %v5652_v24 = vpop.eup %5651 }
 0x7e8   :  { %v1067_v25 = vmul.f32 %v5652_v24, %v5648_v12 }
 0x7ea   :  { %v1069_v29 = vpack.c.bf16 %v1067_v25, %v1067_v25 }
 0x7eb   :  { %5144 = vmatpush3.bf16.xpose.msra.mxu1 %v1174_v27 }
 0x7ec   :  { %5140 = vmatmul.mubr.msk.bf16.vlgmr.msra.gmra.mrb[16].mxu0 %vm730_vm2, %v1069_v29  ;;  %5155 = vmatprep.subr.bf16.mxu1 %v5797_v28 }
 0x7ed   :  { %5150 = vmatpush3.bf16.xpose.msra.mxu0 %v1224_v30  ;;  %5151 = vmatprep.mubr.msk.bf16.mxu0 %vm5798_vm1, %v5797_v28 }
 0x7ee   :  { %5161 = vmatprep.subr.bf16.mxu0 %v5797_v28 }
 0x7f2   :  { %5146 = vmatmul.mubr.msk.bf16.vlgmr.msra.gmra.mrb[28].mxu1 %vm730_vm2, %v1167_v31 }
 0x7f3   :  { %5157 = vmatprep.mubr.msk.bf16.mxu1 %vm5798_vm1, %v5797_v28 }
 0x7f4   :  { %5152 = vmatmul.mubr.msk.bf16.vlgmr.msra.gmra.mrb[20].mxu0 %vm730_vm2, %v1217_v32 }
 0x7f5   :  { %5163 = vmatprep.mubr.msk.bf16.mxu0 %vm5798_vm1, %v5797_v28 }
 0x8b8   :  { %v6210_v33 = vpop.f32.mrb[24].mxu1 }
 0x8b9   :  { %v5135_v34 = vpop.f32.mrb[25].mxu1 }
 0x8ba   :  { %v1115_v35 = vpop.f32.mrb[26].mxu1 }
 0x8bb   :  { %v5136_v36 = vpop.f32.mrb[27].mxu1 }
 0x8bf   :  { %v6212_v37 = vpop.f32.mrb[16].mxu0 }
 0x8c0   :  { %v5501_v38 = vpack.i.bf16 %v6212_v37, %v6210_v33  ;;  %v5141_v39 = vpop.f32.mrb[17].mxu0 }
 0x8c1   :  { %v1163_v40 = vpop.f32.mrb[18].mxu0 }
 0x8c2   :  { %v5142_v41 = vpop.f32.mrb[19].mxu0 }
 0x8c5   :  { %v1210_v42 = vpop.f32.mrb[28].mxu1 }
 0x8c6   :  { %v1211_v44 = vadd.f32 %v1210_v42, %v6128_v63  ;;  %v5147_v45 = vpop.f32.mrb[29].mxu1 }
 0x8c7   :  { %v1213_v46 = vpop.f32.mrb[30].mxu1  ;;  %v1260_v48 = vpop.f32.mrb[20].mxu0 }
 0x8c8   :  { %v1261_v49 = vadd.f32 %v1260_v48, %v6128_v63  ;;  %v5148_v50 = vpop.f32.mrb[31].mxu1  ;;  %v5153_v51 = vpop.f32.mrb[21].mxu0  ;;  %v1266_v53 = vsel %vm730_vm2, %v1211_v44, -inf }
 0x8c9   :  { %v1263_v54 = vpop.f32.mrb[22].mxu0  ;;  %1267 = vmax.xlane.f32.xlu0 %v1266_v53 }
 0x8ca   :  { %v5154_v56 = vpop.f32.mrb[23].mxu0  ;;  %v1269_v57 = vsel %vm730_vm2, %v1261_v49, -inf }
 0x8cb   :  { %1270 = vmax.xlane.f32.xlu1 %v1269_v57 }
 0x8dc   :  { %1338 = vrot.lane.b32.xlu1 %v6110_v55, %s6976_s24 }
 0x8e0   :  { %1388 = vrot.lane.b32.xlu1 %v6108_v52, %s6974_s25 }
 0x8e4   :  { %1438 = vrot.lane.b32.xlu1 %v6110_v55, %s6974_s25 }
 0x8e8   :  { %1436 = vrot.lane.b32.xlu1 %v6110_v55, %s6972_s27 }
 0x956   :  { %v1268_v58 = vpop.xlane.xlu0 %1267 }
 0x957   :  { %v1272_v59 = vsub.f32 %v1211_v44, %v1268_v58 }
 0x958   :  { %v1271_v60 = vpop.xlane.xlu1 %1270 }
 0x959   :  { %v1274_v61 = vmul.f32 1.442695, %v1272_v59  ;;  %v1273_v62 = vsub.f32 %v1261_v49, %v1271_v60 }
 0x95b   :  { %5653 = vpow2.f32 %v1274_v61  ;;  %v1276_v0 = vmul.f32 1.442695, %v1273_v62 }
 0x95c   :  { %v1339_v1 = vpop.permute.xlu1 %1338 }
 0x95d   :  { %5655 = vpow2.f32 %v1276_v0  ;;  %v1344_v2 = vsel %vm854_vm4, %v1339_v1, 0 }
 0x95e   :  { %5162 = vmatpush3.bf16.msra.mxu0 %v1344_v2 }
 0x95f   :  { %5173 = vmatprep.subr.bf16.mxu0 %v5797_v28 }
 0x960   :  { %v1389_v12 = vpop.permute.xlu1 %1388 }
 0x961   :  { %v1394_v20 = vsel %vm730_vm2, %v1389_v12, 0 }
 0x964   :  { %v1439_v19 = vpop.permute.xlu1 %1438 }
 0x965   :  { %v5654_v3 = vpop.eup %5653  ;;  %v1444_v22 = vsel %vm730_vm2, %v1439_v19, 0 }
 0x966   :  { %v1278_v4 = vsel %vm730_vm2, %v5654_v3, 0.0 }
 0x967   :  { %v5656_v5 = vpop.eup %5655  ;;  %1279 = vadd.xlane.f32.xlu0 %v1278_v4 }
 0x968   :  { %v1281_v6 = vsel %vm730_vm2, %v5656_v5, 0.0  ;;  %v1437_v24 = vpop.permute.xlu1 %1436 }
 0x96b   :  { %1282 = vadd.xlane.f32.xlu0 %v1281_v6 }
 0x981   :  { %1290 = vrot.lane.b32.xlu0 %v6108_v52, %s6976_s24 }
 0x985   :  { %1386 = vrot.lane.b32.xlu0 %v6108_v52, %s6972_s27  ;;  %s6990_s27 = smov 8  }
 0x9f4   :  { %v1280_v7 = vpop.xlane.xlu0 %1279 }
 0x9f5   :  { %5657 = vrcp.f32 %v1280_v7 }
 0x9f8   :  { %v1283_v8 = vpop.xlane.xlu0 %1282 }
 0x9f9   :  { %5659 = vrcp.f32 %v1283_v8  ;;  %v5605_v8 = vld [vmem:[%s6951_s7] sm:$0xff]  }
 0x9fc   :  { %v1291_v9 = vpop.permute.xlu0 %1290 }
 0x9fd   :  { %v1296_v10 = vsel %vm854_vm4, %v1291_v9, 0  ;;  %v5606_v9 = vld [vmem:[%s6951_s7 + $0x8] sm:$0xff]  }
 0x9fe   :  { %5156 = vmatpush3.bf16.msra.mxu1 %v1296_v10 }
 0x9ff   :  { %v5658_v11 = vpop.eup %5657  ;;  %5167 = vmatprep.subr.bf16.mxu1 %v5797_v28 }
 0xa00   :  { %v1286_v15 = vmul.f32 %v5658_v11, %v5654_v3  ;;  %v1387_v23 = vpop.permute.xlu0 %1386 }
 0xa02   :  { %v1288_v16 = vpack.c.bf16 %v1286_v15, %v1286_v15 }
 0xa03   :  { %v5660_v17 = vpop.eup %5659 }
 0xa04   :  { %5158 = vmatmul.mubr.msk.bf16.vlgmr.msra.gmra.mrb[32].mxu1 %vm730_vm2, %v1288_v16  ;;  %v1287_v18 = vmul.f32 %v5660_v17, %v5656_v5 }
 0xa05   :  { %5169 = vmatprep.mubr.msk.bf16.mxu1 %vm5798_vm1, %v5797_v28 }
 0xa06   :  { %v1289_v21 = vpack.c.bf16 %v1287_v18, %v1287_v18 }
 0xa07   :  { %5168 = vmatpush3.bf16.xpose.msra.mxu1 %v1394_v20 }
 0xa08   :  { %5164 = vmatmul.mubr.msk.bf16.vlgmr.msra.gmra.mrb[24].mxu0 %vm730_vm2, %v1289_v21  ;;  %5179 = vmatprep.subr.bf16.mxu1 %v5797_v28 }
 0xa09   :  { %5174 = vmatpush3.bf16.xpose.msra.mxu0 %v1444_v22  ;;  %5175 = vmatprep.mubr.msk.bf16.mxu0 %vm5798_vm1, %v5797_v28 }
 0xa0a   :  { %5185 = vmatprep.subr.bf16.mxu0 %v5797_v28 }
 0xa0e   :  { %5170 = vmatmul.mubr.msk.bf16.vlgmr.msra.gmra.mrb[36].mxu1 %vm730_vm2, %v1387_v23 }
 0xa0f   :  { %5181 = vmatprep.mubr.msk.bf16.mxu1 %vm5798_vm1, %v5797_v28 }
 0xa10   :  { %5176 = vmatmul.mubr.msk.bf16.vlgmr.msra.gmra.mrb[28].mxu0 %vm730_vm2, %v1437_v24 }
 0xa11   :  { %5187 = vmatprep.mubr.msk.bf16.mxu0 %vm5798_vm1, %v5797_v28 }
 0xad7   :  { %v1332_v25 = vpop.f32.mrb[32].mxu1 }
 0xad8   :  { %v5159_v26 = vpop.f32.mrb[33].mxu1 }
 0xad9   :  { %v1335_v27 = vpop.f32.mrb[34].mxu1 }
 0xada   :  { %v5160_v29 = vpop.f32.mrb[35].mxu1 }
 0xadb   :  { %v1380_v30 = vpop.f32.mrb[24].mxu0 }
 0xadc   :  { %v5506_v31 = vpack.i.bf16 %v1380_v30, %v1332_v25  ;;  %v5165_v32 = vpop.f32.mrb[25].mxu0 }
 0xadd   :  { %v1383_v34 = vpop.f32.mrb[26].mxu0 }
 0xade   :  { %v5166_v35 = vpop.f32.mrb[27].mxu0 }
 0xae1   :  { %v1430_v36 = vpop.f32.mrb[36].mxu1 }
 0xae2   :  { %v1431_v39 = vadd.f32 %v1430_v36, %v6128_v63  ;;  %v5171_v40 = vpop.f32.mrb[37].mxu1 }
 0xae3   :  { %v1433_v41 = vpop.f32.mrb[38].mxu1  ;;  %v1480_v42 = vpop.f32.mrb[28].mxu0 }
 0xae4   :  { %v1481_v44 = vadd.f32 %v1480_v42, %v6128_v63  ;;  %v5172_v45 = vpop.f32.mrb[39].mxu1  ;;  %v5177_v46 = vpop.f32.mrb[29].mxu0  ;;  %v1486_v48 = vsel %vm730_vm2, %v1431_v39, -inf }
 0xae5   :  { %v1483_v49 = vpop.f32.mrb[30].mxu0  ;;  %1487 = vmax.xlane.f32.xlu0 %v1486_v48 }
 0xae6   :  { %v5178_v50 = vpop.f32.mrb[31].mxu0  ;;  %v1489_v51 = vsel %vm730_vm2, %v1481_v44, -inf }
 0xae7   :  { %1490 = vmax.xlane.f32.xlu1 %v1489_v51 }
 0xaf8   :  { %1558 = vrot.lane.b32.xlu1 %v6110_v55, %s6970_s28 }
 0xafc   :  { %5502 = vrot.lane.b32.xlu1 %v5501_v38, %s6968_s29  ;;  %s6988_s29 = smov 104  }
 0xb00   :  { %5507 = vrot.lane.b32.xlu1 %v5506_v31, %s6964_s0  ;;  %s6991_s0 = smov 16  }
 0xb72   :  { %v1488_v53 = vpop.xlane.xlu0 %1487 }
 0xb73   :  { %v1492_v54 = vsub.f32 %v1431_v39, %v1488_v53 }
 0xb74   :  { %v1491_v56 = vpop.xlane.xlu1 %1490 }
 0xb75   :  { %v1494_v57 = vmul.f32 1.442695, %v1492_v54  ;;  %v1493_v58 = vsub.f32 %v1481_v44, %v1491_v56 }
 0xb77   :  { %5661 = vpow2.f32 %v1494_v57  ;;  %v1496_v59 = vmul.f32 1.442695, %v1493_v58 }
 0xb78   :  { %v1559_v60 = vpop.permute.xlu1 %1558 }
 0xb79   :  { %5663 = vpow2.f32 %v1496_v59  ;;  %v1564_v55 = vsel %vm854_vm4, %v1559_v60, 0 }
 0xb7a   :  { %5186 = vmatpush3.bf16.msra.mxu0 %v1564_v55 }
 0xb7b   :  { %5199 = vmatprep.subr.bf16.mxu0 %v5797_v28 }
 0xb7c   :  { %v5503_v21 = vpop.permute.xlu1 %5502 }
 0xb7d   :  { %v5505_v23 = vunpack.i.h.bf16 %v5503_v21  ;;  %v5504_v24 = vunpack.i.l.bf16 %v5503_v21 }
 0xb7f   :  { %v1631_v29 = vsel %vm730_vm2, %v6170_v47, %v5505_v23  ;;  %v1630_v30 = vsel %vm730_vm2, %v6168_v43, %v5504_v24  ;;  %v4723_v43 = vld [vmem:[%s6952_s8] ss:$0 sm:$0xff] }
 0xb80   :  { %v5508_v22 = vpop.permute.xlu1 %5507 }
 0xb81   :  { %v5662_v61 = vpop.eup %5661  ;;  %v5510_v25 = vunpack.i.h.bf16 %v5508_v22  ;;  %v5509_v26 = vunpack.i.l.bf16 %v5508_v22 }
 0xb82   :  { %v1498_v33 = vsel %vm730_vm2, %v5662_v61, 0.0 }
 0xb83   :  { %v5664_v37 = vpop.eup %5663  ;;  %1499 = vadd.xlane.f32.xlu0 %v1498_v33  ;;  %v1634_v34 = vsel %vm1632_vm5, %v1631_v29, %v5510_v25  ;;  %v1633_v35 = vsel %vm1632_vm5, %v1630_v30, %v5509_v26  ;;  %v5608_v33 = vld [vmem:[%s6955_s11 + $0x8] sm:$0xff]  }
 0xb84   :  { %v1501_v38 = vsel %vm730_vm2, %v5664_v37, 0.0 }
 0xb87   :  { %1502 = vadd.xlane.f32.xlu0 %v1501_v38 }
 0xb9d   :  { %1510 = vrot.lane.b32.xlu0 %v6108_v52, %s6970_s28 }
 0xc10   :  { %v1500_v62 = vpop.xlane.xlu0 %1499 }
 0xc11   :  { %5665 = vrcp.f32 %v1500_v62 }
 0xc14   :  { %v1503_v0 = vpop.xlane.xlu0 %1502 }
 0xc15   :  { %5667 = vrcp.f32 %v1503_v0 }
 0xc18   :  { %v1511_v1 = vpop.permute.xlu0 %1510 }
 0xc19   :  { %v1516_v2 = vsel %vm854_vm4, %v1511_v1, 0 }
 0xc1a   :  { %5180 = vmatpush3.bf16.msra.mxu1 %v1516_v2 }
 0xc1b   :  { %v5666_v3 = vpop.eup %5665  ;;  %5191 = vmatprep.subr.bf16.mxu1 %v5797_v28 }
 0xc1c   :  { %v1506_v4 = vmul.f32 %v5666_v3, %v5662_v61  ;;  %v5607_v61 = vld [vmem:[%s6955_s11] sm:$0xff]  }
 0xc1e   :  { %v1508_v5 = vpack.c.bf16 %v1506_v4, %v1506_v4 }
 0xc1f   :  { %v5668_v6 = vpop.eup %5667 }
 0xc20   :  { %5182 = vmatmul.mubr.msk.bf16.vlgmr.msra.gmra.mrb[40].mxu1 %vm730_vm2, %v1508_v5  ;;  %v1507_v7 = vmul.f32 %v5668_v6, %v5664_v37  ;;  %v4727_v5 = vld [vmem:[%s6953_s9] ss:$0 sm:$0xff] }
 0xc21   :  { %5195 = vmatprep.mubr.msk.bf16.mxu1 %vm5798_vm1, %v5797_v28  ;;  %5192 = vmatpush3.bf16.msra.mxu1 %v5605_v8  ;;  %v4728_v8 = vld [vmem:[%s6954_s10] ss:$0 sm:$0xff] }
 0xc22   :  { %v1509_v52 = vpack.c.bf16 %v1507_v7, %v1507_v7  ;;  %5193 = vmatprep.subr.bf16.mxu1 %v5797_v28 }
 0xc24   :  { %5188 = vmatmul.mubr.msk.bf16.vlgmr.msra.gmra.mrb[32].mxu0 %vm730_vm2, %v1509_v52 }
 0xc25   :  { %5203 = vmatprep.mubr.msk.bf16.mxu0 %vm5798_vm1, %v5797_v28  ;;  %5194 = vmatpush3.bf16.msra.mxu1 %v5606_v9 }
 0xc26   :  { %5207 = vmatprep.subr.bf16.mxu1 %v5797_v28  ;;  %5200 = vmatpush3.bf16.msra.mxu0 %v5607_v61  ;;  %v5613_v61 = vld [vmem:[%s6949_s5 + $0x10] sm:$0xff]  }
 0xc27   :  { %5201 = vmatprep.subr.bf16.mxu0 %v5797_v28 }
 0xc2a   :  { %5202 = vmatpush3.bf16.msra.mxu0 %v5608_v33  ;;  %v5614_v33 = vld [vmem:[%s6949_s5 + $0x18] sm:$0xff]  }
 0xc2b   :  { %5219 = vmatprep.subr.bf16.mxu0 %v5797_v28 }
 0xcf3   :  { %v1552_v10 = vpop.f32.mrb[40].mxu1 }
 0xcf4   :  { %v5183_v11 = vpop.f32.mrb[41].mxu1 }
 0xcf5   :  { %v1555_v12 = vpop.f32.mrb[42].mxu1 }
 0xcf6   :  { %v5184_v15 = vpop.f32.mrb[43].mxu1 }
 0xcf7   :  { %v1600_v16 = vpop.f32.mrb[32].mxu0  ;;  %v5609_v15 = vld [vmem:[%s6957_s13] sm:$0xff]  }
 0xcf8   :  { %v5511_v17 = vpack.i.bf16 %v1600_v16, %v1552_v10  ;;  %v5189_v18 = vpop.f32.mrb[33].mxu0  ;;  %v5610_v16 = vld [vmem:[%s6957_s13 + $0x8] sm:$0xff]  }
 0xcf9   :  { %v1603_v19 = vpop.f32.mrb[34].mxu0  ;;  %v5612_v18 = vld [vmem:[%s6957_s13 + $0x18] sm:$0xff]  }
 0xcfa   :  { %v5190_v20 = vpop.f32.mrb[35].mxu0  ;;  %5512 = vrot.lane.b32.xlu0 %v5511_v17, %s6966_s30  ;;  %v5611_v17 = vld [vmem:[%s6957_s13 + $0x10] sm:$0xff]   ;;  %v4729_v19 = vld [vmem:[%s6956_s12] ss:$0 sm:$0xff]  ;;  %s6992_s30 = smov 24  }
 0xd6c   :  { %v5513_v27 = vpop.permute.xlu0 %5512 }
 0xd6d   :  { %v5515_v31 = vunpack.i.h.bf16 %v5513_v27  ;;  %v5514_v32 = vunpack.i.l.bf16 %v5513_v27 }
 0xd6f   :  { %v1637_v36 = vsel %vm1635_vm6, %v1634_v34, %v5515_v31  ;;  %v1636_v39 = vsel %vm1635_vm6, %v1633_v35, %v5514_v32 }
 0xd70   :  { %v1638_v40 = vpack.c.bf16 %v1637_v36, %v1636_v39 }
 0xd72   :  { %5196 = vmatmul.mubr.msk.bf16.vlgmr.msra.gmra.mrb[44].mxu1 %vm610_vm0, %v1638_v40 }
 0xd73   :  { %5215 = vmatprep.mubr.msk.bf16.mxu1 %vm5798_vm1, %v5797_v28  ;;  %5208 = vmatpush3.bf16.msra.mxu1 %v5609_v15  ;;  %v4748_v15 = vld [vmem:[%s6950_s6 + $0x1] ss:$0 sm:$0xff] }
 0xd74   :  { %5209 = vmatprep.subr.bf16.mxu1 %v5797_v28 }
 0xd77   :  { %5210 = vmatpush3.bf16.msra.mxu1 %v5610_v16 }
 0xd78   :  { %5211 = vmatprep.subr.bf16.mxu1 %v5797_v28 }
 0xd7b   :  { %5212 = vmatpush3.bf16.msra.mxu1 %v5611_v17 }
 0xd7c   :  { %5213 = vmatprep.subr.bf16.mxu1 %v5797_v28 }
 0xd7f   :  { %5214 = vmatpush3.bf16.msra.mxu1 %v5612_v18 }
 0xd80   :  { %5233 = vmatprep.subr.bf16.mxu1 %v5797_v28 }
 0xe45   :  { %v1699_v47 = vpop.f32.mrb[44].mxu1 }
 0xe46   :  { %v1700_v41 = vadd.f32 %v4723_v43, %v1699_v47  ;;  %v5197_v42 = vpop.f32.mrb[45].mxu1 }
 0xe47   :  { %v1702_v44 = vpop.f32.mrb[46].mxu1 }
 0xe48   :  { %v6303_v45 = vadd.f32 %v1700_v41, %v6070_v13  ;;  %v1703_v46 = vadd.f32 %v4723_v43, %v1702_v44  ;;  %v5198_v48 = vpop.f32.mrb[47].mxu1  ;;  %v4733_v43 = vld [vmem:[%s6958_s14] ss:$0 sm:$0xff] }
 0xe4a   :  { %v6306_v49 = vadd.f32 %v1703_v46, %v6072_v14  ;;  %v1710_v50 = vsel %vm610_vm0, %v6303_v45, 0.0 }
 0xe4b   :  { %1711 = vadd.xlane.f32.xlu1 %v1710_v50 }
 0xe4c   :  { %v1713_v51 = vsel %vm610_vm0, %v6306_v49, 0.0 }
 0xe4d   :  { %1714 = vadd.xlane.f32.xlu0 %v1713_v51 }
 0xed8   :  { %v1712_v53 = vpop.xlane.xlu1 %1711 }
 0xed9   :  { %v1716_v54 = vmul.f32 0.03125, %v1712_v53 }
 0xeda   :  { %v1715_v56 = vpop.xlane.xlu0 %1714 }
 0xedb   :  { %v1718_v57 = vsub.f32 %v6303_v45, %v1716_v54  ;;  %v1717_v13 = vmul.f32 0.03125, %v1715_v56 }
 0xedd   :  { %v1719_v58 = vsub.f32 %v6306_v49, %v1717_v13  ;;  %v1720_v59 = vmul.f32 %v1718_v57, %v1718_v57 }
 0xedf   :  { %v1722_v14 = vsel %vm610_vm0, %v1720_v59, 0.0  ;;  %v1721_v60 = vmul.f32 %v1719_v58, %v1719_v58 }
 0xee0   :  { %1723 = vadd.xlane.f32.xlu0 %v1722_v14 }
 0xee1   :  { %v1725_v55 = vsel %vm610_vm0, %v1721_v60, 0.0 }
 0xee4   :  { %1726 = vadd.xlane.f32.xlu0 %v1725_v55 }
 0xf6d   :  { %v1724_v37 = vpop.xlane.xlu0 %1723 }
 0xf6e   :  { %v1728_v38 = vmul.f32 0.03125, %v1724_v37 }
 0xf70   :  { %v1730_v62 = vadd.f32 1e-06, %v1728_v38 }
 0xf71   :  { %v1727_v0 = vpop.xlane.xlu0 %1726 }
 0xf72   :  { %5669 = vrsqrt.f32 %v1730_v62  ;;  %v1729_v1 = vmul.f32 0.03125, %v1727_v0 }
 0xf74   :  { %v1731_v2 = vadd.f32 1e-06, %v1729_v1 }
 0xf76   :  { %5671 = vrsqrt.f32 %v1731_v2 }
 0xf7c   :  { %v5670_v3 = vpop.eup %5669 }
 0xf7d   :  { %v1734_v4 = vmul.f32 %v5670_v3, %v1718_v57 }
 0xf7f   :  { %v1742_v7 = vmul.f32 %v4727_v5, %v1734_v4  ;;  %v4741_v4 = vld [vmem:[%s6947_s3 + $0x1] ss:$0 sm:$0xff] }
 0xf80   :  { %v5672_v6 = vpop.eup %5671 }
 0xf81   :  { %v1735_v52 = vmul.f32 %v5672_v6, %v1719_v58  ;;  %v1750_v10 = vadd.f32 %v4728_v8, %v1742_v7 }
 0xf83   :  { %v1743_v9 = vmul.f32 %v4727_v5, %v1735_v52 }
 0xf85   :  { %v1751_v11 = vadd.f32 %v4728_v8, %v1743_v9  ;;  %v4742_v8 = vld [vmem:[%s6948_s4 + $0x1] ss:$0 sm:$0xff] }
 0xf87   :  { %v1752_v12 = vpack.c.bf16 %v1751_v11, %v1750_v10 }
 0xf89   :  { %5204 = vmatmul.mubr.msk.bf16.vlgmr.msra.gmra.mrb[36].mxu0 %vm610_vm0, %v1752_v12 }
 0xf8a   :  { %5223 = vmatprep.mubr.msk.bf16.mxu0 %vm5798_vm1, %v5797_v28  ;;  %5220 = vmatpush3.bf16.msra.mxu0 %v5613_v61 }
 0xf8b   :  { %5221 = vmatprep.subr.bf16.mxu0 %v5797_v28 }
 0xf8e   :  { %5222 = vmatpush3.bf16.msra.mxu0 %v5614_v33 }
 0xf8f   :  { %5227 = vmatprep.subr.bf16.mxu0 %v5797_v28 }
0x105c   :  { %v1813_v20 = vpop.f32.mrb[36].mxu0 }
0x105d   :  { %v1814_v21 = vadd.f32 %v4729_v19, %v1813_v20  ;;  %v5205_v22 = vpop.f32.mrb[37].mxu0 }
0x105e   :  { %v1816_v23 = vpop.f32.mrb[38].mxu0 }
0x105f   :  { %v1822_v24 = vmul.f32 0.70710677, %v1814_v21  ;;  %v1817_v25 = vadd.f32 %v4729_v19, %v1816_v23  ;;  %v5206_v26 = vpop.f32.mrb[39].mxu0  ;;  %v1820_v32 = vmul.f32 0.5, %v1814_v21 }
0x1061   :  { %5673 = verf.f32 %v1822_v24  ;;  %v1823_v27 = vmul.f32 0.70710677, %v1817_v25  ;;  %v1821_v34 = vmul.f32 0.5, %v1817_v25 }
0x1063   :  { %5675 = verf.f32 %v1823_v27 }
0x106b   :  { %v5674_v29 = vpop.eup %5673 }
0x106c   :  { %v1826_v30 = vadd.f32 1.0, %v5674_v29 }
0x106d   :  { %v5676_v31 = vpop.eup %5675 }
0x106e   :  { %v1827_v35 = vadd.f32 1.0, %v5676_v31  ;;  %v1828_v36 = vmul.f32 %v1826_v30, %v1820_v32 }
0x1070   :  { %v1829_v39 = vmul.f32 %v1827_v35, %v1821_v34 }
0x1072   :  { %v1830_v40 = vpack.c.bf16 %v1829_v39, %v1828_v36 }
0x1074   :  { %5216 = vmatmul.mubr.msk.bf16.vlgmr.msra.gmra.mrb[48].mxu1 %vm1870_vm7, %v1830_v40 }
0x1075   :  { %5235 = vmatprep.mubr.msk.bf16.mxu1 %vm5798_vm1, %v5797_v28 }
0x1147   :  { %v1908_v47 = vpop.f32.mrb[48].mxu1 }
0x1148   :  { %v1909_v41 = vadd.f32 %v4733_v43, %v1908_v47  ;;  %v5217_v42 = vpop.f32.mrb[49].mxu1 }
0x1149   :  { %v1911_v44 = vpop.f32.mrb[50].mxu1 }
0x114a   :  { %v6359_v46 = vadd.f32 %v1909_v41, %v6303_v45  ;;  %v1912_v48 = vadd.f32 %v4733_v43, %v1911_v44  ;;  %v5218_v50 = vpop.f32.mrb[51].mxu1 }
0x114c   :  { %v6362_v51 = vadd.f32 %v1912_v48, %v6306_v49  ;;  %v1921_v53 = vsel %vm610_vm0, %v6359_v46, 0.0 }
0x114d   :  { %1922 = vadd.xlane.f32.xlu1 %v1921_v53 }
0x114e   :  { %v1924_v54 = vsel %vm610_vm0, %v6362_v51, 0.0 }
0x114f   :  { %1925 = vadd.xlane.f32.xlu0 %v1924_v54 }
0x11da   :  { %v1923_v56 = vpop.xlane.xlu1 %1922 }
0x11db   :  { %v1927_v57 = vmul.f32 0.03125, %v1923_v56 }
0x11dc   :  { %v1926_v13 = vpop.xlane.xlu0 %1925 }
0x11dd   :  { %v1929_v58 = vsub.f32 %v6359_v46, %v1927_v57  ;;  %v1928_v45 = vmul.f32 0.03125, %v1926_v13 }
0x11df   :  { %v1930_v59 = vsub.f32 %v6362_v51, %v1928_v45  ;;  %v1931_v14 = vmul.f32 %v1929_v58, %v1929_v58 }
0x11e1   :  { %v1933_v49 = vsel %vm610_vm0, %v1931_v14, 0.0  ;;  %v1932_v60 = vmul.f32 %v1930_v59, %v1930_v59 }
0x11e2   :  { %1934 = vadd.xlane.f32.xlu1 %v1933_v49 }
0x11e3   :  { %v1936_v55 = vsel %vm610_vm0, %v1932_v60, 0.0 }
0x11e4   :  { %1937 = vadd.xlane.f32.xlu0 %v1936_v55 }
0x126f   :  { %v1935_v37 = vpop.xlane.xlu1 %1934 }
0x1270   :  { %v1939_v38 = vmul.f32 0.03125, %v1935_v37 }
0x1271   :  { %v1938_v62 = vpop.xlane.xlu0 %1937 }
0x1272   :  { %v1941_v0 = vadd.f32 1e-06, %v1939_v38  ;;  %v1940_v1 = vmul.f32 0.03125, %v1938_v62 }
0x1274   :  { %5677 = vrsqrt.f32 %v1941_v0  ;;  %v1942_v2 = vadd.f32 1e-06, %v1940_v1 }
0x1276   :  { %5679 = vrsqrt.f32 %v1942_v2 }
0x127e   :  { %v5678_v3 = vpop.eup %5677 }
0x127f   :  { %v1945_v5 = vmul.f32 %v5678_v3, %v1929_v58 }
0x1280   :  { %v5680_v6 = vpop.eup %5679 }
0x1281   :  { %v1946_v7 = vmul.f32 %v5680_v6, %v1930_v59  ;;  %v1953_v52 = vmul.f32 %v4741_v4, %v1945_v5 }
0x1283   :  { %v1954_v9 = vmul.f32 %v4741_v4, %v1946_v7  ;;  %v1961_v10 = vadd.f32 %v4742_v8, %v1953_v52 }
0x1285   :  { %v1962_v11 = vadd.f32 %v4742_v8, %v1954_v9 }
0x1287   :  { %v1963_v12 = vpack.c.bf16 %v1962_v11, %v1961_v10 }
0x1289   :  { %5224 = vmatmul.mubr.msk.bf16.vlgmr.msra.gmra.mrb[40].mxu0 %vm610_vm0, %v1963_v12 }
0x128a   :  { %5229 = vmatprep.mubr.msk.bf16.mxu0 %vm5798_vm1, %v5797_v28 }
0x135c   :  { %v2026_v16 = vpop.f32.mrb[40].mxu0 }
0x135d   :  { %v2027_v17 = vadd.f32 %v4748_v15, %v2026_v16  ;;  %v5225_v18 = vpop.f32.mrb[41].mxu0 }
0x135e   :  { %v2029_v19 = vpop.f32.mrb[42].mxu0 }
0x135f   :  { %v6392_v20 = vpack.c.bf16 %v2027_v17, %v2027_v17  ;;  %v2030_v21 = vadd.f32 %v4748_v15, %v2029_v19  ;;  %v5226_v22 = vpop.f32.mrb[43].mxu0 }
0x1361   :  { %v6394_v23 = vpack.c.bf16 %v2030_v21, %v2030_v21  ;;  %2039 = vrot.lane.b32.xlu1 %v6392_v20, %s5799_s1 }
0x1363   :  { %2087 = vrot.lane.b32.xlu0 %v6394_v23, %s5799_s1 }
0x13d3   :  { %v2040_v24 = vpop.permute.xlu1 %2039 }
0x13d4   :  { %v2045_v25 = vsel %vm730_vm2, %v2040_v24, 0 }
0x13d5   :  { %5228 = vmatpush3.bf16.xpose.msra.mxu0 %v2045_v25  ;;  %v2088_v26 = vpop.permute.xlu0 %2087 }
0x13d6   :  { %v2093_v27 = vsel %vm730_vm2, %v2088_v26, 0  ;;  %5239 = vmatprep.subr.bf16.mxu0 %v5797_v28 }
0x13d7   :  { %5234 = vmatpush3.bf16.xpose.msra.mxu1 %v2093_v27 }
0x13d8   :  { %5245 = vmatprep.subr.bf16.mxu1 %v5797_v28 }
0x13dc   :  { %5230 = vmatmul.mubr.msk.bf16.vlgmr.msra.gmra.mrb[44].mxu0 %vm730_vm2, %v6392_v20 }
0x13dd   :  { %5241 = vmatprep.mubr.msk.bf16.mxu0 %vm5798_vm1, %v5797_v28 }
0x13de   :  { %5236 = vmatmul.mubr.msk.bf16.vlgmr.msra.gmra.mrb[52].mxu1 %vm730_vm2, %v6394_v23 }
0x13df   :  { %5247 = vmatprep.mubr.msk.bf16.mxu1 %vm5798_vm1, %v5797_v28 }
0x14af   :  { %v2081_v29 = vpop.f32.mrb[44].mxu0 }
0x14b0   :  { %v2082_v30 = vadd.f32 %v2081_v29, %v6128_v63  ;;  %v5231_v31 = vpop.f32.mrb[45].mxu0 }
0x14b1   :  { %v2084_v32 = vpop.f32.mrb[46].mxu0  ;;  %v2129_v34 = vpop.f32.mrb[52].mxu1 }
0x14b2   :  { %v2130_v35 = vadd.f32 %v2129_v34, %v6128_v63  ;;  %v5232_v36 = vpop.f32.mrb[47].mxu0  ;;  %v5237_v39 = vpop.f32.mrb[53].mxu1  ;;  %v2135_v40 = vsel %vm730_vm2, %v2082_v30, -inf }
0x14b3   :  { %2136 = vmax.xlane.f32.xlu1 %v2135_v40  ;;  %v2132_v43 = vpop.f32.mrb[54].mxu1 }
0x14b4   :  { %v5238_v47 = vpop.f32.mrb[55].mxu1  ;;  %v2138_v41 = vsel %vm730_vm2, %v2130_v35, -inf }
0x14b5   :  { %2139 = vmax.xlane.f32.xlu0 %v2138_v41 }
0x14c4   :  { %2159 = vrot.lane.b32.xlu1 %v6392_v20, %s5801_s21 }
0x1540   :  { %v2137_v42 = vpop.xlane.xlu1 %2136 }
0x1541   :  { %v2141_v44 = vsub.f32 %v2082_v30, %v2137_v42 }
0x1542   :  { %v2140_v48 = vpop.xlane.xlu0 %2139 }
0x1543   :  { %v2143_v50 = vmul.f32 1.442695, %v2141_v44  ;;  %v2142_v53 = vsub.f32 %v2130_v35, %v2140_v48 }
0x1544   :  { %v2160_v54 = vpop.permute.xlu1 %2159 }
0x1545   :  { %5681 = vpow2.f32 %v2143_v50  ;;  %v2145_v56 = vmul.f32 1.442695, %v2142_v53  ;;  %v2165_v57 = vsel %vm854_vm4, %v2160_v54, 0 }
0x1546   :  { %5240 = vmatpush3.bf16.msra.mxu0 %v2165_v57 }
0x1547   :  { %5683 = vpow2.f32 %v2145_v56  ;;  %5251 = vmatprep.subr.bf16.mxu0 %v5797_v28 }
0x154f   :  { %v5682_v13 = vpop.eup %5681 }
0x1550   :  { %v2147_v58 = vsel %vm730_vm2, %v5682_v13, 0.0 }
0x1551   :  { %v5684_v45 = vpop.eup %5683  ;;  %2148 = vadd.xlane.f32.xlu1 %v2147_v58 }
0x1552   :  { %v2150_v59 = vsel %vm730_vm2, %v5684_v45, 0.0 }
0x1553   :  { %2151 = vadd.xlane.f32.xlu0 %v2150_v59 }
0x1562   :  { %2257 = vrot.lane.b32.xlu1 %v6392_v20, %s5802_s22 }
0x1566   :  { %2307 = vrot.lane.b32.xlu1 %v6394_v23, %s5802_s22 }
0x1569   :  { %2207 = vrot.lane.b32.xlu0 %v6394_v23, %s5801_s21 }
0x156a   :  { %2255 = vrot.lane.b32.xlu1 %v6392_v20, %s5803_s23 }
0x156d   :  { %2305 = vrot.lane.b32.xlu0 %v6394_v23, %s5803_s23 }
0x15de   :  { %v2149_v14 = vpop.xlane.xlu1 %2148 }
0x15df   :  { %5685 = vrcp.f32 %v2149_v14 }
0x15e0   :  { %v2152_v49 = vpop.xlane.xlu0 %2151 }
0x15e1   :  { %5687 = vrcp.f32 %v2152_v49 }
0x15e2   :  { %v2258_v61 = vpop.permute.xlu1 %2257 }
0x15e3   :  { %v2263_v2 = vsel %vm730_vm2, %v2258_v61, 0 }
0x15e4   :  { %v2208_v60 = vpop.permute.xlu0 %2207 }
0x15e5   :  { %v2213_v55 = vsel %vm854_vm4, %v2208_v60, 0 }
0x15e6   :  { %5246 = vmatpush3.bf16.msra.mxu1 %v2213_v55  ;;  %v2308_v1 = vpop.permute.xlu1 %2307 }
0x15e7   :  { %5257 = vmatprep.subr.bf16.mxu1 %v5797_v28  ;;  %v2313_v4 = vsel %vm730_vm2, %v2308_v1, 0 }
0x15e8   :  { %v2306_v6 = vpop.permute.xlu0 %2305 }
0x15e9   :  { %v5686_v33 = vpop.eup %5685 }
0x15ea   :  { %v2155_v37 = vmul.f32 %v5686_v33, %v5682_v13  ;;  %v2256_v5 = vpop.permute.xlu1 %2255 }
0x15eb   :  { %v5688_v38 = vpop.eup %5687 }
0x15ec   :  { %v2156_v62 = vmul.f32 %v5688_v38, %v5684_v45  ;;  %v2157_v0 = vpack.c.bf16 %v2155_v37, %v2155_v37 }
0x15ee   :  { %5242 = vmatmul.mubr.msk.bf16.vlgmr.msra.gmra.mrb[48].mxu0 %vm730_vm2, %v2157_v0  ;;  %v2158_v3 = vpack.c.bf16 %v2156_v62, %v2156_v62 }
0x15ef   :  { %5252 = vmatpush3.bf16.xpose.msra.mxu0 %v2263_v2  ;;  %5253 = vmatprep.mubr.msk.bf16.mxu0 %vm5798_vm1, %v5797_v28 }
0x15f0   :  { %5248 = vmatmul.mubr.msk.bf16.vlgmr.msra.gmra.mrb[56].mxu1 %vm730_vm2, %v2158_v3  ;;  %5263 = vmatprep.subr.bf16.mxu0 %v5797_v28 }
0x15f1   :  { %5258 = vmatpush3.bf16.xpose.msra.mxu1 %v2313_v4  ;;  %5259 = vmatprep.mubr.msk.bf16.mxu1 %vm5798_vm1, %v5797_v28 }
0x15f2   :  { %5269 = vmatprep.subr.bf16.mxu1 %v5797_v28 }
0x15f6   :  { %5254 = vmatmul.mubr.msk.bf16.vlgmr.msra.gmra.mrb[52].mxu0 %vm730_vm2, %v2256_v5 }
0x15f7   :  { %5265 = vmatprep.mubr.msk.bf16.mxu0 %vm5798_vm1, %v5797_v28 }
0x15f8   :  { %5260 = vmatmul.mubr.msk.bf16.vlgmr.msra.gmra.mrb[60].mxu1 %vm730_vm2, %v2306_v6 }
0x15f9   :  { %5271 = vmatprep.mubr.msk.bf16.mxu1 %vm5798_vm1, %v5797_v28 }
0x16c1   :  { %v6450_v7 = vpop.f32.mrb[48].mxu0 }
0x16c2   :  { %v5243_v52 = vpop.f32.mrb[49].mxu0 }
0x16c3   :  { %v2204_v8 = vpop.f32.mrb[50].mxu0  ;;  %v6452_v9 = vpop.f32.mrb[56].mxu1 }
0x16c4   :  { %v5244_v10 = vpop.f32.mrb[51].mxu0  ;;  %v5249_v11 = vpop.f32.mrb[57].mxu1 }
0x16c5   :  { %v2252_v12 = vpop.f32.mrb[58].mxu1 }
0x16c6   :  { %v5250_v15 = vpop.f32.mrb[59].mxu1 }
0x16c9   :  { %v2299_v16 = vpop.f32.mrb[52].mxu0 }
0x16ca   :  { %v2300_v17 = vadd.f32 %v2299_v16, %v6128_v63  ;;  %v5255_v18 = vpop.f32.mrb[53].mxu0 }
0x16cb   :  { %v2302_v19 = vpop.f32.mrb[54].mxu0  ;;  %v2349_v21 = vpop.f32.mrb[60].mxu1 }
0x16cc   :  { %v2350_v22 = vadd.f32 %v2349_v21, %v6128_v63  ;;  %v5256_v24 = vpop.f32.mrb[55].mxu0  ;;  %v5261_v25 = vpop.f32.mrb[61].mxu1  ;;  %v2355_v26 = vsel %vm730_vm2, %v2300_v17, -inf }
0x16cd   :  { %2356 = vmax.xlane.f32.xlu1 %v2355_v26  ;;  %v2352_v27 = vpop.f32.mrb[62].mxu1 }
0x16ce   :  { %v5262_v29 = vpop.f32.mrb[63].mxu1  ;;  %v2358_v30 = vsel %vm730_vm2, %v2350_v22, -inf }
0x16cf   :  { %2359 = vmax.xlane.f32.xlu0 %v2358_v30 }
0x16de   :  { %2379 = vrot.lane.b32.xlu1 %v6392_v20, %s6982_s26 }
0x16e2   :  { %2477 = vrot.lane.b32.xlu1 %v6392_v20, %s6980_s20 }
0x16e6   :  { %2527 = vrot.lane.b32.xlu1 %v6394_v23, %s6980_s20 }
0x16ea   :  { %2475 = vrot.lane.b32.xlu1 %v6392_v20, %s6978_s2 }
0x175a   :  { %v2357_v31 = vpop.xlane.xlu1 %2356 }
0x175b   :  { %v2361_v32 = vsub.f32 %v2300_v17, %v2357_v31 }
0x175c   :  { %v2360_v34 = vpop.xlane.xlu0 %2359 }
0x175d   :  { %v2363_v35 = vmul.f32 1.442695, %v2361_v32  ;;  %v2362_v36 = vsub.f32 %v2350_v22, %v2360_v34 }
0x175e   :  { %v2380_v39 = vpop.permute.xlu1 %2379 }
0x175f   :  { %5689 = vpow2.f32 %v2363_v35  ;;  %v2365_v40 = vmul.f32 1.442695, %v2362_v36  ;;  %v2385_v43 = vsel %vm854_vm4, %v2380_v39, 0 }
0x1760   :  { %5264 = vmatpush3.bf16.msra.mxu0 %v2385_v43 }
0x1761   :  { %5691 = vpow2.f32 %v2365_v40  ;;  %5275 = vmatprep.subr.bf16.mxu0 %v5797_v28 }
0x1762   :  { %v2478_v57 = vpop.permute.xlu1 %2477 }
0x1763   :  { %v2483_v59 = vsel %vm730_vm2, %v2478_v57, 0 }
0x1766   :  { %v2528_v49 = vpop.permute.xlu1 %2527 }
0x1767   :  { %v2533_v55 = vsel %vm730_vm2, %v2528_v49, 0 }
0x1769   :  { %v5690_v47 = vpop.eup %5689 }
0x176a   :  { %v2367_v41 = vsel %vm730_vm2, %v5690_v47, 0.0  ;;  %v2476_v61 = vpop.permute.xlu1 %2475 }
0x176b   :  { %v5692_v42 = vpop.eup %5691  ;;  %2368 = vadd.xlane.f32.xlu0 %v2367_v41 }
0x176c   :  { %v2370_v44 = vsel %vm730_vm2, %v5692_v42, 0.0 }
0x176f   :  { %2371 = vadd.xlane.f32.xlu0 %v2370_v44 }
0x1785   :  { %2427 = vrot.lane.b32.xlu0 %v6394_v23, %s6982_s26 }
0x1789   :  { %2525 = vrot.lane.b32.xlu0 %v6394_v23, %s6978_s2 }
0x17f8   :  { %v2369_v48 = vpop.xlane.xlu0 %2368 }
0x17f9   :  { %5693 = vrcp.f32 %v2369_v48 }
0x17fc   :  { %v2372_v50 = vpop.xlane.xlu0 %2371 }
0x17fd   :  { %5695 = vrcp.f32 %v2372_v50 }
0x1800   :  { %v2428_v53 = vpop.permute.xlu0 %2427 }
0x1801   :  { %v2433_v54 = vsel %vm854_vm4, %v2428_v53, 0 }
0x1802   :  { %5270 = vmatpush3.bf16.msra.mxu1 %v2433_v54 }
0x1803   :  { %v5694_v56 = vpop.eup %5693  ;;  %5281 = vmatprep.subr.bf16.mxu1 %v5797_v28 }
0x1804   :  { %v2375_v13 = vmul.f32 %v5694_v56, %v5690_v47  ;;  %v2526_v33 = vpop.permute.xlu0 %2525 }
0x1806   :  { %v2377_v58 = vpack.c.bf16 %v2375_v13, %v2375_v13 }
0x1807   :  { %v5696_v45 = vpop.eup %5695 }
0x1808   :  { %v2376_v14 = vmul.f32 %v5696_v45, %v5692_v42  ;;  %5266 = vmatmul.mubr.msk.bf16.vlgmr.msra.gmra.mrb[56].mxu0 %vm730_vm2, %v2377_v58 }
0x1809   :  { %5276 = vmatpush3.bf16.xpose.msra.mxu0 %v2483_v59  ;;  %5277 = vmatprep.mubr.msk.bf16.mxu0 %vm5798_vm1, %v5797_v28 }
0x180a   :  { %v2378_v60 = vpack.c.bf16 %v2376_v14, %v2376_v14  ;;  %5287 = vmatprep.subr.bf16.mxu0 %v5797_v28 }
0x180c   :  { %5272 = vmatmul.mubr.msk.bf16.vlgmr.msra.gmra.mrb[64].mxu1 %vm730_vm2, %v2378_v60 }
0x180d   :  { %5282 = vmatpush3.bf16.xpose.msra.mxu1 %v2533_v55  ;;  %5283 = vmatprep.mubr.msk.bf16.mxu1 %vm5798_vm1, %v5797_v28 }
0x180e   :  { %5293 = vmatprep.subr.bf16.mxu1 %v5797_v28 }
0x1810   :  { %5278 = vmatmul.mubr.msk.bf16.vlgmr.msra.gmra.mrb[60].mxu0 %vm730_vm2, %v2476_v61 }
0x1811   :  { %5289 = vmatprep.mubr.msk.bf16.mxu0 %vm5798_vm1, %v5797_v28 }
0x1814   :  { %5284 = vmatmul.mubr.msk.bf16.vlgmr.msra.gmra.mrb[68].mxu1 %vm730_vm2, %v2526_v33 }
0x1815   :  { %5295 = vmatprep.mubr.msk.bf16.mxu1 %vm5798_vm1, %v5797_v28 }
0x18db   :  { %v6492_v37 = vpop.f32.mrb[56].mxu0 }
0x18dc   :  { %v5267_v38 = vpop.f32.mrb[57].mxu0 }
0x18dd   :  { %v2424_v62 = vpop.f32.mrb[58].mxu0 }
0x18de   :  { %v5268_v0 = vpop.f32.mrb[59].mxu0 }
0x18df   :  { %v6494_v1 = vpop.f32.mrb[64].mxu1 }
0x18e0   :  { %v5516_v2 = vpack.i.bf16 %v6494_v1, %v6492_v37  ;;  %v5273_v3 = vpop.f32.mrb[65].mxu1 }
0x18e1   :  { %v2472_v4 = vpop.f32.mrb[66].mxu1 }
0x18e2   :  { %v5274_v5 = vpop.f32.mrb[67].mxu1 }
0x18e3   :  { %v2519_v6 = vpop.f32.mrb[60].mxu0 }
0x18e4   :  { %v2520_v52 = vadd.f32 %v2519_v6, %v6128_v63  ;;  %v5279_v8 = vpop.f32.mrb[61].mxu0 }
0x18e5   :  { %v2522_v10 = vpop.f32.mrb[62].mxu0 }
0x18e6   :  { %v5280_v11 = vpop.f32.mrb[63].mxu0  ;;  %v2575_v12 = vsel %vm730_vm2, %v2520_v52, -inf }
0x18e7   :  { %2576 = vmax.xlane.f32.xlu1 %v2575_v12  ;;  %v2569_v15 = vpop.f32.mrb[68].mxu1 }
0x18e8   :  { %v2570_v16 = vadd.f32 %v2569_v15, %v6128_v63  ;;  %v5285_v17 = vpop.f32.mrb[69].mxu1 }
0x18e9   :  { %v2572_v18 = vpop.f32.mrb[70].mxu1 }
0x18ea   :  { %v5286_v19 = vpop.f32.mrb[71].mxu1  ;;  %v2578_v21 = vsel %vm730_vm2, %v2570_v16, -inf }
0x18eb   :  { %2579 = vmax.xlane.f32.xlu0 %v2578_v21 }
0x18f8   :  { %2599 = vrot.lane.b32.xlu1 %v6392_v20, %s6976_s24 }
0x18fc   :  { %2697 = vrot.lane.b32.xlu1 %v6392_v20, %s6974_s25 }
0x1900   :  { %2747 = vrot.lane.b32.xlu1 %v6394_v23, %s6974_s25 }
0x1904   :  { %2695 = vrot.lane.b32.xlu1 %v6392_v20, %s6988_s29 }
0x1974   :  { %v2577_v22 = vpop.xlane.xlu1 %2576 }
0x1975   :  { %v2581_v24 = vsub.f32 %v2520_v52, %v2577_v22 }
0x1977   :  { %v2583_v25 = vmul.f32 1.442695, %v2581_v24 }
0x1978   :  { %v2600_v26 = vpop.permute.xlu1 %2599  ;;  %v2580_v27 = vpop.xlane.xlu0 %2579 }
0x1979   :  { %5697 = vpow2.f32 %v2583_v25  ;;  %v2605_v29 = vsel %vm854_vm4, %v2600_v26, 0  ;;  %v2582_v30 = vsub.f32 %v2570_v16, %v2580_v27 }
0x197a   :  { %5288 = vmatpush3.bf16.msra.mxu0 %v2605_v29 }
0x197b   :  { %v2585_v31 = vmul.f32 1.442695, %v2582_v30  ;;  %5299 = vmatprep.subr.bf16.mxu0 %v5797_v28 }
0x197c   :  { %v2698_v42 = vpop.permute.xlu1 %2697 }
0x197d   :  { %5699 = vpow2.f32 %v2585_v31  ;;  %v2703_v53 = vsel %vm730_vm2, %v2698_v42, 0 }
0x1980   :  { %v2748_v56 = vpop.permute.xlu1 %2747 }
0x1981   :  { %v2753_v13 = vsel %vm730_vm2, %v2748_v56, 0 }
0x1983   :  { %v5698_v32 = vpop.eup %5697 }
0x1984   :  { %v2587_v34 = vsel %vm730_vm2, %v5698_v32, 0.0  ;;  %v2696_v58 = vpop.permute.xlu1 %2695 }
0x1985   :  { %2588 = vadd.xlane.f32.xlu0 %v2587_v34 }
0x1987   :  { %v5700_v35 = vpop.eup %5699 }
0x1988   :  { %v2590_v36 = vsel %vm730_vm2, %v5700_v35, 0.0 }
0x1989   :  { %2591 = vadd.xlane.f32.xlu0 %v2590_v36 }
0x199f   :  { %2647 = vrot.lane.b32.xlu0 %v6394_v23, %s6976_s24 }
0x19a3   :  { %2745 = vrot.lane.b32.xlu0 %v6394_v23, %s6988_s29 }
0x1a12   :  { %v2589_v39 = vpop.xlane.xlu0 %2588 }
0x1a13   :  { %5701 = vrcp.f32 %v2589_v39 }
0x1a16   :  { %v2592_v40 = vpop.xlane.xlu0 %2591 }
0x1a17   :  { %5703 = vrcp.f32 %v2592_v40  ;;  %v5615_v40 = vld [vmem:[%s6951_s7 + $0x10] sm:$0xff]  }
0x1a1a   :  { %v2648_v43 = vpop.permute.xlu0 %2647 }
0x1a1b   :  { %v2653_v47 = vsel %vm854_vm4, %v2648_v43, 0  ;;  %v5616_v43 = vld [vmem:[%s6951_s7 + $0x18] sm:$0xff]  }
0x1a1c   :  { %5294 = vmatpush3.bf16.msra.mxu1 %v2653_v47 }
0x1a1d   :  { %v5702_v41 = vpop.eup %5701  ;;  %5305 = vmatprep.subr.bf16.mxu1 %v5797_v28 }
0x1a1e   :  { %v2595_v44 = vmul.f32 %v5702_v41, %v5698_v32  ;;  %v2746_v45 = vpop.permute.xlu0 %2745 }
0x1a20   :  { %v2597_v48 = vpack.c.bf16 %v2595_v44, %v2595_v44 }
0x1a21   :  { %v5704_v50 = vpop.eup %5703 }
0x1a22   :  { %v2596_v54 = vmul.f32 %v5704_v50, %v5700_v35  ;;  %5290 = vmatmul.mubr.msk.bf16.vlgmr.msra.gmra.mrb[64].mxu0 %vm730_vm2, %v2597_v48 }
0x1a23   :  { %5300 = vmatpush3.bf16.xpose.msra.mxu0 %v2703_v53  ;;  %5301 = vmatprep.mubr.msk.bf16.mxu0 %vm5798_vm1, %v5797_v28 }
0x1a24   :  { %v2598_v57 = vpack.c.bf16 %v2596_v54, %v2596_v54  ;;  %5311 = vmatprep.subr.bf16.mxu0 %v5797_v28 }
0x1a26   :  { %5296 = vmatmul.mubr.msk.bf16.vlgmr.msra.gmra.mrb[72].mxu1 %vm730_vm2, %v2598_v57 }
0x1a27   :  { %5306 = vmatpush3.bf16.xpose.msra.mxu1 %v2753_v13  ;;  %5307 = vmatprep.mubr.msk.bf16.mxu1 %vm5798_vm1, %v5797_v28 }
0x1a28   :  { %5317 = vmatprep.subr.bf16.mxu1 %v5797_v28 }
0x1a2a   :  { %5302 = vmatmul.mubr.msk.bf16.vlgmr.msra.gmra.mrb[68].mxu0 %vm730_vm2, %v2696_v58 }
0x1a2b   :  { %5313 = vmatprep.mubr.msk.bf16.mxu0 %vm5798_vm1, %v5797_v28 }
0x1a2e   :  { %5308 = vmatmul.mubr.msk.bf16.vlgmr.msra.gmra.mrb[76].mxu1 %vm730_vm2, %v2746_v45 }
0x1a2f   :  { %5319 = vmatprep.mubr.msk.bf16.mxu1 %vm5798_vm1, %v5797_v28 }
0x1af5   :  { %v2641_v59 = vpop.f32.mrb[64].mxu0 }
0x1af6   :  { %v5291_v14 = vpop.f32.mrb[65].mxu0 }
0x1af7   :  { %v2644_v49 = vpop.f32.mrb[66].mxu0 }
0x1af8   :  { %v5292_v60 = vpop.f32.mrb[67].mxu0 }
0x1af9   :  { %v2689_v55 = vpop.f32.mrb[72].mxu1 }
0x1afa   :  { %v5521_v61 = vpack.i.bf16 %v2689_v55, %v2641_v59  ;;  %v5297_v33 = vpop.f32.mrb[73].mxu1 }
0x1afb   :  { %v2692_v38 = vpop.f32.mrb[74].mxu1 }
0x1afc   :  { %v5298_v62 = vpop.f32.mrb[75].mxu1 }
0x1afd   :  { %v2739_v0 = vpop.f32.mrb[68].mxu0 }
0x1afe   :  { %v2740_v3 = vadd.f32 %v2739_v0, %v6128_v63  ;;  %v5303_v4 = vpop.f32.mrb[69].mxu0 }
0x1aff   :  { %v2742_v5 = vpop.f32.mrb[70].mxu0 }
0x1b00   :  { %v5304_v6 = vpop.f32.mrb[71].mxu0  ;;  %v2795_v52 = vsel %vm730_vm2, %v2740_v3, -inf }
0x1b01   :  { %2796 = vmax.xlane.f32.xlu1 %v2795_v52  ;;  %v2789_v8 = vpop.f32.mrb[76].mxu1 }
0x1b02   :  { %v2790_v10 = vadd.f32 %v2789_v8, %v6128_v63  ;;  %v5309_v11 = vpop.f32.mrb[77].mxu1 }
0x1b03   :  { %v2792_v12 = vpop.f32.mrb[78].mxu1 }
0x1b04   :  { %v5310_v15 = vpop.f32.mrb[79].mxu1  ;;  %v2798_v16 = vsel %vm730_vm2, %v2790_v10, -inf }
0x1b05   :  { %2799 = vmax.xlane.f32.xlu0 %v2798_v16 }
0x1b12   :  { %2819 = vrot.lane.b32.xlu1 %v6392_v20, %s6989_s19 }
0x1b16   :  { %5517 = vrot.lane.b32.xlu1 %v5516_v2, %s6990_s27 }
0x1b1a   :  { %5522 = vrot.lane.b32.xlu1 %v5521_v61, %s6991_s0 }
0x1b8e   :  { %v2797_v17 = vpop.xlane.xlu1 %2796 }
0x1b8f   :  { %v2801_v18 = vsub.f32 %v2740_v3, %v2797_v17 }
0x1b91   :  { %v2803_v19 = vmul.f32 1.442695, %v2801_v18 }
0x1b92   :  { %v2820_v21 = vpop.permute.xlu1 %2819  ;;  %v2800_v22 = vpop.xlane.xlu0 %2799 }
0x1b93   :  { %5705 = vpow2.f32 %v2803_v19  ;;  %v2825_v24 = vsel %vm854_vm4, %v2820_v21, 0  ;;  %v2802_v25 = vsub.f32 %v2790_v10, %v2800_v22 }
0x1b94   :  { %5312 = vmatpush3.bf16.msra.mxu0 %v2825_v24 }
0x1b95   :  { %v2805_v26 = vmul.f32 1.442695, %v2802_v25  ;;  %5323 = vmatprep.subr.bf16.mxu0 %v5797_v28 }
0x1b96   :  { %v5518_v57 = vpop.permute.xlu1 %5517 }
0x1b97   :  { %5707 = vpow2.f32 %v2805_v26  ;;  %v5520_v58 = vunpack.i.h.bf16 %v5518_v57  ;;  %v5519_v45 = vunpack.i.l.bf16 %v5518_v57 }
0x1b99   :  { %v2940_v60 = vsel %vm730_vm2, %v6452_v9, %v5520_v58  ;;  %v2939_v55 = vsel %vm730_vm2, %v6450_v7, %v5519_v45  ;;  %v4775_v7 = vld [vmem:[%s6952_s8 + $0x1] ss:$0 sm:$0xff] }
0x1b9a   :  { %v5523_v13 = vpop.permute.xlu1 %5522 }
0x1b9b   :  { %v5525_v59 = vunpack.i.h.bf16 %v5523_v13  ;;  %v5524_v14 = vunpack.i.l.bf16 %v5523_v13 }
0x1b9d   :  { %v5706_v20 = vpop.eup %5705  ;;  %v2942_v38 = vsel %vm1632_vm5, %v2940_v60, %v5525_v59  ;;  %v2941_v62 = vsel %vm1632_vm5, %v2939_v55, %v5524_v14 }
0x1b9e   :  { %v2807_v37 = vsel %vm730_vm2, %v5706_v20, 0.0 }
0x1b9f   :  { %2808 = vadd.xlane.f32.xlu0 %v2807_v37  ;;  %v5618_v37 = vld [vmem:[%s6955_s11 + $0x18] sm:$0xff]  }
0x1ba1   :  { %v5708_v1 = vpop.eup %5707 }
0x1ba2   :  { %v2810_v2 = vsel %vm730_vm2, %v5708_v1, 0.0 }
0x1ba3   :  { %2811 = vadd.xlane.f32.xlu0 %v2810_v2 }
0x1bb9   :  { %2867 = vrot.lane.b32.xlu0 %v6394_v23, %s6989_s19 }
0x1c2c   :  { %v2809_v27 = vpop.xlane.xlu0 %2808 }
0x1c2d   :  { %5709 = vrcp.f32 %v2809_v27 }
0x1c30   :  { %v2812_v29 = vpop.xlane.xlu0 %2811 }
0x1c31   :  { %5711 = vrcp.f32 %v2812_v29 }
0x1c34   :  { %v2868_v30 = vpop.permute.xlu0 %2867 }
0x1c35   :  { %v2873_v31 = vsel %vm854_vm4, %v2868_v30, 0 }
0x1c36   :  { %5318 = vmatpush3.bf16.msra.mxu1 %v2873_v31 }
0x1c37   :  { %v5710_v32 = vpop.eup %5709  ;;  %5331 = vmatprep.subr.bf16.mxu1 %v5797_v28 }
0x1c38   :  { %v2815_v34 = vmul.f32 %v5710_v32, %v5706_v20  ;;  %v5617_v20 = vld [vmem:[%s6955_s11 + $0x10] sm:$0xff]  }
0x1c3a   :  { %v2817_v35 = vpack.c.bf16 %v2815_v34, %v2815_v34 }
0x1c3b   :  { %v5712_v36 = vpop.eup %5711 }
0x1c3c   :  { %v2816_v39 = vmul.f32 %v5712_v36, %v5708_v1  ;;  %5314 = vmatmul.mubr.msk.bf16.vlgmr.msra.gmra.mrb[72].mxu0 %vm730_vm2, %v2817_v35  ;;  %v4781_v35 = vld [vmem:[%s6953_s9 + $0x1] ss:$0 sm:$0xff] }
0x1c3d   :  { %5327 = vmatprep.mubr.msk.bf16.mxu0 %vm5798_vm1, %v5797_v28  ;;  %5324 = vmatpush3.bf16.msra.mxu0 %v5615_v40  ;;  %v4782_v40 = vld [vmem:[%s6954_s10 + $0x1] ss:$0 sm:$0xff] }
0x1c3e   :  { %v2818_v23 = vpack.c.bf16 %v2816_v39, %v2816_v39  ;;  %5325 = vmatprep.subr.bf16.mxu0 %v5797_v28 }
0x1c40   :  { %5320 = vmatmul.mubr.msk.bf16.vlgmr.msra.gmra.mrb[80].mxu1 %vm730_vm2, %v2818_v23 }
0x1c41   :  { %5335 = vmatprep.mubr.msk.bf16.mxu1 %vm5798_vm1, %v5797_v28  ;;  %5326 = vmatpush3.bf16.msra.mxu0 %v5616_v43 }
0x1c42   :  { %5339 = vmatprep.subr.bf16.mxu0 %v5797_v28  ;;  %5332 = vmatpush3.bf16.msra.mxu1 %v5617_v20  ;;  %v5623_v20 = vld [vmem:[%s6949_s5 + $0x20] sm:$0xff]  }
0x1c43   :  { %5333 = vmatprep.subr.bf16.mxu1 %v5797_v28 }
0x1c46   :  { %5334 = vmatpush3.bf16.msra.mxu1 %v5618_v37  ;;  %v5624_v37 = vld [vmem:[%s6949_s5 + $0x28] sm:$0xff]  }
0x1c47   :  { %5351 = vmatprep.subr.bf16.mxu1 %v5797_v28 }
0x1d0f   :  { %v2861_v47 = vpop.f32.mrb[72].mxu0 }
0x1d10   :  { %v5315_v41 = vpop.f32.mrb[73].mxu0 }
0x1d11   :  { %v2864_v42 = vpop.f32.mrb[74].mxu0 }
0x1d12   :  { %v5316_v44 = vpop.f32.mrb[75].mxu0 }
0x1d13   :  { %v2909_v48 = vpop.f32.mrb[80].mxu1  ;;  %v5619_v44 = vld [vmem:[%s6957_s13 + $0x20] sm:$0xff]  }
0x1d14   :  { %v5526_v50 = vpack.i.bf16 %v2909_v48, %v2861_v47  ;;  %v5321_v53 = vpop.f32.mrb[81].mxu1  ;;  %v5620_v48 = vld [vmem:[%s6957_s13 + $0x28] sm:$0xff]  }
0x1d15   :  { %v2912_v54 = vpop.f32.mrb[82].mxu1  ;;  %v5622_v53 = vld [vmem:[%s6957_s13 + $0x38] sm:$0xff]  }
0x1d16   :  { %5527 = vrot.lane.b32.xlu1 %v5526_v50, %s6992_s30  ;;  %v5322_v56 = vpop.f32.mrb[83].mxu1  ;;  %v5621_v50 = vld [vmem:[%s6957_s13 + $0x30] sm:$0xff]   ;;  %v4788_v54 = vld [vmem:[%s6956_s12 + $0x1] ss:$0 sm:$0xff] }
0x1d88   :  { %v5528_v49 = vpop.permute.xlu1 %5527 }
0x1d89   :  { %v5530_v61 = vunpack.i.h.bf16 %v5528_v49  ;;  %v5529_v33 = vunpack.i.l.bf16 %v5528_v49 }
0x1d8b   :  { %v2944_v0 = vsel %vm1635_vm6, %v2942_v38, %v5530_v61  ;;  %v2943_v3 = vsel %vm1635_vm6, %v2941_v62, %v5529_v33 }
0x1d8c   :  { %v2945_v4 = vpack.c.bf16 %v2944_v0, %v2943_v3 }
0x1d8e   :  { %5328 = vmatmul.mubr.msk.bf16.vlgmr.msra.gmra.mrb[76].mxu0 %vm610_vm0, %v2945_v4 }
0x1d8f   :  { %5347 = vmatprep.mubr.msk.bf16.mxu0 %vm5798_vm1, %v5797_v28  ;;  %5340 = vmatpush3.bf16.msra.mxu0 %v5619_v44  ;;  %v4816_v44 = vld [vmem:[%s6950_s6 + $0x2] ss:$0 sm:$0xff]  ;;  %s6995_s6 = smov 112  }
0x1d90   :  { %5341 = vmatprep.subr.bf16.mxu0 %v5797_v28 }
0x1d93   :  { %5342 = vmatpush3.bf16.msra.mxu0 %v5620_v48 }
0x1d94   :  { %5343 = vmatprep.subr.bf16.mxu0 %v5797_v28 }
0x1d97   :  { %5344 = vmatpush3.bf16.msra.mxu0 %v5621_v50 }
0x1d98   :  { %5345 = vmatprep.subr.bf16.mxu0 %v5797_v28 }
0x1d9b   :  { %5346 = vmatpush3.bf16.msra.mxu0 %v5622_v53 }
0x1d9c   :  { %5365 = vmatprep.subr.bf16.mxu0 %v5797_v28 }
0x1e61   :  { %v3008_v9 = vpop.f32.mrb[76].mxu0 }
0x1e62   :  { %v3009_v5 = vadd.f32 %v4775_v7, %v3008_v9  ;;  %v5329_v6 = vpop.f32.mrb[77].mxu0 }
0x1e63   :  { %v3011_v52 = vpop.f32.mrb[78].mxu0 }
0x1e64   :  { %v6585_v8 = vadd.f32 %v3009_v5, %v6359_v46  ;;  %v3012_v10 = vadd.f32 %v4775_v7, %v3011_v52  ;;  %v5330_v11 = vpop.f32.mrb[79].mxu0  ;;  %v4801_v7 = vld [vmem:[%s6958_s14 + $0x1] ss:$0 sm:$0xff] }
0x1e66   :  { %v6588_v12 = vadd.f32 %v3012_v10, %v6362_v51  ;;  %v3021_v15 = vsel %vm610_vm0, %v6585_v8, 0.0 }
0x1e67   :  { %3022 = vadd.xlane.f32.xlu0 %v3021_v15 }
0x1e68   :  { %v3024_v16 = vsel %vm610_vm0, %v6588_v12, 0.0 }
0x1e69   :  { %3025 = vadd.xlane.f32.xlu1 %v3024_v16 }
0x1ef4   :  { %v3023_v17 = vpop.xlane.xlu0 %3022 }
0x1ef5   :  { %v3027_v18 = vmul.f32 0.03125, %v3023_v17 }
0x1ef6   :  { %v3026_v19 = vpop.xlane.xlu1 %3025 }
0x1ef7   :  { %v3029_v21 = vsub.f32 %v6585_v8, %v3027_v18  ;;  %v3028_v46 = vmul.f32 0.03125, %v3026_v19 }
0x1ef9   :  { %v3030_v22 = vsub.f32 %v6588_v12, %v3028_v46  ;;  %v3031_v24 = vmul.f32 %v3029_v21, %v3029_v21 }
0x1efb   :  { %v3033_v51 = vsel %vm610_vm0, %v3031_v24, 0.0  ;;  %v3032_v25 = vmul.f32 %v3030_v22, %v3030_v22 }
0x1efc   :  { %3034 = vadd.xlane.f32.xlu0 %v3033_v51 }
0x1efd   :  { %v3036_v26 = vsel %vm610_vm0, %v3032_v25, 0.0 }
0x1f00   :  { %3037 = vadd.xlane.f32.xlu0 %v3036_v26 }
0x1f89   :  { %v3035_v1 = vpop.xlane.xlu0 %3034 }
0x1f8a   :  { %v3039_v2 = vmul.f32 0.03125, %v3035_v1 }
0x1f8c   :  { %v3041_v27 = vadd.f32 1e-06, %v3039_v2 }
0x1f8d   :  { %v3038_v29 = vpop.xlane.xlu0 %3037 }
0x1f8e   :  { %5713 = vrsqrt.f32 %v3041_v27  ;;  %v3040_v30 = vmul.f32 0.03125, %v3038_v29 }
0x1f90   :  { %v3042_v31 = vadd.f32 1e-06, %v3040_v30 }
0x1f92   :  { %5715 = vrsqrt.f32 %v3042_v31 }
0x1f98   :  { %v5714_v32 = vpop.eup %5713 }
0x1f99   :  { %v3045_v34 = vmul.f32 %v5714_v32, %v3029_v21 }
0x1f9b   :  { %v3053_v39 = vmul.f32 %v4781_v35, %v3045_v34  ;;  %v4809_v34 = vld [vmem:[%s6947_s3 + $0x2] ss:$0 sm:$0xff]  ;;  %s6993_s3 = smov 56  }
0x1f9c   :  { %v5716_v36 = vpop.eup %5715 }
0x1f9d   :  { %v3046_v23 = vmul.f32 %v5716_v36, %v3030_v22  ;;  %v3061_v47 = vadd.f32 %v4782_v40, %v3053_v39 }
0x1f9f   :  { %v3054_v43 = vmul.f32 %v4781_v35, %v3046_v23 }
0x1fa1   :  { %v3062_v41 = vadd.f32 %v4782_v40, %v3054_v43  ;;  %v4810_v40 = vld [vmem:[%s6948_s4 + $0x2] ss:$0 sm:$0xff]  ;;  %s6994_s4 = smov 80  }
0x1fa3   :  { %v3063_v42 = vpack.c.bf16 %v3062_v41, %v3061_v47 }
0x1fa5   :  { %5336 = vmatmul.mubr.msk.bf16.vlgmr.msra.gmra.mrb[84].mxu1 %vm610_vm0, %v3063_v42 }
0x1fa6   :  { %5355 = vmatprep.mubr.msk.bf16.mxu1 %vm5798_vm1, %v5797_v28  ;;  %5352 = vmatpush3.bf16.msra.mxu1 %v5623_v20 }
0x1fa7   :  { %5353 = vmatprep.subr.bf16.mxu1 %v5797_v28 }
0x1faa   :  { %5354 = vmatpush3.bf16.msra.mxu1 %v5624_v37 }
0x1fab   :  { %5359 = vmatprep.subr.bf16.mxu1 %v5797_v28 }
0x2078   :  { %v3126_v56 = vpop.f32.mrb[84].mxu1 }
0x2079   :  { %v3127_v57 = vadd.f32 %v4788_v54, %v3126_v56  ;;  %v5337_v13 = vpop.f32.mrb[85].mxu1 }
0x207a   :  { %v3129_v58 = vpop.f32.mrb[86].mxu1 }
0x207b   :  { %v3135_v45 = vmul.f32 0.70710677, %v3127_v57  ;;  %v3130_v59 = vadd.f32 %v4788_v54, %v3129_v58  ;;  %v5338_v14 = vpop.f32.mrb[87].mxu1  ;;  %v3133_v33 = vmul.f32 0.5, %v3127_v57 }
0x207d   :  { %5717 = verf.f32 %v3135_v45  ;;  %v3136_v49 = vmul.f32 0.70710677, %v3130_v59  ;;  %v3134_v38 = vmul.f32 0.5, %v3130_v59 }
0x207f   :  { %5719 = verf.f32 %v3136_v49 }
0x2087   :  { %v5718_v60 = vpop.eup %5717 }
0x2088   :  { %v3139_v55 = vadd.f32 1.0, %v5718_v60 }
0x2089   :  { %v5720_v61 = vpop.eup %5719 }
0x208a   :  { %v3140_v62 = vadd.f32 1.0, %v5720_v61  ;;  %v3141_v0 = vmul.f32 %v3139_v55, %v3133_v33 }
0x208c   :  { %v3142_v3 = vmul.f32 %v3140_v62, %v3134_v38 }
0x208e   :  { %v3143_v4 = vpack.c.bf16 %v3142_v3, %v3141_v0 }
0x2090   :  { %5348 = vmatmul.mubr.msk.bf16.vlgmr.msra.gmra.mrb[80].mxu0 %vm1870_vm7, %v3143_v4 }
0x2091   :  { %5367 = vmatprep.mubr.msk.bf16.mxu0 %vm5798_vm1, %v5797_v28 }
0x2163   :  { %v3222_v9 = vpop.f32.mrb[80].mxu0 }
0x2164   :  { %v3223_v5 = vadd.f32 %v4801_v7, %v3222_v9  ;;  %v5349_v6 = vpop.f32.mrb[81].mxu0 }
0x2165   :  { %v3225_v52 = vpop.f32.mrb[82].mxu0 }
0x2166   :  { %v6641_v10 = vadd.f32 %v3223_v5, %v6585_v8  ;;  %v3226_v11 = vadd.f32 %v4801_v7, %v3225_v52  ;;  %v5350_v15 = vpop.f32.mrb[83].mxu0 }
0x2168   :  { %v6644_v16 = vadd.f32 %v3226_v11, %v6588_v12  ;;  %v3235_v17 = vsel %vm610_vm0, %v6641_v10, 0.0 }
0x2169   :  { %3236 = vadd.xlane.f32.xlu0 %v3235_v17 }
0x216a   :  { %v3238_v18 = vsel %vm610_vm0, %v6644_v16, 0.0 }
0x216b   :  { %3239 = vadd.xlane.f32.xlu1 %v3238_v18 }
0x21f6   :  { %v3237_v19 = vpop.xlane.xlu0 %3236 }
0x21f7   :  { %v3241_v21 = vmul.f32 0.03125, %v3237_v19 }
0x21f8   :  { %v3240_v46 = vpop.xlane.xlu1 %3239 }
0x21f9   :  { %v3243_v22 = vsub.f32 %v6641_v10, %v3241_v21  ;;  %v3242_v8 = vmul.f32 0.03125, %v3240_v46 }
0x21fb   :  { %v3244_v24 = vsub.f32 %v6644_v16, %v3242_v8  ;;  %v3245_v51 = vmul.f32 %v3243_v22, %v3243_v22 }
0x21fd   :  { %v3247_v12 = vsel %vm610_vm0, %v3245_v51, 0.0  ;;  %v3246_v25 = vmul.f32 %v3244_v24, %v3244_v24 }
0x21fe   :  { %3248 = vadd.xlane.f32.xlu0 %v3247_v12 }
0x21ff   :  { %v3250_v26 = vsel %vm610_vm0, %v3246_v25, 0.0 }
0x2200   :  { %3251 = vadd.xlane.f32.xlu1 %v3250_v26 }
0x228b   :  { %v3249_v1 = vpop.xlane.xlu0 %3248 }
0x228c   :  { %v3253_v2 = vmul.f32 0.03125, %v3249_v1 }
0x228d   :  { %v3252_v27 = vpop.xlane.xlu1 %3251 }
0x228e   :  { %v3255_v29 = vadd.f32 1e-06, %v3253_v2  ;;  %v3254_v30 = vmul.f32 0.03125, %v3252_v27 }
0x2290   :  { %5721 = vrsqrt.f32 %v3255_v29  ;;  %v3256_v31 = vadd.f32 1e-06, %v3254_v30 }
0x2292   :  { %5723 = vrsqrt.f32 %v3256_v31 }
0x229a   :  { %v5722_v32 = vpop.eup %5721 }
0x229b   :  { %v3259_v35 = vmul.f32 %v5722_v32, %v3243_v22 }
0x229c   :  { %v5724_v36 = vpop.eup %5723 }
0x229d   :  { %v3267_v39 = vmul.f32 %v4809_v34, %v3259_v35  ;;  %v3260_v23 = vmul.f32 %v5724_v36, %v3244_v24 }
0x229f   :  { %v3268_v43 = vmul.f32 %v4809_v34, %v3260_v23  ;;  %v3275_v47 = vadd.f32 %v4810_v40, %v3267_v39 }
0x22a1   :  { %v3276_v41 = vadd.f32 %v4810_v40, %v3268_v43 }
0x22a3   :  { %v3277_v42 = vpack.c.bf16 %v3276_v41, %v3275_v47 }
0x22a5   :  { %5356 = vmatmul.mubr.msk.bf16.vlgmr.msra.gmra.mrb[88].mxu1 %vm610_vm0, %v3277_v42 }
0x22a6   :  { %5361 = vmatprep.mubr.msk.bf16.mxu1 %vm5798_vm1, %v5797_v28 }
0x2378   :  { %v3340_v48 = vpop.f32.mrb[88].mxu1 }
0x2379   :  { %v3341_v50 = vadd.f32 %v4816_v44, %v3340_v48  ;;  %v5357_v53 = vpop.f32.mrb[89].mxu1 }
0x237a   :  { %v3343_v54 = vpop.f32.mrb[90].mxu1 }
0x237b   :  { %v6674_v56 = vpack.c.bf16 %v3341_v50, %v3341_v50  ;;  %v3344_v57 = vadd.f32 %v4816_v44, %v3343_v54  ;;  %v5358_v13 = vpop.f32.mrb[91].mxu1 }
0x237d   :  { %v6676_v58 = vpack.c.bf16 %v3344_v57, %v3344_v57  ;;  %3353 = vrot.lane.b32.xlu0 %v6674_v56, %s5799_s1 }
0x237f   :  { %3401 = vrot.lane.b32.xlu1 %v6676_v58, %s5799_s1  ;;  %s6996_s1 = smov 48  }
0x23ef   :  { %v3354_v45 = vpop.permute.xlu0 %3353 }
0x23f0   :  { %v3359_v59 = vsel %vm730_vm2, %v3354_v45, 0 }
0x23f1   :  { %5360 = vmatpush3.bf16.xpose.msra.mxu1 %v3359_v59  ;;  %v3402_v14 = vpop.permute.xlu1 %3401 }
0x23f2   :  { %v3407_v49 = vsel %vm730_vm2, %v3402_v14, 0  ;;  %5371 = vmatprep.subr.bf16.mxu1 %v5797_v28 }
0x23f3   :  { %5366 = vmatpush3.bf16.xpose.msra.mxu0 %v3407_v49 }
0x23f4   :  { %5377 = vmatprep.subr.bf16.mxu0 %v5797_v28 }
0x23f8   :  { %5362 = vmatmul.mubr.msk.bf16.vlgmr.msra.gmra.mrb[92].mxu1 %vm730_vm2, %v6674_v56 }
0x23f9   :  { %5373 = vmatprep.mubr.msk.bf16.mxu1 %vm5798_vm1, %v5797_v28 }
0x23fa   :  { %5368 = vmatmul.mubr.msk.bf16.vlgmr.msra.gmra.mrb[84].mxu0 %vm730_vm2, %v6676_v58 }
0x23fb   :  { %5379 = vmatprep.mubr.msk.bf16.mxu0 %vm5798_vm1, %v5797_v28 }
0x24cb   :  { %v3395_v60 = vpop.f32.mrb[92].mxu1 }
0x24cc   :  { %v3396_v55 = vadd.f32 %v3395_v60, %v6128_v63  ;;  %v5363_v61 = vpop.f32.mrb[93].mxu1 }
0x24cd   :  { %v3398_v33 = vpop.f32.mrb[94].mxu1  ;;  %v3443_v38 = vpop.f32.mrb[84].mxu0 }
0x24ce   :  { %v3444_v62 = vadd.f32 %v3443_v38, %v6128_v63  ;;  %v5364_v0 = vpop.f32.mrb[95].mxu1  ;;  %v5369_v3 = vpop.f32.mrb[85].mxu0  ;;  %v3449_v4 = vsel %vm730_vm2, %v3396_v55, -inf }
0x24cf   :  { %v3446_v7 = vpop.f32.mrb[86].mxu0  ;;  %3450 = vmax.xlane.f32.xlu1 %v3449_v4 }
0x24d0   :  { %v5370_v9 = vpop.f32.mrb[87].mxu0  ;;  %v3452_v5 = vsel %vm730_vm2, %v3444_v62, -inf }
0x24d1   :  { %3453 = vmax.xlane.f32.xlu0 %v3452_v5 }
0x24e0   :  { %3521 = vrot.lane.b32.xlu1 %v6676_v58, %s5801_s21 }
0x24e4   :  { %3571 = vrot.lane.b32.xlu1 %v6674_v56, %s5802_s22 }
0x255c   :  { %v3451_v6 = vpop.xlane.xlu1 %3450 }
0x255d   :  { %v3455_v52 = vsub.f32 %v3396_v55, %v3451_v6 }
0x255e   :  { %v3454_v11 = vpop.xlane.xlu0 %3453 }
0x255f   :  { %v3457_v15 = vmul.f32 1.442695, %v3455_v52  ;;  %v3456_v17 = vsub.f32 %v3444_v62, %v3454_v11 }
0x2560   :  { %v3522_v18 = vpop.permute.xlu1 %3521 }
0x2561   :  { %5725 = vpow2.f32 %v3457_v15  ;;  %v3459_v19 = vmul.f32 1.442695, %v3456_v17  ;;  %v3527_v21 = vsel %vm854_vm4, %v3522_v18, 0 }
0x2562   :  { %5378 = vmatpush3.bf16.msra.mxu0 %v3527_v21 }
0x2563   :  { %5727 = vpow2.f32 %v3459_v19  ;;  %5389 = vmatprep.subr.bf16.mxu0 %v5797_v28 }
0x2564   :  { %v3572_v51 = vpop.permute.xlu1 %3571 }
0x2565   :  { %v3577_v31 = vsel %vm730_vm2, %v3572_v51, 0 }
0x256b   :  { %v5726_v46 = vpop.eup %5725 }
0x256c   :  { %v3461_v22 = vsel %vm730_vm2, %v5726_v46, 0.0 }
0x256d   :  { %v5728_v8 = vpop.eup %5727  ;;  %3462 = vadd.xlane.f32.xlu0 %v3461_v22 }
0x256e   :  { %v3464_v24 = vsel %vm730_vm2, %v5728_v8, 0.0 }
0x256f   :  { %3465 = vadd.xlane.f32.xlu1 %v3464_v24 }
0x2580   :  { %3621 = vrot.lane.b32.xlu1 %v6676_v58, %s5802_s22 }
0x2583   :  { %3473 = vrot.lane.b32.xlu0 %v6674_v56, %s5801_s21  ;;  %s6997_s21 = smov 72  }
0x2584   :  { %3619 = vrot.lane.b32.xlu1 %v6676_v58, %s5803_s23 }
0x2587   :  { %3569 = vrot.lane.b32.xlu0 %v6674_v56, %s5803_s23 }
0x25fa   :  { %v3463_v12 = vpop.xlane.xlu0 %3462 }
0x25fb   :  { %5729 = vrcp.f32 %v3463_v12 }
0x25fc   :  { %v3466_v25 = vpop.xlane.xlu1 %3465 }
0x25fd   :  { %5731 = vrcp.f32 %v3466_v25 }
0x25fe   :  { %v3474_v26 = vpop.permute.xlu0 %3473 }
0x25ff   :  { %v3479_v20 = vsel %vm854_vm4, %v3474_v26, 0 }
0x2600   :  { %5372 = vmatpush3.bf16.msra.mxu1 %v3479_v20  ;;  %v3622_v30 = vpop.permute.xlu1 %3621 }
0x2601   :  { %5383 = vmatprep.subr.bf16.mxu1 %v5797_v28  ;;  %v3627_v34 = vsel %vm730_vm2, %v3622_v30, 0 }
0x2602   :  { %v3570_v35 = vpop.permute.xlu0 %3569 }
0x2604   :  { %v3620_v36 = vpop.permute.xlu1 %3619 }
0x2605   :  { %v5730_v37 = vpop.eup %5729 }
0x2606   :  { %v3469_v1 = vmul.f32 %v5730_v37, %v5726_v46 }
0x2607   :  { %v5732_v2 = vpop.eup %5731 }
0x2608   :  { %v3470_v27 = vmul.f32 %v5732_v2, %v5728_v8  ;;  %v3471_v29 = vpack.c.bf16 %v3469_v1, %v3469_v1 }
0x260a   :  { %5374 = vmatmul.mubr.msk.bf16.vlgmr.msra.gmra.mrb[96].mxu1 %vm730_vm2, %v3471_v29  ;;  %v3472_v32 = vpack.c.bf16 %v3470_v27, %v3470_v27 }
0x260b   :  { %5384 = vmatpush3.bf16.xpose.msra.mxu1 %v3577_v31  ;;  %5385 = vmatprep.mubr.msk.bf16.mxu1 %vm5798_vm1, %v5797_v28 }
0x260c   :  { %5380 = vmatmul.mubr.msk.bf16.vlgmr.msra.gmra.mrb[88].mxu0 %vm730_vm2, %v3472_v32  ;;  %5395 = vmatprep.subr.bf16.mxu1 %v5797_v28 }
0x260d   :  { %5390 = vmatpush3.bf16.xpose.msra.mxu0 %v3627_v34  ;;  %5391 = vmatprep.mubr.msk.bf16.mxu0 %vm5798_vm1, %v5797_v28 }
0x260e   :  { %5401 = vmatprep.subr.bf16.mxu0 %v5797_v28 }
0x2612   :  { %5386 = vmatmul.mubr.msk.bf16.vlgmr.msra.gmra.mrb[100].mxu1 %vm730_vm2, %v3570_v35 }
0x2613   :  { %5397 = vmatprep.mubr.msk.bf16.mxu1 %vm5798_vm1, %v5797_v28 }
0x2614   :  { %5392 = vmatmul.mubr.msk.bf16.vlgmr.msra.gmra.mrb[92].mxu0 %vm730_vm2, %v3620_v36 }
0x2615   :  { %5403 = vmatprep.mubr.msk.bf16.mxu0 %vm5798_vm1, %v5797_v28 }
0x26dd   :  { %v6732_v39 = vpop.f32.mrb[96].mxu1 }
0x26de   :  { %v5375_v23 = vpop.f32.mrb[97].mxu1 }
0x26df   :  { %v3518_v40 = vpop.f32.mrb[98].mxu1  ;;  %v6734_v43 = vpop.f32.mrb[88].mxu0 }
0x26e0   :  { %v5376_v47 = vpop.f32.mrb[99].mxu1  ;;  %v5381_v41 = vpop.f32.mrb[89].mxu0 }
0x26e1   :  { %v3566_v42 = vpop.f32.mrb[90].mxu0 }
0x26e2   :  { %v5382_v44 = vpop.f32.mrb[91].mxu0 }
0x26e5   :  { %v3613_v48 = vpop.f32.mrb[100].mxu1 }
0x26e6   :  { %v3614_v50 = vadd.f32 %v3613_v48, %v6128_v63  ;;  %v5387_v53 = vpop.f32.mrb[101].mxu1 }
0x26e7   :  { %v3616_v54 = vpop.f32.mrb[102].mxu1  ;;  %v3663_v57 = vpop.f32.mrb[92].mxu0 }
0x26e8   :  { %v3664_v13 = vadd.f32 %v3663_v57, %v6128_v63  ;;  %v5388_v45 = vpop.f32.mrb[103].mxu1  ;;  %v5393_v59 = vpop.f32.mrb[93].mxu0  ;;  %v3669_v14 = vsel %vm730_vm2, %v3614_v50, -inf }
0x26e9   :  { %v3666_v49 = vpop.f32.mrb[94].mxu0  ;;  %3670 = vmax.xlane.f32.xlu0 %v3669_v14 }
0x26ea   :  { %v5394_v60 = vpop.f32.mrb[95].mxu0  ;;  %v3672_v55 = vsel %vm730_vm2, %v3664_v13, -inf }
0x26eb   :  { %3673 = vmax.xlane.f32.xlu1 %v3672_v55 }
0x26fc   :  { %3741 = vrot.lane.b32.xlu1 %v6676_v58, %s6993_s3 }
0x2700   :  { %3791 = vrot.lane.b32.xlu1 %v6674_v56, %s6994_s4 }
0x2704   :  { %3841 = vrot.lane.b32.xlu1 %v6676_v58, %s6994_s4 }
0x2708   :  { %3839 = vrot.lane.b32.xlu1 %v6676_v58, %s6995_s6 }
0x2776   :  { %v3671_v61 = vpop.xlane.xlu0 %3670 }
0x2777   :  { %v3675_v33 = vsub.f32 %v3614_v50, %v3671_v61 }
0x2778   :  { %v3674_v38 = vpop.xlane.xlu1 %3673 }
0x2779   :  { %v3677_v62 = vmul.f32 1.442695, %v3675_v33  ;;  %v3676_v0 = vsub.f32 %v3664_v13, %v3674_v38 }
0x277b   :  { %5733 = vpow2.f32 %v3677_v62  ;;  %v3679_v3 = vmul.f32 1.442695, %v3676_v0 }
0x277c   :  { %v3742_v4 = vpop.permute.xlu1 %3741 }
0x277d   :  { %5735 = vpow2.f32 %v3679_v3  ;;  %v3747_v7 = vsel %vm854_vm4, %v3742_v4, 0 }
0x277e   :  { %5402 = vmatpush3.bf16.msra.mxu0 %v3747_v7 }
0x277f   :  { %5413 = vmatprep.subr.bf16.mxu0 %v5797_v28 }
0x2780   :  { %v3792_v21 = vpop.permute.xlu1 %3791 }
0x2781   :  { %v3797_v12 = vsel %vm730_vm2, %v3792_v21, 0 }
0x2784   :  { %v3842_v51 = vpop.permute.xlu1 %3841 }
0x2785   :  { %v5734_v9 = vpop.eup %5733  ;;  %v3847_v26 = vsel %vm730_vm2, %v3842_v51, 0 }
0x2786   :  { %v3681_v5 = vsel %vm730_vm2, %v5734_v9, 0.0 }
0x2787   :  { %v5736_v6 = vpop.eup %5735  ;;  %3682 = vadd.xlane.f32.xlu0 %v3681_v5 }
0x2788   :  { %v3684_v52 = vsel %vm730_vm2, %v5736_v6, 0.0  ;;  %v3840_v37 = vpop.permute.xlu1 %3839 }
0x278b   :  { %3685 = vadd.xlane.f32.xlu0 %v3684_v52 }
0x27a1   :  { %3693 = vrot.lane.b32.xlu0 %v6674_v56, %s6993_s3 }
0x27a5   :  { %3789 = vrot.lane.b32.xlu0 %v6674_v56, %s6995_s6 }
0x2814   :  { %v3683_v11 = vpop.xlane.xlu0 %3682 }
0x2815   :  { %5737 = vrcp.f32 %v3683_v11 }
0x2818   :  { %v3686_v15 = vpop.xlane.xlu0 %3685 }
0x2819   :  { %5739 = vrcp.f32 %v3686_v15 }
0x281c   :  { %v3694_v17 = vpop.permute.xlu0 %3693 }
0x281d   :  { %v3699_v18 = vsel %vm854_vm4, %v3694_v17, 0 }
0x281e   :  { %5396 = vmatpush3.bf16.msra.mxu1 %v3699_v18 }
0x281f   :  { %v5738_v19 = vpop.eup %5737  ;;  %5407 = vmatprep.subr.bf16.mxu1 %v5797_v28 }
0x2820   :  { %v3689_v46 = vmul.f32 %v5738_v19, %v5734_v9  ;;  %v3790_v20 = vpop.permute.xlu0 %3789 }
0x2822   :  { %v3691_v22 = vpack.c.bf16 %v3689_v46, %v3689_v46 }
0x2823   :  { %v5740_v8 = vpop.eup %5739 }
0x2824   :  { %v3690_v24 = vmul.f32 %v5740_v8, %v5736_v6  ;;  %5398 = vmatmul.mubr.msk.bf16.vlgmr.msra.gmra.mrb[104].mxu1 %vm730_vm2, %v3691_v22 }
0x2825   :  { %5409 = vmatprep.mubr.msk.bf16.mxu1 %vm5798_vm1, %v5797_v28 }
0x2826   :  { %v3692_v25 = vpack.c.bf16 %v3690_v24, %v3690_v24 }
0x2827   :  { %5408 = vmatpush3.bf16.xpose.msra.mxu1 %v3797_v12 }
0x2828   :  { %5404 = vmatmul.mubr.msk.bf16.vlgmr.msra.gmra.mrb[96].mxu0 %vm730_vm2, %v3692_v25  ;;  %5419 = vmatprep.subr.bf16.mxu1 %v5797_v28 }
0x2829   :  { %5414 = vmatpush3.bf16.xpose.msra.mxu0 %v3847_v26  ;;  %5415 = vmatprep.mubr.msk.bf16.mxu0 %vm5798_vm1, %v5797_v28 }
0x282a   :  { %5425 = vmatprep.subr.bf16.mxu0 %v5797_v28 }
0x282e   :  { %5410 = vmatmul.mubr.msk.bf16.vlgmr.msra.gmra.mrb[108].mxu1 %vm730_vm2, %v3790_v20 }
0x282f   :  { %5421 = vmatprep.mubr.msk.bf16.mxu1 %vm5798_vm1, %v5797_v28 }
0x2830   :  { %5416 = vmatmul.mubr.msk.bf16.vlgmr.msra.gmra.mrb[100].mxu0 %vm730_vm2, %v3840_v37 }
0x2831   :  { %5427 = vmatprep.mubr.msk.bf16.mxu0 %vm5798_vm1, %v5797_v28 }
0x28f7   :  { %v6774_v1 = vpop.f32.mrb[104].mxu1 }
0x28f8   :  { %v5399_v2 = vpop.f32.mrb[105].mxu1 }
0x28f9   :  { %v3738_v27 = vpop.f32.mrb[106].mxu1 }
0x28fa   :  { %v5400_v29 = vpop.f32.mrb[107].mxu1 }
0x28fb   :  { %v6776_v30 = vpop.f32.mrb[96].mxu0 }
0x28fc   :  { %v5531_v31 = vpack.i.bf16 %v6776_v30, %v6774_v1  ;;  %v5405_v32 = vpop.f32.mrb[97].mxu0 }
0x28fd   :  { %v3786_v34 = vpop.f32.mrb[98].mxu0 }
0x28fe   :  { %v5406_v35 = vpop.f32.mrb[99].mxu0 }
0x2901   :  { %v3833_v36 = vpop.f32.mrb[108].mxu1 }
0x2902   :  { %v3834_v23 = vadd.f32 %v3833_v36, %v6128_v63  ;;  %v5411_v40 = vpop.f32.mrb[109].mxu1 }
0x2903   :  { %v3836_v47 = vpop.f32.mrb[110].mxu1  ;;  %v3883_v41 = vpop.f32.mrb[100].mxu0 }
0x2904   :  { %v3884_v42 = vadd.f32 %v3883_v41, %v6128_v63  ;;  %v5412_v44 = vpop.f32.mrb[111].mxu1  ;;  %v5417_v48 = vpop.f32.mrb[101].mxu0  ;;  %v3889_v50 = vsel %vm730_vm2, %v3834_v23, -inf }
0x2905   :  { %v3886_v53 = vpop.f32.mrb[102].mxu0  ;;  %3890 = vmax.xlane.f32.xlu0 %v3889_v50 }
0x2906   :  { %v5418_v54 = vpop.f32.mrb[103].mxu0  ;;  %v3892_v57 = vsel %vm730_vm2, %v3884_v42, -inf }
0x2907   :  { %3893 = vmax.xlane.f32.xlu1 %v3892_v57 }
0x2918   :  { %3961 = vrot.lane.b32.xlu1 %v6676_v58, %s6996_s1 }
0x291c   :  { %4011 = vrot.lane.b32.xlu1 %v6674_v56, %s6997_s21 }
0x2920   :  { %4061 = vrot.lane.b32.xlu1 %v6676_v58, %s6997_s21 }
0x2924   :  { %4059 = vrot.lane.b32.xlu1 %v6676_v58, %s6988_s29 }
0x2992   :  { %v3891_v13 = vpop.xlane.xlu0 %3890 }
0x2993   :  { %v3895_v45 = vsub.f32 %v3834_v23, %v3891_v13 }
0x2994   :  { %v3894_v59 = vpop.xlane.xlu1 %3893 }
0x2995   :  { %v3897_v14 = vmul.f32 1.442695, %v3895_v45  ;;  %v3896_v49 = vsub.f32 %v3884_v42, %v3894_v59 }
0x2997   :  { %5741 = vpow2.f32 %v3897_v14  ;;  %v3899_v60 = vmul.f32 1.442695, %v3896_v49 }
0x2998   :  { %v3962_v55 = vpop.permute.xlu1 %3961 }
0x2999   :  { %5743 = vpow2.f32 %v3899_v60  ;;  %v3967_v61 = vsel %vm854_vm4, %v3962_v55, 0 }
0x299a   :  { %5426 = vmatpush3.bf16.msra.mxu0 %v3967_v61 }
0x299b   :  { %5437 = vmatprep.subr.bf16.mxu0 %v5797_v28 }
0x299c   :  { %v4012_v6 = vpop.permute.xlu1 %4011 }
0x299d   :  { %v4017_v19 = vsel %vm730_vm2, %v4012_v6, 0 }
0x29a0   :  { %v4062_v18 = vpop.permute.xlu1 %4061 }
0x29a1   :  { %v5742_v33 = vpop.eup %5741  ;;  %v4067_v46 = vsel %vm730_vm2, %v4062_v18, 0 }
0x29a2   :  { %v3901_v38 = vsel %vm730_vm2, %v5742_v33, 0.0 }
0x29a3   :  { %v5744_v62 = vpop.eup %5743  ;;  %3902 = vadd.xlane.f32.xlu0 %v3901_v38 }
0x29a4   :  { %v3904_v0 = vsel %vm730_vm2, %v5744_v62, 0.0  ;;  %v4060_v8 = vpop.permute.xlu1 %4059 }
0x29a7   :  { %3905 = vadd.xlane.f32.xlu0 %v3904_v0 }
0x29bd   :  { %3913 = vrot.lane.b32.xlu0 %v6674_v56, %s6996_s1 }
0x29c1   :  { %4009 = vrot.lane.b32.xlu0 %v6674_v56, %s6988_s29 }
0x2a30   :  { %v3903_v3 = vpop.xlane.xlu0 %3902 }
0x2a31   :  { %5745 = vrcp.f32 %v3903_v3  ;;  %v5625_v3 = vld [vmem:[%s6951_s7 + $0x20] sm:$0xff]  }
0x2a34   :  { %v3906_v4 = vpop.xlane.xlu0 %3905 }
0x2a35   :  { %5747 = vrcp.f32 %v3906_v4  ;;  %v5626_v4 = vld [vmem:[%s6951_s7 + $0x28] sm:$0xff]  }
0x2a38   :  { %v3914_v7 = vpop.permute.xlu0 %3913 }
0x2a39   :  { %v3919_v9 = vsel %vm854_vm4, %v3914_v7, 0 }
0x2a3a   :  { %5420 = vmatpush3.bf16.msra.mxu1 %v3919_v9 }
0x2a3b   :  { %v5746_v5 = vpop.eup %5745  ;;  %5431 = vmatprep.subr.bf16.mxu1 %v5797_v28 }
0x2a3c   :  { %v3909_v52 = vmul.f32 %v5746_v5, %v5742_v33  ;;  %v4010_v22 = vpop.permute.xlu0 %4009 }
0x2a3e   :  { %v3911_v11 = vpack.c.bf16 %v3909_v52, %v3909_v52 }
0x2a3f   :  { %v5748_v15 = vpop.eup %5747 }
0x2a40   :  { %v3910_v17 = vmul.f32 %v5748_v15, %v5744_v62  ;;  %5422 = vmatmul.mubr.msk.bf16.vlgmr.msra.gmra.mrb[112].mxu1 %vm730_vm2, %v3911_v11 }
0x2a41   :  { %5433 = vmatprep.mubr.msk.bf16.mxu1 %vm5798_vm1, %v5797_v28 }
0x2a42   :  { %v3912_v21 = vpack.c.bf16 %v3910_v17, %v3910_v17 }
0x2a43   :  { %5432 = vmatpush3.bf16.xpose.msra.mxu1 %v4017_v19 }
0x2a44   :  { %5428 = vmatmul.mubr.msk.bf16.vlgmr.msra.gmra.mrb[104].mxu0 %vm730_vm2, %v3912_v21  ;;  %5443 = vmatprep.subr.bf16.mxu1 %v5797_v28 }
0x2a45   :  { %5438 = vmatpush3.bf16.xpose.msra.mxu0 %v4067_v46  ;;  %5439 = vmatprep.mubr.msk.bf16.mxu0 %vm5798_vm1, %v5797_v28 }
0x2a46   :  { %5449 = vmatprep.subr.bf16.mxu0 %v5797_v28 }
0x2a4a   :  { %5434 = vmatmul.mubr.msk.bf16.vlgmr.msra.gmra.mrb[116].mxu1 %vm730_vm2, %v4010_v22 }
0x2a4b   :  { %5445 = vmatprep.mubr.msk.bf16.mxu1 %vm5798_vm1, %v5797_v28 }
0x2a4c   :  { %5440 = vmatmul.mubr.msk.bf16.vlgmr.msra.gmra.mrb[108].mxu0 %vm730_vm2, %v4060_v8 }
0x2a4d   :  { %5451 = vmatprep.mubr.msk.bf16.mxu0 %vm5798_vm1, %v5797_v28 }
0x2b13   :  { %v3955_v24 = vpop.f32.mrb[112].mxu1 }
0x2b14   :  { %v5423_v51 = vpop.f32.mrb[113].mxu1 }
0x2b15   :  { %v3958_v12 = vpop.f32.mrb[114].mxu1 }
0x2b16   :  { %v5424_v25 = vpop.f32.mrb[115].mxu1 }
0x2b17   :  { %v4003_v26 = vpop.f32.mrb[104].mxu0 }
0x2b18   :  { %v5536_v20 = vpack.i.bf16 %v4003_v26, %v3955_v24  ;;  %v5429_v37 = vpop.f32.mrb[105].mxu0 }
0x2b19   :  { %v4006_v2 = vpop.f32.mrb[106].mxu0 }
0x2b1a   :  { %v5430_v27 = vpop.f32.mrb[107].mxu0 }
0x2b1d   :  { %v4053_v29 = vpop.f32.mrb[116].mxu1 }
0x2b1e   :  { %v4054_v32 = vadd.f32 %v4053_v29, %v6128_v63  ;;  %v5435_v34 = vpop.f32.mrb[117].mxu1 }
0x2b1f   :  { %v4056_v35 = vpop.f32.mrb[118].mxu1  ;;  %v4103_v36 = vpop.f32.mrb[108].mxu0 }
0x2b20   :  { %v4104_v23 = vadd.f32 %v4103_v36, %v6128_v63  ;;  %v5436_v40 = vpop.f32.mrb[119].mxu1  ;;  %v5441_v47 = vpop.f32.mrb[109].mxu0  ;;  %v4109_v41 = vsel %vm730_vm2, %v4054_v32, -inf }
0x2b21   :  { %v4106_v42 = vpop.f32.mrb[110].mxu0  ;;  %4110 = vmax.xlane.f32.xlu0 %v4109_v41 }
0x2b22   :  { %v5442_v44 = vpop.f32.mrb[111].mxu0  ;;  %v4112_v48 = vsel %vm730_vm2, %v4104_v23, -inf }
0x2b23   :  { %4113 = vmax.xlane.f32.xlu1 %v4112_v48 }
0x2b34   :  { %4181 = vrot.lane.b32.xlu1 %v6676_v58, %s6989_s19 }
0x2b38   :  { %5532 = vrot.lane.b32.xlu1 %v5531_v31, %s6990_s27 }
0x2b3c   :  { %5537 = vrot.lane.b32.xlu1 %v5536_v20, %s6991_s0 }
0x2bae   :  { %v4111_v63 = vpop.xlane.xlu0 %4110 }
0x2baf   :  { %v4115_v50 = vsub.f32 %v4054_v32, %v4111_v63 }
0x2bb0   :  { %v4114_v53 = vpop.xlane.xlu1 %4113 }
0x2bb1   :  { %v4117_v54 = vmul.f32 1.442695, %v4115_v50  ;;  %v4116_v57 = vsub.f32 %v4104_v23, %v4114_v53 }
0x2bb3   :  { %5749 = vpow2.f32 %v4117_v54  ;;  %v4119_v13 = vmul.f32 1.442695, %v4116_v57 }
0x2bb4   :  { %v4182_v45 = vpop.permute.xlu1 %4181 }
0x2bb5   :  { %5751 = vpow2.f32 %v4119_v13  ;;  %v4187_v59 = vsel %vm854_vm4, %v4182_v45, 0 }
0x2bb6   :  { %5450 = vmatpush3.bf16.msra.mxu0 %v4187_v59  ;;  %v5627_v59 = vld [vmem:[%s6955_s11 + $0x20] sm:$0xff]  }
0x2bb7   :  { %5463 = vmatprep.subr.bf16.mxu0 %v5797_v28 }
0x2bb8   :  { %v5533_v19 = vpop.permute.xlu1 %5532 }
0x2bb9   :  { %v5535_v46 = vunpack.i.h.bf16 %v5533_v19  ;;  %v5534_v22 = vunpack.i.l.bf16 %v5533_v19 }
0x2bbb   :  { %v4254_v12 = vsel %vm730_vm2, %v6734_v43, %v5535_v46  ;;  %v4253_v25 = vsel %vm730_vm2, %v6732_v39, %v5534_v22  ;;  %v4843_v39 = vld [vmem:[%s6952_s8 + $0x2] ss:$0 sm:$0xff] }
0x2bbc   :  { %v5538_v21 = vpop.permute.xlu1 %5537 }
0x2bbd   :  { %v5750_v58 = vpop.eup %5749  ;;  %v5540_v8 = vunpack.i.h.bf16 %v5538_v21  ;;  %v5539_v24 = vunpack.i.l.bf16 %v5538_v21 }
0x2bbe   :  { %v4121_v1 = vsel %vm730_vm2, %v5750_v58, 0.0 }
0x2bbf   :  { %v5752_v30 = vpop.eup %5751  ;;  %4122 = vadd.xlane.f32.xlu0 %v4121_v1  ;;  %v4256_v37 = vsel %vm1632_vm5, %v4254_v12, %v5540_v8  ;;  %v4255_v2 = vsel %vm1632_vm5, %v4253_v25, %v5539_v24 }
0x2bc0   :  { %v4124_v31 = vsel %vm730_vm2, %v5752_v30, 0.0 }
0x2bc3   :  { %4125 = vadd.xlane.f32.xlu0 %v4124_v31 }
0x2bd9   :  { %4133 = vrot.lane.b32.xlu0 %v6674_v56, %s6989_s19 }
0x2c4c   :  { %v4123_v14 = vpop.xlane.xlu0 %4122 }
0x2c4d   :  { %5753 = vrcp.f32 %v4123_v14 }
0x2c50   :  { %v4126_v49 = vpop.xlane.xlu0 %4125 }
0x2c51   :  { %5755 = vrcp.f32 %v4126_v49 }
0x2c54   :  { %v4134_v60 = vpop.permute.xlu0 %4133 }
0x2c55   :  { %v4139_v55 = vsel %vm854_vm4, %v4134_v60, 0 }
0x2c56   :  { %5444 = vmatpush3.bf16.msra.mxu1 %v4139_v55 }
0x2c57   :  { %v5754_v61 = vpop.eup %5753  ;;  %5455 = vmatprep.subr.bf16.mxu1 %v5797_v28 }
0x2c58   :  { %v4129_v33 = vmul.f32 %v5754_v61, %v5750_v58  ;;  %v5628_v58 = vld [vmem:[%s6955_s11 + $0x28] sm:$0xff]  }
0x2c5a   :  { %v4131_v38 = vpack.c.bf16 %v4129_v33, %v4129_v33  ;;  %v4849_v33 = vld [vmem:[%s6953_s9 + $0x2] ss:$0 sm:$0xff] }
0x2c5b   :  { %v5756_v62 = vpop.eup %5755 }
0x2c5c   :  { %v4130_v0 = vmul.f32 %v5756_v62, %v5752_v30  ;;  %5446 = vmatmul.mubr.msk.bf16.vlgmr.msra.gmra.mrb[120].mxu1 %vm730_vm2, %v4131_v38 }
0x2c5d   :  { %5459 = vmatprep.mubr.msk.bf16.mxu1 %vm5798_vm1, %v5797_v28  ;;  %5456 = vmatpush3.bf16.msra.mxu1 %v5625_v3 }
0x2c5e   :  { %v4132_v56 = vpack.c.bf16 %v4130_v0, %v4130_v0  ;;  %5457 = vmatprep.subr.bf16.mxu1 %v5797_v28 }
0x2c60   :  { %5452 = vmatmul.mubr.msk.bf16.vlgmr.msra.gmra.mrb[112].mxu0 %vm730_vm2, %v4132_v56  ;;  %v4850_v56 = vld [vmem:[%s6954_s10 + $0x2] ss:$0 sm:$0xff] }
0x2c61   :  { %5467 = vmatprep.mubr.msk.bf16.mxu0 %vm5798_vm1, %v5797_v28  ;;  %5458 = vmatpush3.bf16.msra.mxu1 %v5626_v4 }
0x2c62   :  { %5471 = vmatprep.subr.bf16.mxu1 %v5797_v28  ;;  %5464 = vmatpush3.bf16.msra.mxu0 %v5627_v59 }
0x2c63   :  { %5465 = vmatprep.subr.bf16.mxu0 %v5797_v28 }
0x2c66   :  { %5466 = vmatpush3.bf16.msra.mxu0 %v5628_v58 }
0x2d2f   :  { %v4175_v7 = vpop.f32.mrb[120].mxu1 }
0x2d30   :  { %v5447_v9 = vpop.f32.mrb[121].mxu1 }
0x2d31   :  { %v4178_v5 = vpop.f32.mrb[122].mxu1 }
0x2d32   :  { %v5448_v6 = vpop.f32.mrb[123].mxu1  ;;  %v5629_v5 = vld [vmem:[%s6957_s13 + $0x40] sm:$0xff]  }
0x2d33   :  { %v4223_v52 = vpop.f32.mrb[112].mxu0  ;;  %v5630_v6 = vld [vmem:[%s6957_s13 + $0x48] sm:$0xff]  }
0x2d34   :  { %v5541_v11 = vpack.i.bf16 %v4223_v52, %v4175_v7  ;;  %v5453_v15 = vpop.f32.mrb[113].mxu0  ;;  %v5631_v52 = vld [vmem:[%s6957_s13 + $0x50] sm:$0xff]  }
0x2d35   :  { %v4226_v17 = vpop.f32.mrb[114].mxu0  ;;  %v4856_v15 = vld [vmem:[%s6956_s12 + $0x2] ss:$0 sm:$0xff] }
0x2d36   :  { %v5454_v18 = vpop.f32.mrb[115].mxu0  ;;  %5542 = vrot.lane.b32.xlu0 %v5541_v11, %s6992_s30  ;;  %v5632_v11 = vld [vmem:[%s6957_s13 + $0x58] sm:$0xff]  }
0x2da8   :  { %v5543_v51 = vpop.permute.xlu0 %5542 }
0x2da9   :  { %v5545_v26 = vunpack.i.h.bf16 %v5543_v51  ;;  %v5544_v20 = vunpack.i.l.bf16 %v5543_v51 }
0x2dab   :  { %v4258_v27 = vsel %vm1635_vm6, %v4256_v37, %v5545_v26  ;;  %v4257_v29 = vsel %vm1635_vm6, %v4255_v2, %v5544_v20 }
0x2dac   :  { %v4259_v32 = vpack.c.bf16 %v4258_v27, %v4257_v29  ;;  %v4869_v29 = vld [vmem:[%s6958_s14 + $0x2] ss:$0 sm:$0xff] }
0x2dae   :  { %5460 = vmatmul.mubr.msk.bf16.vlgmr.msra.gmra.mrb[124].mxu1 %vm610_vm0, %v4259_v32 }
0x2daf   :  { %5479 = vmatprep.mubr.msk.bf16.mxu1 %vm5798_vm1, %v5797_v28  ;;  %5472 = vmatpush3.bf16.msra.mxu1 %v5629_v5 }
0x2db0   :  { %5473 = vmatprep.subr.bf16.mxu1 %v5797_v28 }
0x2db3   :  { %5474 = vmatpush3.bf16.msra.mxu1 %v5630_v6 }
0x2db4   :  { %5475 = vmatprep.subr.bf16.mxu1 %v5797_v28 }
0x2db7   :  { %5476 = vmatpush3.bf16.msra.mxu1 %v5631_v52 }
0x2db8   :  { %5477 = vmatprep.subr.bf16.mxu1 %v5797_v28 }
0x2dbb   :  { %5478 = vmatpush3.bf16.msra.mxu1 %v5632_v11 }
0x2e81   :  { %v4322_v43 = vpop.f32.mrb[124].mxu1 }
0x2e82   :  { %v4323_v34 = vadd.f32 %v4843_v39, %v4322_v43  ;;  %v5461_v35 = vpop.f32.mrb[125].mxu1 }
0x2e83   :  { %v4325_v36 = vpop.f32.mrb[126].mxu1 }
0x2e84   :  { %v6867_v23 = vadd.f32 %v4323_v34, %v6641_v10  ;;  %v4326_v40 = vadd.f32 %v4843_v39, %v4325_v36  ;;  %v5462_v47 = vpop.f32.mrb[127].mxu1 }
0x2e86   :  { %v6870_v41 = vadd.f32 %v4326_v40, %v6644_v16  ;;  %v4335_v42 = vsel %vm610_vm0, %v6867_v23, 0.0 }
0x2e87   :  { %4336 = vadd.xlane.f32.xlu1 %v4335_v42 }
0x2e88   :  { %v4338_v44 = vsel %vm610_vm0, %v6870_v41, 0.0 }
0x2e89   :  { %4339 = vadd.xlane.f32.xlu0 %v4338_v44 }
0x2f14   :  { %v4337_v48 = vpop.xlane.xlu1 %4336 }
0x2f15   :  { %v4341_v63 = vmul.f32 0.03125, %v4337_v48 }
0x2f16   :  { %v4340_v50 = vpop.xlane.xlu0 %4339 }
0x2f17   :  { %v4343_v53 = vsub.f32 %v6867_v23, %v4341_v63  ;;  %v4342_v10 = vmul.f32 0.03125, %v4340_v50 }
0x2f19   :  { %v4344_v54 = vsub.f32 %v6870_v41, %v4342_v10  ;;  %v4345_v57 = vmul.f32 %v4343_v53, %v4343_v53 }
0x2f1b   :  { %v4347_v16 = vsel %vm610_vm0, %v4345_v57, 0.0  ;;  %v4346_v13 = vmul.f32 %v4344_v54, %v4344_v54 }
0x2f1c   :  { %4348 = vadd.xlane.f32.xlu0 %v4347_v16 }
0x2f1d   :  { %v4350_v45 = vsel %vm610_vm0, %v4346_v13, 0.0 }
0x2f20   :  { %4351 = vadd.xlane.f32.xlu0 %v4350_v45 }
0x2fa9   :  { %v4349_v1 = vpop.xlane.xlu0 %4348 }
0x2faa   :  { %v4353_v30 = vmul.f32 0.03125, %v4349_v1 }
0x2fac   :  { %v4355_v31 = vadd.f32 1e-06, %v4353_v30  ;;  %v4875_v30 = vld [vmem:[%s6959_s15] ss:$0 sm:$0xff]  ;;  %s5814_s15 = smov [#allocation2]  }
0x2fad   :  { %v4352_v14 = vpop.xlane.xlu0 %4351 }
0x2fae   :  { %5757 = vrsqrt.f32 %v4355_v31  ;;  %v4354_v49 = vmul.f32 0.03125, %v4352_v14 }
0x2fb0   :  { %v4356_v60 = vadd.f32 1e-06, %v4354_v49 }
0x2fb2   :  { %5759 = vrsqrt.f32 %v4356_v60 }
0x2fb8   :  { %v5758_v55 = vpop.eup %5757 }
0x2fb9   :  { %v4359_v61 = vmul.f32 %v5758_v55, %v4343_v53  ;;  %v4876_v55 = vld [vmem:[%s6960_s16] ss:$0 sm:$0xff]  ;;  %s4637_s16 = sshll.u32 %s5814_s15, 4  ;;  %s4638_s16 = int_to_ptr.vmem [resolvable:$true] %s4637_s16 }
0x2fba   :  { %s5773_s29 = scalar_lea.vmem %s4638_s16, 32  ;;  %p5778_p1 = scmp.lt.s32.totalorder %s4638_s16, %s4638_s16 }
0x2fbb   :  { %v4367_v62 = vmul.f32 %v4849_v33, %v4359_v61  ;;  %p5774_p0 = scmp.ne.s32.totalorder %s4638_s16, %s5773_s29  ;;  %p5779_p2 = scmp.lt.s32.totalorder %s5773_s29, %s5773_s29 }
0x2fbc   :  { %v5760_v38 = vpop.eup %5759 }
0x2fbd   :  { %v4360_v0 = vmul.f32 %v5760_v38, %v4344_v54  ;;  %v4375_v4 = vadd.f32 %v4850_v56, %v4367_v62  ;;  %p5780_p3 = por %p5779_p2, %p5778_p1 }
0x2fbf   :  { %v4368_v3 = vmul.f32 %v4849_v33, %v4360_v0  ;;  %p5781_p4 = pnand %p5780_p3, %p5774_p0 }
0x2fc1   :  { %v4376_v7 = vadd.f32 %v4850_v56, %v4368_v3 }
0x2fc3   :  { %v4377_v9 = vpack.c.bf16 %v4376_v7, %v4375_v4 }
0x2fc5   :  { %5468 = vmatmul.mubr.msk.bf16.vlgmr.msra.gmra.mrb[116].mxu0 %vm610_vm0, %v4377_v9 }
0x3098   :  { %v4440_v17 = vpop.f32.mrb[116].mxu0 }
0x3099   :  { %v4441_v18 = vadd.f32 %v4856_v15, %v4440_v17  ;;  %v5469_v19 = vpop.f32.mrb[117].mxu0 }
0x309a   :  { %v4443_v21 = vpop.f32.mrb[118].mxu0 }
0x309b   :  { %v4449_v46 = vmul.f32 0.70710677, %v4441_v18  ;;  %v4444_v22 = vadd.f32 %v4856_v15, %v4443_v21  ;;  %v5470_v8 = vpop.f32.mrb[119].mxu0  ;;  %v4447_v25 = vmul.f32 0.5, %v4441_v18 }
0x309d   :  { %5761 = verf.f32 %v4449_v46  ;;  %v4450_v24 = vmul.f32 0.70710677, %v4444_v22  ;;  %v4448_v26 = vmul.f32 0.5, %v4444_v22 }
0x309f   :  { %5763 = verf.f32 %v4450_v24 }
0x30a7   :  { %v5762_v28 = vpop.eup %5761 }
0x30a8   :  { %v4453_v51 = vadd.f32 1.0, %v5762_v28 }
0x30a9   :  { %v5764_v12 = vpop.eup %5763 }
0x30aa   :  { %v4454_v20 = vadd.f32 1.0, %v5764_v12  ;;  %v4455_v37 = vmul.f32 %v4453_v51, %v4447_v25 }
0x30ac   :  { %v4456_v2 = vmul.f32 %v4454_v20, %v4448_v26 }
0x30ae   :  { %v4457_v27 = vpack.c.bf16 %v4456_v2, %v4455_v37 }
0x30b0   :  { %5480 = vmatmul.mubr.msk.bf16.vlgmr.msra.gmra.mrb[128].mxu1 %vm1870_vm7, %v4457_v27 }
0x3183   :  { %v4536_v32 = vpop.f32.mrb[128].mxu1 }
0x3184   :  { %v5481_v39 = vpop.f32.mrb[129].mxu1  ;;  %v4537_v34 = vadd.f32 %v4869_v29, %v4536_v32 }
0x3185   :  { %v4539_v43 = vpop.f32.mrb[130].mxu1 }
0x3186   :  { %v4540_v35 = vadd.f32 %v4869_v29, %v4539_v43  ;;  %v5482_v36 = vpop.f32.mrb[131].mxu1  ;;  %v4543_v47 = vadd.f32 %v4537_v34, %v6867_v23 }
0x3188   :  { %v4544_v40 = vadd.f32 %v4540_v35, %v6870_v41 }
0x318a   :  { %v4549_v42 = vrot.slane %v4544_v40, 7 }
0x318c   :  { %v4551_v44 = vsel %vm4550_vm8, %v4549_v42, %v4543_v47 }
0x318d   :  { %v4554_v48 = vsel %vm4553_vm9, %v4551_v44, 0.0 }
0x318e   :  { %4555 = vadd.xlane.f32.xlu1 %v4554_v48 }
0x321b   :  { %v4556_v63 = vpop.xlane.xlu1 %4555 }
0x321c   :  { %v4557_v50 = vmul.f32 0.03125, %v4556_v63 }
0x321e   :  { %v4559_v53 = vrot.slane %v4557_v50, 1  ;;  %v4562_v10 = vsub.f32 %v4543_v47, %v4557_v50 }
0x3220   :  { %v4563_v54 = vsub.f32 %v4544_v40, %v4559_v53  ;;  %v4564_v16 = vmul.f32 %v4562_v10, %v4562_v10 }
0x3222   :  { %v4565_v57 = vmul.f32 %v4563_v54, %v4563_v54 }
0x3224   :  { %v4568_v13 = vrot.slane %v4565_v57, 7 }
0x3226   :  { %v4569_v41 = vsel %vm4550_vm8, %v4568_v13, %v4564_v16 }
0x3227   :  { %v4571_v45 = vsel %vm4553_vm9, %v4569_v41, 0.0 }
0x3228   :  { %4572 = vadd.xlane.f32.xlu0 %v4571_v45 }
0x32b5   :  { %v4573_v23 = vpop.xlane.xlu0 %4572 }
0x32b6   :  { %v4574_v59 = vmul.f32 0.03125, %v4573_v23 }
0x32b8   :  { %v4575_v58 = vadd.f32 1e-06, %v4574_v59 }
0x32ba   :  { %5765 = vrsqrt.f32 %v4575_v58 }
0x32c4   :  { %v5766_v1 = vpop.eup %5765 }
0x32c5   :  { %v4578_v31 = vrot.slane %v5766_v1, 1  ;;  %v4581_v14 = vmul.f32 %v5766_v1, %v4562_v10 }
0x32c7   :  { %v4582_v49 = vmul.f32 %v4578_v31, %v4563_v54  ;;  %v4589_v60 = vmul.f32 %v4875_v30, %v4581_v14 }
0x32c9   :  { %v4590_v61 = vmul.f32 %v4875_v30, %v4582_v49  ;;  %v4597_v33 = vadd.f32 %v4876_v55, %v4589_v60 }
0x32cb   :  { %v4598_v38 = vadd.f32 %v4876_v55, %v4590_v61  ;;  %v4599_v0 = vmul.f32 %v4597_v33, %v4597_v33 }
0x32cd   :  { %v4600_v62 = vmul.f32 %v4598_v38, %v4598_v38 }
0x32cf   :  { %v4603_v56 = vrot.slane %v4600_v62, 7 }
0x32d1   :  { %v4604_v3 = vsel %vm4550_vm8, %v4603_v56, %v4599_v0 }
0x32d2   :  { %v4606_v4 = vsel %vm4553_vm9, %v4604_v3, 0.0 }
0x32d3   :  { %4607 = vadd.xlane.f32.xlu1 %v4606_v4 }
0x3360   :  { %v4608_v7 = vpop.xlane.xlu1 %4607 }
0x3361   :  { %5767 = vrsqrt.f32 %v4608_v7  ;;  %vm4611_vm10 = vcmp.eq.f32.partialorder %v4608_v7, inf  ;;  %v4614_v6 = vand.u32 2147483648, %v4608_v7  ;;  %vm4613_vm11 = vcmp.eq.f32.partialorder %v4608_v7, 0.0 }
0x336b   :  { %v5768_v9 = vpop.eup %5767 }
0x336c   :  { %v4610_v5 = vmul.f32 %v5768_v9, %v4608_v7 }
0x336e   :  { %v4612_v52 = vsel %vm4611_vm10, %v4608_v7, %v4610_v5 }
0x336f   :  { %v4615_v11 = vsel %vm4613_vm11, %v4614_v6, %v4612_v52 }
0x3370   :  { %v4616_v15 = vmax.f32 %v4615_v11, 1e-12 }
0x3372   :  { %v4618_v17 = vrot.slane %v4616_v15, 1  ;;  %5769 = vrcp.f32 %v4616_v15 }
0x3374   :  { %5771 = vrcp.f32 %v4618_v17 }
0x337c   :  { %v5770_v18 = vpop.eup %5769 }
0x337d   :  { %v4622_v46 = vmul.f32 %v5770_v18, %v4597_v33 }
0x337e   :  { %v5772_v19 = vpop.eup %5771 }
0x337f   :  { %v4624_v21 = vmul.f32 %v5772_v19, %v4598_v38 }
0x3381   :  { %v4627_v22 = vrot.slane %v4624_v21, 7 }
0x3383   :  { %v4628_v8 = vsel %vm4550_vm8, %v4627_v22, %v4622_v46 }
0x3384   :  { %4630 = vst.msk [vmem:[#allocation2] sm:$0x3] %vm4553_vm9, %v4628_v8 }
0x3385   :  { %5784 = shalt.err (!%p5781_p4)
}
0x3386   :  { %s5785_s27 = scalar_lea.hbm %s6961_s17, 32 }
0x3387   :  { %p5786_p5 = scmp.ne.s32.totalorder %s6961_s17, %s5785_s27  ;;  %p5789_p6 = scmp.lt.u32.totalorder %s5785_s27, %s6961_s17 }
0x3389   :  { %p5791_p7 = pnand %p5789_p6, %p5786_p5 }
0x338b   :  { %5794 = shalt.err (!%p5791_p7)
}
0x338c   :  { %4640 = dma.vmem_to_hbm [thread:$0]  %s4638_s16, 32, %s6961_s17, [#allocation3]  }
0x338d   :  { %5795 = dma.done.wait [#allocation3], 32  }
0x338e   :  { %5796 = vsyncadd [#allocation3], 4294967264 }
0x338f   :  { %4644 = vsyncpa [#allocation3], 1 }

</bundles_post_ra>
